<compile_context>
chip_gen: v5e
topology: v5e:2x2
jax: 0.10.0
libtpu: 0.0.40
codegen_flags: <defaults>
</compile_context>

<pallas_src>
import functools
from dataclasses import dataclass

import numpy as np
import jax
import jax.numpy as jnp
from jax import lax
from jax.experimental import pallas as pl
from jax.experimental.pallas import tpu as pltpu


# ----------------------------------------------------------------------------
# Config (stand-in for the PyTorch `args`)
# ----------------------------------------------------------------------------
@dataclass(frozen=True)
class MapCfg:
    frame_height: int = 32
    frame_width: int = 32
    map_resolution: int = 5
    map_size_cm: int = 480
    global_downscaling: int = 2
    vision_range: int = 16
    hfov: float = 79.0
    du_scale: int = 2
    cat_pred_threshold: float = 5.0
    exp_pred_threshold: float = 1.0
    map_pred_threshold: float = 1.0
    num_sem_categories: int = 4
    camera_height: float = 0.88  # meters


# ----------------------------------------------------------------------------
# Kernel A: point cloud -> separable trilinear splat -> height projections ->
#           rotation grid_sample (fused, matmul form).   grid=(bs,)
# ----------------------------------------------------------------------------
def _project_rotate_kernel(params_ref, depth_ref, gx_ref, gz_ref, feat_ref,
                           bx_ref, by_ref, fp_ref, rot_ref, *,
                           vr, zdim, min_z, max_z, agent_height, shift_x,
                           inv_xy, inv_z, off_xy, off_z,
                           inv_map_thr, inv_exp_thr, inv_cat_thr,
                           m, x1_off, y1_off):
    f32 = jnp.float32
    b = pl.program_id(0)

    # ---- point cloud (elevation 0, shift rotation identity) -> voxel coords ----
    d = depth_ref[0]                                   # (1, nPt) depth, du_scale-strided
    px = (gx_ref[0] * d + shift_x) * inv_xy + off_xy   # x voxel position
    py = d * inv_xy + off_xy                           # y voxel position
    pz = (gz_ref[0] * d + agent_height) * inv_z + off_z

    def corners(pos, dim):
        # faithful to splat_feat_nd: a corner is valid iff 0 < idx < dim
        p0 = jnp.floor(pos)
        p1 = p0 + 1.0
        w0 = 1.0 - (pos - p0)
        w1 = 1.0 - (p1 - pos)
        s0 = ((p0 > 0.0) & (p0 < dim)).astype(f32)
        s1 = ((p1 > 0.0) & (p1 < dim)).astype(f32)
        return (p0.astype(jnp.int32), w0 * s0), (p1.astype(jnp.int32), w1 * s1)

    xc = corners(px, float(vr))
    yc = corners(py, float(vr))
    (z0, wz0), (z1, wz1) = corners(pz, float(zdim))
    in0 = ((z0 >= min_z) & (z0 < max_z)).astype(f32)
    in1 = ((z1 >= min_z) & (z1 < max_z)).astype(f32)
    sz_band = wz0 * in0 + wz1 * in1        # z-weight restricted to [min_z, max_z)
    sz_all = wz0 + wz1                     # z-weight over the full height (exp row)

    npt = d.shape[-1]
    cell = lax.broadcasted_iota(jnp.int32, (vr, npt), 0)

    def axis_onehot(cn):
        (i0, w0), (i1, w1) = cn
        return jnp.where(cell == i0, w0, 0.0) + jnp.where(cell == i1, w1, 0.0)

    wx1h = axis_onehot(xc)                 # (vr, nPt) x-cell corner weights
    wy1h = axis_onehot(yc)                 # (vr, nPt) y-cell corner weights

    # feat rows: [ones (map), ones (exp), sem_0 .. sem_{n-1}]
    feat = feat_ref[0]                     # (nF, nPt)
    nF = feat.shape[0]
    row = lax.broadcasted_iota(jnp.int32, feat.shape, 0)
    zw = jnp.where(row == 1, sz_all, sz_band)
    scale = jnp.where(row == 0, inv_map_thr,
                      jnp.where(row == 1, inv_exp_thr, inv_cat_thr))
    a = feat * zw * scale                  # threshold scaling folded in (linear)

    # separable splat: expand over x-cells, contract the point axis against the
    # y one-hot -> (nF*vr, vr) with rows (feat, xcell) and minor dim = ycell
    a1 = (a[:, None, :] * wx1h[None, :, :]).reshape(nF * vr, npt)
    proj = lax.dot_general(a1, wy1h, (((1,), (1,)), ((), ())),
                           preferred_element_type=f32)
    local = jnp.clip(proj, 0.0, 1.0)       # clamped agent-centric projections

    # channel 0 in raw [x][y] splat order; the wrapper transposes to [y][x]
    fp_ref[0, 0] = local[0:vr, :]

    # ---- rotation grid_sample fused in: per-destination bilinear one-hots over the
    #      (vr x vr) patch (agent_view is exactly zero outside the patch) ----------
    cos_r = params_ref[b, 0]
    sin_r = params_ref[b, 1]
    bx = bx_ref[0]                          # (1, m*m) affine_grid base x (align_corners=True)
    by = by_ref[0]                          # (1, m*m) affine_grid base y
    pxr = (cos_r * bx - sin_r * by + 1.0) * (0.5 * (m - 1.0))   # source col (pixels)
    pyr = (sin_r * bx + cos_r * by + 1.0) * (0.5 * (m - 1.0))   # source row (pixels)

    mm = bx.shape[-1]
    krng = lax.broadcasted_iota(jnp.int32, (vr, mm), 0)

    def resample_onehot(pos, off):
        # out-of-patch / out-of-image corners fall outside [0, vr) -> weight 0,
        # which reproduces both the zeros padding and the zero background.
        p0 = jnp.floor(pos)
        w1 = pos - p0
        i0 = p0.astype(jnp.int32) - off
        return (jnp.where(krng == i0, 1.0 - w1, 0.0)
                + jnp.where(krng == i0 + 1, w1, 0.0))

    ry = resample_onehot(pyr, y1_off)       # (vr, m*m) source-row weights
    rx = resample_onehot(pxr, x1_off)       # (vr, m*m) source-col weights

    g = jnp.dot(local, ry, preferred_element_type=f32)   # (nF*vr, m*m) on the MXU
    g3 = g.reshape(nF, vr, mm)
    rot_ref[0] = jnp.sum(g3 * rx[None, :, :], axis=1)    # (nF, m*m) lane-dense


def _project_and_rotate(params, depth, gx, gz, feat, bx, by, *, kcfg):
    bs = depth.shape[0]
    npt = depth.shape[-1]
    nF = feat.shape[1]
    vr = kcfg["vr"]
    mm = bx.shape[-1]
    kern = functools.partial(_project_rotate_kernel, **kcfg)
    return pl.pallas_call(
        kern,
        out_shape=(jax.ShapeDtypeStruct((bs, 1, vr, vr), jnp.float32),
                   jax.ShapeDtypeStruct((bs, nF, mm), jnp.float32)),
        grid=(bs,),
        in_specs=[
            pl.BlockSpec(memory_space=pltpu.MemorySpace.SMEM),     # pose scalars
            pl.BlockSpec((1, 1, npt), lambda b: (b, 0, 0)),        # depth
            pl.BlockSpec((1, 1, npt), lambda b: (0, 0, 0)),        # (grid_x - xc)/f
            pl.BlockSpec((1, 1, npt), lambda b: (0, 0, 0)),        # (grid_z - zc)/f
            pl.BlockSpec((1, nF, npt), lambda b: (b, 0, 0)),       # feat rows
            pl.BlockSpec((1, 1, mm), lambda b: (0, 0, 0)),         # base grid x
            pl.BlockSpec((1, 1, mm), lambda b: (0, 0, 0)),         # base grid y
        ],
        out_specs=(
            pl.BlockSpec((1, 1, vr, vr), lambda b: (b, 0, 0, 0)),
            pl.BlockSpec((1, nF, mm), lambda b: (b, 0, 0)),
        ),
        compiler_params=pltpu.CompilerParams(dimension_semantics=("parallel",)),
    )(params, depth, gx, gz, feat, bx, by)


# ----------------------------------------------------------------------------
# Kernel B: translation grid_sample (separable -> 1 big + batched matmul) + max
# ----------------------------------------------------------------------------
def _translate_max_kernel(params_ref, rot_ref, maps_ref, out_ref):
    f32 = jnp.float32
    b = pl.program_id(0)
    sx = params_ref[b, 2]                  # source-col shift in pixels
    sy = params_ref[b, 3]                  # source-row shift in pixels

    nF = rot_ref.shape[1]
    m = rot_ref.shape[-1]

    ir = lax.broadcasted_iota(jnp.int32, (m, m), 0)
    ic = lax.broadcasted_iota(jnp.int32, (m, m), 1)

    # column operator: aut[u, j] = bilinear weight of source col u for output col j
    su = ic.astype(f32) + sx
    u0 = jnp.floor(su)
    wu = su - u0
    u0i = u0.astype(jnp.int32)
    aut = jnp.where(ir == u0i, 1.0 - wu, 0.0) + jnp.where(ir == u0i + 1, wu, 0.0)

    # row operator: av[i, v] = bilinear weight of source row v for output row i
    sv = ir.astype(f32) + sy
    v0 = jnp.floor(sv)
    wv = sv - v0
    v0i = v0.astype(jnp.int32)
    av = jnp.where(ic == v0i, 1.0 - wv, 0.0) + jnp.where(ic == v0i + 1, wv, 0.0)

    rot = rot_ref[0]                                          # (nF, m, m)
    t1 = jnp.dot(rot.reshape(nF * m, m), aut,                 # one (nF*m, m) matmul
                 preferred_element_type=f32).reshape(nF, m, m)
    av_b = jnp.broadcast_to(av[None], (nF, m, m))
    tr = lax.dot_general(av_b, t1, (((2,), (1,)), ((0,), (0,))),
                         preferred_element_type=f32)          # (nF, m, m)

    maps = maps_ref[0]                                        # (c, m, m)
    out_ref[0, 0:2] = jnp.maximum(maps[0:2], tr[0:2])         # map / exp channels
    out_ref[0, 2:4] = jnp.maximum(maps[2:4], 0.0)             # agent_view chans 2,3 are zero
    out_ref[0, 4:] = jnp.maximum(maps[4:], tr[2:])            # semantic channels


def _translate_and_fuse(params, rotated, maps_last):
    bs, c, m, _ = maps_last.shape
    nF = rotated.shape[1]
    return pl.pallas_call(
        _translate_max_kernel,
        out_shape=jax.ShapeDtypeStruct((bs, c, m, m), jnp.float32),
        grid=(bs,),
        in_specs=[
            pl.BlockSpec(memory_space=pltpu.MemorySpace.SMEM),
            pl.BlockSpec((1, nF, m, m), lambda b: (b, 0, 0, 0)),
            pl.BlockSpec((1, c, m, m), lambda b: (b, 0, 0, 0)),
        ],
        out_specs=pl.BlockSpec((1, c, m, m), lambda b: (b, 0, 0, 0)),
        compiler_params=pltpu.CompilerParams(dimension_semantics=("parallel",)),
    )(params, rotated, maps_last)


# ----------------------------------------------------------------------------
# Semantic_Mapping.forward
# ----------------------------------------------------------------------------
def semantic_mapping_forward(cfg, obs, pose_obs, maps_last, poses_last):
    obs = obs.astype(jnp.float32)
    pose_obs = pose_obs.astype(jnp.float32)
    maps_last = maps_last.astype(jnp.float32)
    poses_last = poses_last.astype(jnp.float32)

    bs, c, h, w = obs.shape
    s = cfg.du_scale
    hp, wp = h // s, w // s
    npt = hp * wp
    vr = cfg.vision_range
    res = float(cfg.map_resolution)
    z_res = float(cfg.map_resolution)
    max_h = int(360 / z_res)
    min_h = int(-40 / z_res)
    zdim = max_h - min_h
    agent_height = cfg.camera_height * 100.0
    shift_x = float(vr * cfg.map_resolution // 2)
    min_z = int(25 / z_res - min_h)
    max_z = int((agent_height + 1) / z_res - min_h)
    map_cm = cfg.map_size_cm // cfg.global_downscaling
    m = map_cm // cfg.map_resolution
    half = map_cm // (cfg.map_resolution * 2)
    nsem = cfg.num_sem_categories
    nF = nsem + 2
    assert c == nsem + 4

    # camera geometry (du.get_camera_matrix / get_point_cloud_from_z_t, strided)
    xc_cam = (w - 1.0) / 2.0
    zc_cam = (h - 1.0) / 2.0
    f_cam = (w / 2.0) / np.tan(np.deg2rad(cfg.hfov / 2.0))
    jj = jnp.arange(wp, dtype=jnp.float32) * s
    ii = jnp.arange(hp, dtype=jnp.float32) * s
    gx = jnp.broadcast_to(((jj - xc_cam) / f_cam)[None, :], (hp, wp)).reshape(1, 1, npt)
    gz = jnp.broadcast_to((((h - 1.0) - ii - zc_cam) / f_cam)[:, None],
                          (hp, wp)).reshape(1, 1, npt)

    # per-point inputs: strided depth + AvgPool2d(du_scale) of the semantic channels
    depth_sub = obs[:, 3, ::s, ::s].reshape(bs, 1, npt)
    feat_sem = obs[:, 4:, :, :].reshape(bs, nsem, hp, s, wp, s).mean(axis=(3, 5))
    feat_plus = jnp.concatenate(
        [jnp.ones((bs, 2, npt), jnp.float32), feat_sem.reshape(bs, nsem, npt)], axis=1)

    # affine_grid base coordinates (align_corners=True), flattened lane-dense
    lin = jnp.linspace(-1.0, 1.0, m, dtype=jnp.float32)
    bx = jnp.broadcast_to(lin[None, :], (m, m)).reshape(1, 1, m * m)
    by = jnp.broadcast_to(lin[:, None], (m, m)).reshape(1, 1, m * m)

    # pose integration (get_new_pose_batch)
    rad = poses_last[:, 2] / 57.29577951308232
    sin_t = jnp.sin(rad)
    cos_t = jnp.cos(rad)
    new_y = poses_last[:, 1] + pose_obs[:, 0] * sin_t + pose_obs[:, 1] * cos_t
    new_x = poses_last[:, 0] + pose_obs[:, 0] * cos_t - pose_obs[:, 1] * sin_t
    new_o = poses_last[:, 2] + pose_obs[:, 2] * 57.29577951308232
    new_o = jnp.fmod(new_o - 180.0, 360.0) + 180.0
    new_o = jnp.fmod(new_o + 180.0, 360.0) - 180.0
    current_poses = jnp.stack([new_x, new_y, new_o], axis=1)
    pose_pred = current_poses  # torch returns the in-place-updated poses_last (aliased)

    # spatial-transform parameters (get_grid), shared by both kernels through SMEM
    st_x = -(current_poses[:, 0] * 100.0 / res - half) / half
    st_y = -(current_poses[:, 1] * 100.0 / res - half) / half
    rot_rad = (90.0 - current_poses[:, 2]) * (np.pi / 180.0)
    params = jnp.stack([jnp.cos(rot_rad), jnp.sin(rot_rad),
                        st_x * (m - 1) / 2.0, st_y * (m - 1) / 2.0], axis=1)

    kcfg = dict(vr=vr, zdim=zdim, min_z=min_z, max_z=max_z,
                agent_height=agent_height, shift_x=shift_x,
                inv_xy=1.0 / res, inv_z=1.0 / z_res,
                off_xy=vr / 2.0 - float(vr // 2),
                off_z=zdim / 2.0 - float((max_h + min_h) // 2),
                inv_map_thr=1.0 / cfg.map_pred_threshold,
                inv_exp_thr=1.0 / cfg.exp_pred_threshold,
                inv_cat_thr=1.0 / cfg.cat_pred_threshold,
                m=m, x1_off=half - vr // 2, y1_off=half)

    fp_raw, rot_flat = _project_and_rotate(params, depth_sub, gx, gz, feat_plus,
                                           bx, by, kcfg=kcfg)
    fp_map_pred = jnp.swapaxes(fp_raw, 2, 3)        # raw splat is [x][y]; torch is [y][x]
    rotated = rot_flat.reshape(bs, nF, m, m)        # free metadata reshape in the wrapper

    map_pred = _translate_and_fuse(params, rotated, maps_last)

    return fp_map_pred, map_pred, pose_pred, current_poses


# ----------------------------------------------------------------------------
# Demo
# ----------------------------------------------------------------------------
if __name__ == "__main__":
    cfg = MapCfg()
    key = jax.random.PRNGKey(0)
    k_obs, k_pose, k_map, k_ang = jax.random.split(key, 4)

    bs = 2
    c = cfg.num_sem_categories + 4
    h, w = cfg.frame_height, cfg.frame_width
    m = (cfg.map_size_cm // cfg.global_downscaling) // cfg.map_resolution

    obs = jax.random.uniform(k_obs, (bs, c, h, w), jnp.float32)
    obs = obs.at[:, 3].set(obs[:, 3] * 80.0 + 20.0)          # depth channel in cm
    pose_obs = jax.random.uniform(k_pose, (bs, 3), jnp.float32, minval=-0.2, maxval=0.2)
    maps_last = jax.random.uniform(k_map, (bs, c, m, m), jnp.float32)
    center_m = (cfg.map_size_cm // cfg.global_downscaling) / 100.0 / 2.0
    poses_last = jnp.stack(
        [jnp.full((bs,), center_m, jnp.float32),
         jnp.full((bs,), center_m, jnp.float32),
         jax.random.uniform(k_ang, (bs,), jnp.float32, minval=-180.0, maxval=180.0)],
        axis=1)

    fwd = jax.jit(functools.partial(semantic_mapping_forward, cfg))
    fp_map_pred, map_pred, pose_pred, current_poses = fwd(obs, pose_obs, maps_last, poses_last)
    jax.block_until_ready((fp_map_pred, map_pred, pose_pred, current_poses))

    assert fp_map_pred.shape == (bs, 1, cfg.vision_range, cfg.vision_range)
    assert map_pred.shape == (bs, c, m, m)
    assert pose_pred.shape == (bs, 3) and current_poses.shape == (bs, 3)
    assert bool(jnp.isfinite(map_pred).all()) and bool(jnp.isfinite(fp_map_pred).all())
    print("KERNEL_OK")
</pallas_src>

<mosaic_0001>
module attributes {stable_mosaic.version = 11 : i64} {
  func.func @_project_rotate_kernel(%arg0: i32, %arg1: memref<2x4xf32, #tpu.memory_space<smem>>, %arg2: memref<1x1x256xf32, #tpu.memory_space<vmem>>, %arg3: memref<1x1x256xf32, #tpu.memory_space<vmem>>, %arg4: memref<1x1x256xf32, #tpu.memory_space<vmem>>, %arg5: memref<1x6x256xf32, #tpu.memory_space<vmem>>, %arg6: memref<1x1x2304xf32, #tpu.memory_space<vmem>>, %arg7: memref<1x1x2304xf32, #tpu.memory_space<vmem>>, %arg8: memref<1x1x16x16xf32, #tpu.memory_space<vmem>>, %arg9: memref<1x6x2304xf32, #tpu.memory_space<vmem>>) attributes {dimension_semantics = [#tpu.dimension_semantics<parallel>], iteration_bounds = array<i64: 2>, scalar_prefetch = 0 : i64, scratch_operands = 0 : i64, tpu.core_type = #tpu.core_type<tc>, window_params = [{transform_indices = @transform_0, window_bounds = array<i64: 2, 4>}, {transform_indices = @transform_1, window_bounds = array<i64: 1, 1, 256>}, {pipeline_mode = #tpu.pipeline_mode<synchronous>, transform_indices = @transform_2, window_bounds = array<i64: 1, 1, 256>}, {pipeline_mode = #tpu.pipeline_mode<synchronous>, transform_indices = @transform_3, window_bounds = array<i64: 1, 1, 256>}, {transform_indices = @transform_4, window_bounds = array<i64: 1, 6, 256>}, {pipeline_mode = #tpu.pipeline_mode<synchronous>, transform_indices = @transform_5, window_bounds = array<i64: 1, 1, 2304>}, {pipeline_mode = #tpu.pipeline_mode<synchronous>, transform_indices = @transform_6, window_bounds = array<i64: 1, 1, 2304>}, {transform_indices = @transform_7, window_bounds = array<i64: 1, 1, 16, 16>}, {transform_indices = @transform_8, window_bounds = array<i64: 1, 6, 2304>}]} {
    %c0 = arith.constant 0 : index
    %c0_0 = arith.constant 0 : index
    %c0_1 = arith.constant 0 : index
    %0 = vector.load %arg2[%c0, %c0_0, %c0_1] : memref<1x1x256xf32, #tpu.memory_space<vmem>>, vector<1x1x256xf32>
    %1 = vector.shape_cast %0 : vector<1x1x256xf32> to vector<1x256xf32>
    %c0_2 = arith.constant 0 : index
    %c0_3 = arith.constant 0 : index
    %c0_4 = arith.constant 0 : index
    %2 = vector.load %arg3[%c0_2, %c0_3, %c0_4] : memref<1x1x256xf32, #tpu.memory_space<vmem>>, vector<1x1x256xf32>
    %3 = vector.shape_cast %2 : vector<1x1x256xf32> to vector<1x256xf32>
    %4 = arith.mulf %3, %1 : vector<1x256xf32>
    %cst = arith.constant 4.000000e+01 : f32
    %5 = vector.broadcast %cst : f32 to vector<1x256xf32>
    %6 = arith.addf %4, %5 : vector<1x256xf32>
    %cst_5 = arith.constant 2.000000e-01 : f32
    %7 = vector.broadcast %cst_5 : f32 to vector<1x256xf32>
    %8 = arith.mulf %6, %7 : vector<1x256xf32>
    %cst_6 = arith.constant 0.000000e+00 : f32
    %9 = vector.broadcast %cst_6 : f32 to vector<1x256xf32>
    %10 = arith.addf %8, %9 : vector<1x256xf32>
    %cst_7 = arith.constant 2.000000e-01 : f32
    %11 = vector.broadcast %cst_7 : f32 to vector<1x256xf32>
    %12 = arith.mulf %1, %11 : vector<1x256xf32>
    %cst_8 = arith.constant 0.000000e+00 : f32
    %13 = vector.broadcast %cst_8 : f32 to vector<1x256xf32>
    %14 = arith.addf %12, %13 : vector<1x256xf32>
    %c0_9 = arith.constant 0 : index
    %c0_10 = arith.constant 0 : index
    %c0_11 = arith.constant 0 : index
    %15 = vector.load %arg4[%c0_9, %c0_10, %c0_11] : memref<1x1x256xf32, #tpu.memory_space<vmem>>, vector<1x1x256xf32>
    %16 = vector.shape_cast %15 : vector<1x1x256xf32> to vector<1x256xf32>
    %17 = arith.mulf %16, %1 : vector<1x256xf32>
    %cst_12 = arith.constant 8.800000e+01 : f32
    %18 = vector.broadcast %cst_12 : f32 to vector<1x256xf32>
    %19 = arith.addf %17, %18 : vector<1x256xf32>
    %cst_13 = arith.constant 2.000000e-01 : f32
    %20 = vector.broadcast %cst_13 : f32 to vector<1x256xf32>
    %21 = arith.mulf %19, %20 : vector<1x256xf32>
    %cst_14 = arith.constant 8.000000e+00 : f32
    %22 = vector.broadcast %cst_14 : f32 to vector<1x256xf32>
    %23 = arith.addf %21, %22 : vector<1x256xf32>
    %24 = math.floor %10 : vector<1x256xf32>
    %cst_15 = arith.constant 1.000000e+00 : f32
    %25 = vector.broadcast %cst_15 : f32 to vector<1x256xf32>
    %26 = arith.addf %24, %25 : vector<1x256xf32>
    %27 = arith.subf %10, %24 : vector<1x256xf32>
    %cst_16 = arith.constant 1.000000e+00 : f32
    %28 = vector.broadcast %cst_16 : f32 to vector<1x256xf32>
    %29 = arith.subf %28, %27 : vector<1x256xf32>
    %30 = arith.subf %26, %10 : vector<1x256xf32>
    %cst_17 = arith.constant 1.000000e+00 : f32
    %31 = vector.broadcast %cst_17 : f32 to vector<1x256xf32>
    %32 = arith.subf %31, %30 : vector<1x256xf32>
    %cst_18 = arith.constant 0.000000e+00 : f32
    %33 = vector.broadcast %cst_18 : f32 to vector<1x256xf32>
    %34 = arith.cmpf ogt, %24, %33 : vector<1x256xf32>
    %cst_19 = arith.constant 1.600000e+01 : f32
    %35 = vector.broadcast %cst_19 : f32 to vector<1x256xf32>
    %36 = arith.cmpf olt, %24, %35 : vector<1x256xf32>
    %37 = arith.andi %34, %36 : vector<1x256xi1>
    %38 = arith.extui %37 : vector<1x256xi1> to vector<1x256xi32>
    %39 = arith.sitofp %38 : vector<1x256xi32> to vector<1x256xf32>
    %cst_20 = arith.constant 0.000000e+00 : f32
    %40 = vector.broadcast %cst_20 : f32 to vector<1x256xf32>
    %41 = arith.cmpf ogt, %26, %40 : vector<1x256xf32>
    %cst_21 = arith.constant 1.600000e+01 : f32
    %42 = vector.broadcast %cst_21 : f32 to vector<1x256xf32>
    %43 = arith.cmpf olt, %26, %42 : vector<1x256xf32>
    %44 = arith.andi %41, %43 : vector<1x256xi1>
    %45 = arith.extui %44 : vector<1x256xi1> to vector<1x256xi32>
    %46 = arith.sitofp %45 : vector<1x256xi32> to vector<1x256xf32>
    %47 = arith.fptosi %24 : vector<1x256xf32> to vector<1x256xi32>
    %48 = arith.mulf %29, %39 : vector<1x256xf32>
    %49 = arith.fptosi %26 : vector<1x256xf32> to vector<1x256xi32>
    %50 = arith.mulf %32, %46 : vector<1x256xf32>
    %51 = math.floor %14 : vector<1x256xf32>
    %cst_22 = arith.constant 1.000000e+00 : f32
    %52 = vector.broadcast %cst_22 : f32 to vector<1x256xf32>
    %53 = arith.addf %51, %52 : vector<1x256xf32>
    %54 = arith.subf %14, %51 : vector<1x256xf32>
    %cst_23 = arith.constant 1.000000e+00 : f32
    %55 = vector.broadcast %cst_23 : f32 to vector<1x256xf32>
    %56 = arith.subf %55, %54 : vector<1x256xf32>
    %57 = arith.subf %53, %14 : vector<1x256xf32>
    %cst_24 = arith.constant 1.000000e+00 : f32
    %58 = vector.broadcast %cst_24 : f32 to vector<1x256xf32>
    %59 = arith.subf %58, %57 : vector<1x256xf32>
    %cst_25 = arith.constant 0.000000e+00 : f32
    %60 = vector.broadcast %cst_25 : f32 to vector<1x256xf32>
    %61 = arith.cmpf ogt, %51, %60 : vector<1x256xf32>
    %cst_26 = arith.constant 1.600000e+01 : f32
    %62 = vector.broadcast %cst_26 : f32 to vector<1x256xf32>
    %63 = arith.cmpf olt, %51, %62 : vector<1x256xf32>
    %64 = arith.andi %61, %63 : vector<1x256xi1>
    %65 = arith.extui %64 : vector<1x256xi1> to vector<1x256xi32>
    %66 = arith.sitofp %65 : vector<1x256xi32> to vector<1x256xf32>
    %cst_27 = arith.constant 0.000000e+00 : f32
    %67 = vector.broadcast %cst_27 : f32 to vector<1x256xf32>
    %68 = arith.cmpf ogt, %53, %67 : vector<1x256xf32>
    %cst_28 = arith.constant 1.600000e+01 : f32
    %69 = vector.broadcast %cst_28 : f32 to vector<1x256xf32>
    %70 = arith.cmpf olt, %53, %69 : vector<1x256xf32>
    %71 = arith.andi %68, %70 : vector<1x256xi1>
    %72 = arith.extui %71 : vector<1x256xi1> to vector<1x256xi32>
    %73 = arith.sitofp %72 : vector<1x256xi32> to vector<1x256xf32>
    %74 = arith.fptosi %51 : vector<1x256xf32> to vector<1x256xi32>
    %75 = arith.mulf %56, %66 : vector<1x256xf32>
    %76 = arith.fptosi %53 : vector<1x256xf32> to vector<1x256xi32>
    %77 = arith.mulf %59, %73 : vector<1x256xf32>
    %78 = math.floor %23 : vector<1x256xf32>
    %cst_29 = arith.constant 1.000000e+00 : f32
    %79 = vector.broadcast %cst_29 : f32 to vector<1x256xf32>
    %80 = arith.addf %78, %79 : vector<1x256xf32>
    %81 = arith.subf %23, %78 : vector<1x256xf32>
    %cst_30 = arith.constant 1.000000e+00 : f32
    %82 = vector.broadcast %cst_30 : f32 to vector<1x256xf32>
    %83 = arith.subf %82, %81 : vector<1x256xf32>
    %84 = arith.subf %80, %23 : vector<1x256xf32>
    %cst_31 = arith.constant 1.000000e+00 : f32
    %85 = vector.broadcast %cst_31 : f32 to vector<1x256xf32>
    %86 = arith.subf %85, %84 : vector<1x256xf32>
    %cst_32 = arith.constant 0.000000e+00 : f32
    %87 = vector.broadcast %cst_32 : f32 to vector<1x256xf32>
    %88 = arith.cmpf ogt, %78, %87 : vector<1x256xf32>
    %cst_33 = arith.constant 8.000000e+01 : f32
    %89 = vector.broadcast %cst_33 : f32 to vector<1x256xf32>
    %90 = arith.cmpf olt, %78, %89 : vector<1x256xf32>
    %91 = arith.andi %88, %90 : vector<1x256xi1>
    %92 = arith.extui %91 : vector<1x256xi1> to vector<1x256xi32>
    %93 = arith.sitofp %92 : vector<1x256xi32> to vector<1x256xf32>
    %cst_34 = arith.constant 0.000000e+00 : f32
    %94 = vector.broadcast %cst_34 : f32 to vector<1x256xf32>
    %95 = arith.cmpf ogt, %80, %94 : vector<1x256xf32>
    %cst_35 = arith.constant 8.000000e+01 : f32
    %96 = vector.broadcast %cst_35 : f32 to vector<1x256xf32>
    %97 = arith.cmpf olt, %80, %96 : vector<1x256xf32>
    %98 = arith.andi %95, %97 : vector<1x256xi1>
    %99 = arith.extui %98 : vector<1x256xi1> to vector<1x256xi32>
    %100 = arith.sitofp %99 : vector<1x256xi32> to vector<1x256xf32>
    %101 = arith.fptosi %78 : vector<1x256xf32> to vector<1x256xi32>
    %102 = arith.mulf %83, %93 : vector<1x256xf32>
    %103 = arith.fptosi %80 : vector<1x256xf32> to vector<1x256xi32>
    %104 = arith.mulf %86, %100 : vector<1x256xf32>
    %c13_i32 = arith.constant 13 : i32
    %105 = vector.broadcast %c13_i32 : i32 to vector<1x256xi32>
    %106 = arith.cmpi sge, %101, %105 : vector<1x256xi32>
    %c25_i32 = arith.constant 25 : i32
    %107 = vector.broadcast %c25_i32 : i32 to vector<1x256xi32>
    %108 = arith.cmpi slt, %101, %107 : vector<1x256xi32>
    %109 = arith.andi %106, %108 : vector<1x256xi1>
    %110 = arith.extui %109 : vector<1x256xi1> to vector<1x256xi32>
    %111 = arith.sitofp %110 : vector<1x256xi32> to vector<1x256xf32>
    %c13_i32_36 = arith.constant 13 : i32
    %112 = vector.broadcast %c13_i32_36 : i32 to vector<1x256xi32>
    %113 = arith.cmpi sge, %103, %112 : vector<1x256xi32>
    %c25_i32_37 = arith.constant 25 : i32
    %114 = vector.broadcast %c25_i32_37 : i32 to vector<1x256xi32>
    %115 = arith.cmpi slt, %103, %114 : vector<1x256xi32>
    %116 = arith.andi %113, %115 : vector<1x256xi1>
    %117 = arith.extui %116 : vector<1x256xi1> to vector<1x256xi32>
    %118 = arith.sitofp %117 : vector<1x256xi32> to vector<1x256xf32>
    %119 = arith.mulf %102, %111 : vector<1x256xf32>
    %120 = arith.mulf %104, %118 : vector<1x256xf32>
    %121 = arith.addf %119, %120 : vector<1x256xf32>
    %122 = arith.addf %102, %104 : vector<1x256xf32>
    %123 = tpu.iota {dimensions = array<i32: 0>} : vector<16x256xi32>
    %124 = vector.broadcast %47 : vector<1x256xi32> to vector<16x256xi32>
    %125 = arith.cmpi eq, %123, %124 : vector<16x256xi32>
    %cst_38 = arith.constant 0.000000e+00 : f32
    %126 = vector.shape_cast %48 : vector<1x256xf32> to vector<1x256xf32>
    %127 = vector.broadcast %126 : vector<1x256xf32> to vector<16x256xf32>
    %128 = vector.broadcast %cst_38 : f32 to vector<16x256xf32>
    %129 = arith.select %125, %127, %128 : vector<16x256xi1>, vector<16x256xf32>
    %130 = vector.broadcast %49 : vector<1x256xi32> to vector<16x256xi32>
    %131 = arith.cmpi eq, %123, %130 : vector<16x256xi32>
    %cst_39 = arith.constant 0.000000e+00 : f32
    %132 = vector.shape_cast %50 : vector<1x256xf32> to vector<1x256xf32>
    %133 = vector.broadcast %132 : vector<1x256xf32> to vector<16x256xf32>
    %134 = vector.broadcast %cst_39 : f32 to vector<16x256xf32>
    %135 = arith.select %131, %133, %134 : vector<16x256xi1>, vector<16x256xf32>
    %136 = arith.addf %129, %135 : vector<16x256xf32>
    %137 = vector.broadcast %74 : vector<1x256xi32> to vector<16x256xi32>
    %138 = arith.cmpi eq, %123, %137 : vector<16x256xi32>
    %cst_40 = arith.constant 0.000000e+00 : f32
    %139 = vector.shape_cast %75 : vector<1x256xf32> to vector<1x256xf32>
    %140 = vector.broadcast %139 : vector<1x256xf32> to vector<16x256xf32>
    %141 = vector.broadcast %cst_40 : f32 to vector<16x256xf32>
    %142 = arith.select %138, %140, %141 : vector<16x256xi1>, vector<16x256xf32>
    %143 = vector.broadcast %76 : vector<1x256xi32> to vector<16x256xi32>
    %144 = arith.cmpi eq, %123, %143 : vector<16x256xi32>
    %cst_41 = arith.constant 0.000000e+00 : f32
    %145 = vector.shape_cast %77 : vector<1x256xf32> to vector<1x256xf32>
    %146 = vector.broadcast %145 : vector<1x256xf32> to vector<16x256xf32>
    %147 = vector.broadcast %cst_41 : f32 to vector<16x256xf32>
    %148 = arith.select %144, %146, %147 : vector<16x256xi1>, vector<16x256xf32>
    %149 = arith.addf %142, %148 : vector<16x256xf32>
    %c0_42 = arith.constant 0 : index
    %c0_43 = arith.constant 0 : index
    %c0_44 = arith.constant 0 : index
    %150 = vector.load %arg5[%c0_42, %c0_43, %c0_44] : memref<1x6x256xf32, #tpu.memory_space<vmem>>, vector<1x6x256xf32>
    %151 = vector.shape_cast %150 : vector<1x6x256xf32> to vector<6x256xf32>
    %152 = tpu.iota {dimensions = array<i32: 0>} : vector<6x256xi32>
    %c1_i32 = arith.constant 1 : i32
    %153 = vector.broadcast %c1_i32 : i32 to vector<6x256xi32>
    %154 = arith.cmpi eq, %152, %153 : vector<6x256xi32>
    %155 = vector.shape_cast %122 : vector<1x256xf32> to vector<1x256xf32>
    %156 = vector.broadcast %155 : vector<1x256xf32> to vector<6x256xf32>
    %157 = vector.shape_cast %121 : vector<1x256xf32> to vector<1x256xf32>
    %158 = vector.broadcast %157 : vector<1x256xf32> to vector<6x256xf32>
    %159 = arith.select %154, %156, %158 : vector<6x256xi1>, vector<6x256xf32>
    %c0_i32 = arith.constant 0 : i32
    %160 = vector.broadcast %c0_i32 : i32 to vector<6x256xi32>
    %161 = arith.cmpi eq, %152, %160 : vector<6x256xi32>
    %c1_i32_45 = arith.constant 1 : i32
    %162 = vector.broadcast %c1_i32_45 : i32 to vector<6x256xi32>
    %163 = arith.cmpi eq, %152, %162 : vector<6x256xi32>
    %cst_46 = arith.constant 1.000000e+00 : f32
    %cst_47 = arith.constant 2.000000e-01 : f32
    %164 = vector.broadcast %cst_46 : f32 to vector<6x256xf32>
    %165 = vector.broadcast %cst_47 : f32 to vector<6x256xf32>
    %166 = arith.select %163, %164, %165 : vector<6x256xi1>, vector<6x256xf32>
    %cst_48 = arith.constant 1.000000e+00 : f32
    %167 = vector.broadcast %cst_48 : f32 to vector<6x256xf32>
    %168 = arith.select %161, %167, %166 : vector<6x256xi1>, vector<6x256xf32>
    %169 = arith.mulf %151, %159 : vector<6x256xf32>
    %170 = arith.mulf %169, %168 : vector<6x256xf32>
    %171 = vector.shape_cast %170 : vector<6x256xf32> to vector<6x1x256xf32>
    %172 = vector.shape_cast %136 : vector<16x256xf32> to vector<1x16x256xf32>
    %173 = vector.broadcast %171 : vector<6x1x256xf32> to vector<6x16x256xf32>
    %174 = vector.broadcast %172 : vector<1x16x256xf32> to vector<6x16x256xf32>
    %175 = arith.mulf %173, %174 : vector<6x16x256xf32>
    %176 = vector.shape_cast %175 : vector<6x16x256xf32> to vector<96x256xf32>
    %cst_49 = arith.constant dense<0.000000e+00> : vector<96x16xf32>
    %177 = tpu.matmul %176, %149, %cst_49 {dimension_numbers = #tpu.dot_dimension_numbers<[1], [1], [0], [0], [0, 0, 1, 0], [], []>} : vector<96x256xf32>, vector<16x256xf32>, vector<96x16xf32> -> vector<96x16xf32>
    %cst_50 = arith.constant 0.000000e+00 : f32
    %cst_51 = arith.constant 1.000000e+00 : f32
    %178 = vector.broadcast %cst_50 : f32 to vector<96x16xf32>
    %179 = arith.maximumf %178, %177 : vector<96x16xf32>
    %180 = vector.broadcast %cst_51 : f32 to vector<96x16xf32>
    %181 = arith.minimumf %180, %179 : vector<96x16xf32>
    %182 = vector.extract_strided_slice %181 {offsets = [0, 0], sizes = [16, 16], strides = [1, 1]} : vector<96x16xf32> to vector<16x16xf32>
    %c0_52 = arith.constant 0 : index
    %c0_53 = arith.constant 0 : index
    %c0_54 = arith.constant 0 : index
    %c0_55 = arith.constant 0 : index
    %183 = vector.load %arg8[%c0_52, %c0_53, %c0_54, %c0_55] : memref<1x1x16x16xf32, #tpu.memory_space<vmem>>, vector<1x1x16x16xf32>
    %184 = vector.shape_cast %183 : vector<1x1x16x16xf32> to vector<16x16xf32>
    %185 = vector.shape_cast %182 : vector<16x16xf32> to vector<1x1x16x16xf32>
    tpu.vector_store %arg8[%c0_52, %c0_53, %c0_54, %c0_55], %185 {strides = array<i32>} : memref<1x1x16x16xf32, #tpu.memory_space<vmem>>, vector<1x1x16x16xf32>,
    %186 = arith.index_cast %arg0 : i32 to index
    %c0_56 = arith.constant 0 : index
    %187 = memref.load %arg1[%186, %c0_56] : memref<2x4xf32, #tpu.memory_space<smem>>
    %188 = arith.index_cast %arg0 : i32 to index
    %c1 = arith.constant 1 : index
    %189 = memref.load %arg1[%188, %c1] : memref<2x4xf32, #tpu.memory_space<smem>>
    %c0_57 = arith.constant 0 : index
    %c0_58 = arith.constant 0 : index
    %c0_59 = arith.constant 0 : index
    %190 = vector.load %arg6[%c0_57, %c0_58, %c0_59] : memref<1x1x2304xf32, #tpu.memory_space<vmem>>, vector<1x1x2304xf32>
    %191 = vector.shape_cast %190 : vector<1x1x2304xf32> to vector<1x2304xf32>
    %c0_60 = arith.constant 0 : index
    %c0_61 = arith.constant 0 : index
    %c0_62 = arith.constant 0 : index
    %192 = vector.load %arg7[%c0_60, %c0_61, %c0_62] : memref<1x1x2304xf32, #tpu.memory_space<vmem>>, vector<1x1x2304xf32>
    %193 = vector.shape_cast %192 : vector<1x1x2304xf32> to vector<1x2304xf32>
    %194 = vector.broadcast %187 : f32 to vector<1x2304xf32>
    %195 = arith.mulf %194, %191 : vector<1x2304xf32>
    %196 = vector.broadcast %189 : f32 to vector<1x2304xf32>
    %197 = arith.mulf %196, %193 : vector<1x2304xf32>
    %198 = arith.subf %195, %197 : vector<1x2304xf32>
    %cst_63 = arith.constant 1.000000e+00 : f32
    %199 = vector.broadcast %cst_63 : f32 to vector<1x2304xf32>
    %200 = arith.addf %198, %199 : vector<1x2304xf32>
    %cst_64 = arith.constant 2.350000e+01 : f32
    %201 = vector.broadcast %cst_64 : f32 to vector<1x2304xf32>
    %202 = arith.mulf %200, %201 : vector<1x2304xf32>
    %203 = vector.broadcast %189 : f32 to vector<1x2304xf32>
    %204 = arith.mulf %203, %191 : vector<1x2304xf32>
    %205 = vector.broadcast %187 : f32 to vector<1x2304xf32>
    %206 = arith.mulf %205, %193 : vector<1x2304xf32>
    %207 = arith.addf %204, %206 : vector<1x2304xf32>
    %cst_65 = arith.constant 1.000000e+00 : f32
    %208 = vector.broadcast %cst_65 : f32 to vector<1x2304xf32>
    %209 = arith.addf %207, %208 : vector<1x2304xf32>
    %cst_66 = arith.constant 2.350000e+01 : f32
    %210 = vector.broadcast %cst_66 : f32 to vector<1x2304xf32>
    %211 = arith.mulf %209, %210 : vector<1x2304xf32>
    %212 = tpu.iota {dimensions = array<i32: 0>} : vector<16x2304xi32>
    %213 = math.floor %211 : vector<1x2304xf32>
    %214 = arith.subf %211, %213 : vector<1x2304xf32>
    %215 = arith.fptosi %213 : vector<1x2304xf32> to vector<1x2304xi32>
    %c24_i32 = arith.constant 24 : i32
    %216 = vector.broadcast %c24_i32 : i32 to vector<1x2304xi32>
    %217 = arith.subi %215, %216 : vector<1x2304xi32>
    %218 = vector.broadcast %217 : vector<1x2304xi32> to vector<16x2304xi32>
    %219 = arith.cmpi eq, %212, %218 : vector<16x2304xi32>
    %cst_67 = arith.constant 1.000000e+00 : f32
    %220 = vector.broadcast %cst_67 : f32 to vector<1x2304xf32>
    %221 = arith.subf %220, %214 : vector<1x2304xf32>
    %cst_68 = arith.constant 0.000000e+00 : f32
    %222 = vector.shape_cast %221 : vector<1x2304xf32> to vector<1x2304xf32>
    %223 = vector.broadcast %222 : vector<1x2304xf32> to vector<16x2304xf32>
    %224 = vector.broadcast %cst_68 : f32 to vector<16x2304xf32>
    %225 = arith.select %219, %223, %224 : vector<16x2304xi1>, vector<16x2304xf32>
    %c1_i32_69 = arith.constant 1 : i32
    %226 = vector.broadcast %c1_i32_69 : i32 to vector<1x2304xi32>
    %227 = arith.addi %217, %226 : vector<1x2304xi32>
    %228 = vector.broadcast %227 : vector<1x2304xi32> to vector<16x2304xi32>
    %229 = arith.cmpi eq, %212, %228 : vector<16x2304xi32>
    %cst_70 = arith.constant 0.000000e+00 : f32
    %230 = vector.shape_cast %214 : vector<1x2304xf32> to vector<1x2304xf32>
    %231 = vector.broadcast %230 : vector<1x2304xf32> to vector<16x2304xf32>
    %232 = vector.broadcast %cst_70 : f32 to vector<16x2304xf32>
    %233 = arith.select %229, %231, %232 : vector<16x2304xi1>, vector<16x2304xf32>
    %234 = arith.addf %225, %233 : vector<16x2304xf32>
    %235 = math.floor %202 : vector<1x2304xf32>
    %236 = arith.subf %202, %235 : vector<1x2304xf32>
    %237 = arith.fptosi %235 : vector<1x2304xf32> to vector<1x2304xi32>
    %c16_i32 = arith.constant 16 : i32
    %238 = vector.broadcast %c16_i32 : i32 to vector<1x2304xi32>
    %239 = arith.subi %237, %238 : vector<1x2304xi32>
    %240 = vector.broadcast %239 : vector<1x2304xi32> to vector<16x2304xi32>
    %241 = arith.cmpi eq, %212, %240 : vector<16x2304xi32>
    %cst_71 = arith.constant 1.000000e+00 : f32
    %242 = vector.broadcast %cst_71 : f32 to vector<1x2304xf32>
    %243 = arith.subf %242, %236 : vector<1x2304xf32>
    %cst_72 = arith.constant 0.000000e+00 : f32
    %244 = vector.shape_cast %243 : vector<1x2304xf32> to vector<1x2304xf32>
    %245 = vector.broadcast %244 : vector<1x2304xf32> to vector<16x2304xf32>
    %246 = vector.broadcast %cst_72 : f32 to vector<16x2304xf32>
    %247 = arith.select %241, %245, %246 : vector<16x2304xi1>, vector<16x2304xf32>
    %c1_i32_73 = arith.constant 1 : i32
    %248 = vector.broadcast %c1_i32_73 : i32 to vector<1x2304xi32>
    %249 = arith.addi %239, %248 : vector<1x2304xi32>
    %250 = vector.broadcast %249 : vector<1x2304xi32> to vector<16x2304xi32>
    %251 = arith.cmpi eq, %212, %250 : vector<16x2304xi32>
    %cst_74 = arith.constant 0.000000e+00 : f32
    %252 = vector.shape_cast %236 : vector<1x2304xf32> to vector<1x2304xf32>
    %253 = vector.broadcast %252 : vector<1x2304xf32> to vector<16x2304xf32>
    %254 = vector.broadcast %cst_74 : f32 to vector<16x2304xf32>
    %255 = arith.select %251, %253, %254 : vector<16x2304xi1>, vector<16x2304xf32>
    %256 = arith.addf %247, %255 : vector<16x2304xf32>
    %cst_75 = arith.constant dense<0.000000e+00> : vector<96x2304xf32>
    %257 = tpu.matmul %181, %234, %cst_75 {dimension_numbers = #tpu.dot_dimension_numbers<[1], [0], [0], [1], [0, 0, 1, 1], [], []>} : vector<96x16xf32>, vector<16x2304xf32>, vector<96x2304xf32> -> vector<96x2304xf32>
    %258 = vector.shape_cast %257 : vector<96x2304xf32> to vector<6x16x2304xf32>
    %259 = vector.shape_cast %256 : vector<16x2304xf32> to vector<1x16x2304xf32>
    %260 = vector.broadcast %259 : vector<1x16x2304xf32> to vector<6x16x2304xf32>
    %261 = arith.mulf %258, %260 : vector<6x16x2304xf32>
    %cst_76 = arith.constant dense<0.000000e+00> : vector<6x2304xf32>
    %262 = vector.multi_reduction <add>, %261, %cst_76 [1] : vector<6x16x2304xf32> to vector<6x2304xf32>
    %c0_77 = arith.constant 0 : index
    %c0_78 = arith.constant 0 : index
    %c0_79 = arith.constant 0 : index
    %263 = vector.load %arg9[%c0_77, %c0_78, %c0_79] : memref<1x6x2304xf32, #tpu.memory_space<vmem>>, vector<1x6x2304xf32>
    %264 = vector.shape_cast %263 : vector<1x6x2304xf32> to vector<6x2304xf32>
    %265 = vector.shape_cast %262 : vector<6x2304xf32> to vector<1x6x2304xf32>
    tpu.vector_store %arg9[%c0_77, %c0_78, %c0_79], %265 {strides = array<i32>} : memref<1x6x2304xf32, #tpu.memory_space<vmem>>, vector<1x6x2304xf32>,
    return
  }
  func.func @transform_0(%arg0: i32) -> (i32, i32) {
    %c0_i32 = arith.constant 0 : i32
    %c0_i32_0 = arith.constant 0 : i32
    %c0_i32_1 = arith.constant 0 : i32
    return %c0_i32, %c0_i32_0 : i32, i32
  }
  func.func @transform_1(%arg0: i32) -> (i32, i32, i32) {
    %c0_i32 = arith.constant 0 : i32
    %c0_i32_0 = arith.constant 0 : i32
    %c0_i32_1 = arith.constant 0 : i32
    return %arg0, %c0_i32, %c0_i32_0 : i32, i32, i32
  }
  func.func @transform_2(%arg0: i32) -> (i32, i32, i32) {
    %c0_i32 = arith.constant 0 : i32
    %c0_i32_0 = arith.constant 0 : i32
    %c0_i32_1 = arith.constant 0 : i32
    %c0_i32_2 = arith.constant 0 : i32
    return %c0_i32, %c0_i32_0, %c0_i32_1 : i32, i32, i32
  }
  func.func @transform_3(%arg0: i32) -> (i32, i32, i32) {
    %c0_i32 = arith.constant 0 : i32
    %c0_i32_0 = arith.constant 0 : i32
    %c0_i32_1 = arith.constant 0 : i32
    %c0_i32_2 = arith.constant 0 : i32
    return %c0_i32, %c0_i32_0, %c0_i32_1 : i32, i32, i32
  }
  func.func @transform_4(%arg0: i32) -> (i32, i32, i32) {
    %c0_i32 = arith.constant 0 : i32
    %c0_i32_0 = arith.constant 0 : i32
    %c0_i32_1 = arith.constant 0 : i32
    return %arg0, %c0_i32, %c0_i32_0 : i32, i32, i32
  }
  func.func @transform_5(%arg0: i32) -> (i32, i32, i32) {
    %c0_i32 = arith.constant 0 : i32
    %c0_i32_0 = arith.constant 0 : i32
    %c0_i32_1 = arith.constant 0 : i32
    %c0_i32_2 = arith.constant 0 : i32
    return %c0_i32, %c0_i32_0, %c0_i32_1 : i32, i32, i32
  }
  func.func @transform_6(%arg0: i32) -> (i32, i32, i32) {
    %c0_i32 = arith.constant 0 : i32
    %c0_i32_0 = arith.constant 0 : i32
    %c0_i32_1 = arith.constant 0 : i32
    %c0_i32_2 = arith.constant 0 : i32
    return %c0_i32, %c0_i32_0, %c0_i32_1 : i32, i32, i32
  }
  func.func @transform_7(%arg0: i32) -> (i32, i32, i32, i32) {
    %c0_i32 = arith.constant 0 : i32
    %c0_i32_0 = arith.constant 0 : i32
    %c0_i32_1 = arith.constant 0 : i32
    %c0_i32_2 = arith.constant 0 : i32
    return %arg0, %c0_i32, %c0_i32_0, %c0_i32_1 : i32, i32, i32, i32
  }
  func.func @transform_8(%arg0: i32) -> (i32, i32, i32) {
    %c0_i32 = arith.constant 0 : i32
    %c0_i32_0 = arith.constant 0 : i32
    %c0_i32_1 = arith.constant 0 : i32
    return %arg0, %c0_i32, %c0_i32_0 : i32, i32, i32
  }
}

module attributes {stable_mosaic.version = 11 : i64} {
  func.func @_translate_max_kernel(%arg0: i32, %arg1: memref<2x4xf32, #tpu.memory_space<smem>>, %arg2: memref<1x6x48x48xf32, #tpu.memory_space<vmem>>, %arg3: memref<1x8x48x48xf32, #tpu.memory_space<vmem>>, %arg4: memref<1x8x48x48xf32, #tpu.memory_space<vmem>>) attributes {dimension_semantics = [#tpu.dimension_semantics<parallel>], iteration_bounds = array<i64: 2>, scalar_prefetch = 0 : i64, scratch_operands = 0 : i64, tpu.core_type = #tpu.core_type<tc>, window_params = [{transform_indices = @transform_0, window_bounds = array<i64: 2, 4>}, {transform_indices = @transform_1, window_bounds = array<i64: 1, 6, 48, 48>}, {transform_indices = @transform_2, window_bounds = array<i64: 1, 8, 48, 48>}, {transform_indices = @transform_3, window_bounds = array<i64: 1, 8, 48, 48>}]} {
    %0 = arith.index_cast %arg0 : i32 to index
    %c2 = arith.constant 2 : index
    %1 = memref.load %arg1[%0, %c2] : memref<2x4xf32, #tpu.memory_space<smem>>
    %2 = arith.index_cast %arg0 : i32 to index
    %c3 = arith.constant 3 : index
    %3 = memref.load %arg1[%2, %c3] : memref<2x4xf32, #tpu.memory_space<smem>>
    %4 = tpu.iota {dimensions = array<i32: 0>} : vector<48x48xi32>
    %5 = tpu.iota {dimensions = array<i32: 1>} : vector<48x48xi32>
    %6 = arith.sitofp %5 : vector<48x48xi32> to vector<48x48xf32>
    %7 = vector.broadcast %1 : f32 to vector<48x48xf32>
    %8 = arith.addf %6, %7 : vector<48x48xf32>
    %9 = math.floor %8 : vector<48x48xf32>
    %10 = arith.subf %8, %9 : vector<48x48xf32>
    %11 = arith.fptosi %9 : vector<48x48xf32> to vector<48x48xi32>
    %12 = arith.cmpi eq, %4, %11 : vector<48x48xi32>
    %cst = arith.constant 1.000000e+00 : f32
    %13 = vector.broadcast %cst : f32 to vector<48x48xf32>
    %14 = arith.subf %13, %10 : vector<48x48xf32>
    %cst_0 = arith.constant 0.000000e+00 : f32
    %15 = vector.broadcast %cst_0 : f32 to vector<48x48xf32>
    %16 = arith.select %12, %14, %15 : vector<48x48xi1>, vector<48x48xf32>
    %c1_i32 = arith.constant 1 : i32
    %17 = vector.broadcast %c1_i32 : i32 to vector<48x48xi32>
    %18 = arith.addi %11, %17 : vector<48x48xi32>
    %19 = arith.cmpi eq, %4, %18 : vector<48x48xi32>
    %cst_1 = arith.constant 0.000000e+00 : f32
    %20 = vector.broadcast %cst_1 : f32 to vector<48x48xf32>
    %21 = arith.select %19, %10, %20 : vector<48x48xi1>, vector<48x48xf32>
    %22 = arith.addf %16, %21 : vector<48x48xf32>
    %23 = arith.sitofp %4 : vector<48x48xi32> to vector<48x48xf32>
    %24 = vector.broadcast %3 : f32 to vector<48x48xf32>
    %25 = arith.addf %23, %24 : vector<48x48xf32>
    %26 = math.floor %25 : vector<48x48xf32>
    %27 = arith.subf %25, %26 : vector<48x48xf32>
    %28 = arith.fptosi %26 : vector<48x48xf32> to vector<48x48xi32>
    %29 = arith.cmpi eq, %5, %28 : vector<48x48xi32>
    %cst_2 = arith.constant 1.000000e+00 : f32
    %30 = vector.broadcast %cst_2 : f32 to vector<48x48xf32>
    %31 = arith.subf %30, %27 : vector<48x48xf32>
    %cst_3 = arith.constant 0.000000e+00 : f32
    %32 = vector.broadcast %cst_3 : f32 to vector<48x48xf32>
    %33 = arith.select %29, %31, %32 : vector<48x48xi1>, vector<48x48xf32>
    %c1_i32_4 = arith.constant 1 : i32
    %34 = vector.broadcast %c1_i32_4 : i32 to vector<48x48xi32>
    %35 = arith.addi %28, %34 : vector<48x48xi32>
    %36 = arith.cmpi eq, %5, %35 : vector<48x48xi32>
    %cst_5 = arith.constant 0.000000e+00 : f32
    %37 = vector.broadcast %cst_5 : f32 to vector<48x48xf32>
    %38 = arith.select %36, %27, %37 : vector<48x48xi1>, vector<48x48xf32>
    %39 = arith.addf %33, %38 : vector<48x48xf32>
    %c0 = arith.constant 0 : index
    %c0_6 = arith.constant 0 : index
    %c0_7 = arith.constant 0 : index
    %c0_8 = arith.constant 0 : index
    %40 = vector.load %arg2[%c0, %c0_6, %c0_7, %c0_8] : memref<1x6x48x48xf32, #tpu.memory_space<vmem>>, vector<1x6x48x48xf32>
    %41 = vector.shape_cast %40 : vector<1x6x48x48xf32> to vector<6x48x48xf32>
    %42 = vector.shape_cast %41 : vector<6x48x48xf32> to vector<288x48xf32>
    %cst_9 = arith.constant dense<0.000000e+00> : vector<288x48xf32>
    %43 = tpu.matmul %42, %22, %cst_9 {dimension_numbers = #tpu.dot_dimension_numbers<[1], [0], [0], [1], [0, 0, 1, 1], [], []>} : vector<288x48xf32>, vector<48x48xf32>, vector<288x48xf32> -> vector<288x48xf32>
    %44 = vector.shape_cast %43 : vector<288x48xf32> to vector<6x48x48xf32>
    %45 = vector.shape_cast %39 : vector<48x48xf32> to vector<1x48x48xf32>
    %46 = vector.shape_cast %45 : vector<1x48x48xf32> to vector<1x48x48xf32>
    %47 = vector.broadcast %46 : vector<1x48x48xf32> to vector<6x48x48xf32>
    %cst_10 = arith.constant dense<0.000000e+00> : vector<6x48x48xf32>
    %48 = tpu.matmul %47, %44, %cst_10 {dimension_numbers = #tpu.dot_dimension_numbers<[2], [1], [1], [2], [0, 0, 0, 1, 1, 2], [0], [0]>} : vector<6x48x48xf32>, vector<6x48x48xf32>, vector<6x48x48xf32> -> vector<6x48x48xf32>
    %c0_11 = arith.constant 0 : index
    %c0_12 = arith.constant 0 : index
    %c0_13 = arith.constant 0 : index
    %c0_14 = arith.constant 0 : index
    %49 = vector.load %arg3[%c0_11, %c0_12, %c0_13, %c0_14] : memref<1x8x48x48xf32, #tpu.memory_space<vmem>>, vector<1x8x48x48xf32>
    %50 = vector.shape_cast %49 : vector<1x8x48x48xf32> to vector<8x48x48xf32>
    %51 = vector.extract_strided_slice %50 {offsets = [0, 0, 0], sizes = [2, 48, 48], strides = [1, 1, 1]} : vector<8x48x48xf32> to vector<2x48x48xf32>
    %52 = vector.extract_strided_slice %48 {offsets = [0, 0, 0], sizes = [2, 48, 48], strides = [1, 1, 1]} : vector<6x48x48xf32> to vector<2x48x48xf32>
    %53 = arith.maximumf %51, %52 : vector<2x48x48xf32>
    %c0_15 = arith.constant 0 : index
    %c0_16 = arith.constant 0 : index
    %c0_17 = arith.constant 0 : index
    %c0_18 = arith.constant 0 : index
    %54 = vector.load %arg4[%c0_15, %c0_16, %c0_17, %c0_18] : memref<1x8x48x48xf32, #tpu.memory_space<vmem>>, vector<1x2x48x48xf32>
    %55 = vector.shape_cast %54 : vector<1x2x48x48xf32> to vector<2x48x48xf32>
    %56 = vector.shape_cast %53 : vector<2x48x48xf32> to vector<1x2x48x48xf32>
    tpu.vector_store %arg4[%c0_15, %c0_16, %c0_17, %c0_18], %56 {strides = array<i32>} : memref<1x8x48x48xf32, #tpu.memory_space<vmem>>, vector<1x2x48x48xf32>,
    %57 = vector.extract_strided_slice %50 {offsets = [2, 0, 0], sizes = [2, 48, 48], strides = [1, 1, 1]} : vector<8x48x48xf32> to vector<2x48x48xf32>
    %cst_19 = arith.constant 0.000000e+00 : f32
    %58 = vector.broadcast %cst_19 : f32 to vector<2x48x48xf32>
    %59 = arith.maximumf %57, %58 : vector<2x48x48xf32>
    %c0_20 = arith.constant 0 : index
    %c2_21 = arith.constant 2 : index
    %c0_22 = arith.constant 0 : index
    %c0_23 = arith.constant 0 : index
    %60 = vector.load %arg4[%c0_20, %c2_21, %c0_22, %c0_23] : memref<1x8x48x48xf32, #tpu.memory_space<vmem>>, vector<1x2x48x48xf32>
    %61 = vector.shape_cast %60 : vector<1x2x48x48xf32> to vector<2x48x48xf32>
    %62 = vector.shape_cast %59 : vector<2x48x48xf32> to vector<1x2x48x48xf32>
    tpu.vector_store %arg4[%c0_20, %c2_21, %c0_22, %c0_23], %62 {strides = array<i32>} : memref<1x8x48x48xf32, #tpu.memory_space<vmem>>, vector<1x2x48x48xf32>,
    %63 = vector.extract_strided_slice %50 {offsets = [4, 0, 0], sizes = [4, 48, 48], strides = [1, 1, 1]} : vector<8x48x48xf32> to vector<4x48x48xf32>
    %64 = vector.extract_strided_slice %48 {offsets = [2, 0, 0], sizes = [4, 48, 48], strides = [1, 1, 1]} : vector<6x48x48xf32> to vector<4x48x48xf32>
    %65 = arith.maximumf %63, %64 : vector<4x48x48xf32>
    %c0_24 = arith.constant 0 : index
    %c4 = arith.constant 4 : index
    %c0_25 = arith.constant 0 : index
    %c0_26 = arith.constant 0 : index
    %66 = vector.load %arg4[%c0_24, %c4, %c0_25, %c0_26] : memref<1x8x48x48xf32, #tpu.memory_space<vmem>>, vector<1x4x48x48xf32>
    %67 = vector.shape_cast %66 : vector<1x4x48x48xf32> to vector<4x48x48xf32>
    %68 = vector.shape_cast %65 : vector<4x48x48xf32> to vector<1x4x48x48xf32>
    tpu.vector_store %arg4[%c0_24, %c4, %c0_25, %c0_26], %68 {strides = array<i32>} : memref<1x8x48x48xf32, #tpu.memory_space<vmem>>, vector<1x4x48x48xf32>,
    return
  }
  func.func @transform_0(%arg0: i32) -> (i32, i32) {
    %c0_i32 = arith.constant 0 : i32
    %c0_i32_0 = arith.constant 0 : i32
    %c0_i32_1 = arith.constant 0 : i32
    return %c0_i32, %c0_i32_0 : i32, i32
  }
  func.func @transform_1(%arg0: i32) -> (i32, i32, i32, i32) {
    %c0_i32 = arith.constant 0 : i32
    %c0_i32_0 = arith.constant 0 : i32
    %c0_i32_1 = arith.constant 0 : i32
    %c0_i32_2 = arith.constant 0 : i32
    return %arg0, %c0_i32, %c0_i32_0, %c0_i32_1 : i32, i32, i32, i32
  }
  func.func @transform_2(%arg0: i32) -> (i32, i32, i32, i32) {
    %c0_i32 = arith.constant 0 : i32
    %c0_i32_0 = arith.constant 0 : i32
    %c0_i32_1 = arith.constant 0 : i32
    %c0_i32_2 = arith.constant 0 : i32
    return %arg0, %c0_i32, %c0_i32_0, %c0_i32_1 : i32, i32, i32, i32
  }
  func.func @transform_3(%arg0: i32) -> (i32, i32, i32, i32) {
    %c0_i32 = arith.constant 0 : i32
    %c0_i32_0 = arith.constant 0 : i32
    %c0_i32_1 = arith.constant 0 : i32
    %c0_i32_2 = arith.constant 0 : i32
    return %arg0, %c0_i32, %c0_i32_0, %c0_i32_1 : i32, i32, i32, i32
  }
}

</mosaic_0001>

<bundles_post_ra>
// kernel: squeeze.10
= control target key start
LH: loop header
LB: loop body
LE: loop exit
PB: predicated region body
PF: predicated region fallthrough
CT: control target
= control target key end

     0   :  { %s88_s8 = smov 112   ;;  %s89_s11 = smov 80   ;;  %vm3_vm0 = vcmask 130048   ;;  %vm9_vm1 = vcmask 1048448   ;;  %vm15_vm2 = vcmask 917248   ;;  %vm21_vm3 = vcmask 786048   ;;  %s141_s0 = inlined_call_operand.vmem [shape: f32[2,1,16,16], index: 0, kind: input, shape index: {}]   ;;  %s142_s1 = inlined_call_operand.vmem [shape: f32[2,1,256], index: 1, kind: output, shape index: {}]  }
   0x1   :  { %v71_v0 = vld [vmem:[%s141_s0 + $0x7] ss:$8 sm:$0xf]   ;;  %v73_v1 = vld [vmem:[%s141_s0 + $0x5] ss:$8 sm:$0xf]  }
   0x2   :  { %7 = vrot.lane.b32.xlu0 %v71_v0, %s88_s8  ;;  %19 = vrot.lane.b32.xlu1 %v73_v1, %s89_s11  ;;  %v75_v2 = vld [vmem:[%s141_s0 + $0x3] ss:$8 sm:$0xf]   ;;  %s90_s14 = smov 48   ;;  %s91_s19 = smov 96   ;;  %vm27_vm4 = vcmask 654848  }
   0x3   :  { %31 = vrot.lane.b32.xlu2 %v75_v2, %s90_s14  ;;  %v72_v3 = vld [vmem:[%s141_s0 + $0x6] ss:$8 sm:$0xf]   ;;  %v74_v4 = vld [vmem:[%s141_s0 + $0x4] ss:$8 sm:$0xf]  }
   0x4   :  { %s92_s20 = smov 64   ;;  %v76_v5 = vld [vmem:[%s141_s0 + $0x2] ss:$8 sm:$0xf]   ;;  %s93_s23 = smov 32   ;;  %vm33_vm5 = vcmask 523648  }
   0x5   :  { %v77_v6 = vld [vmem:[%s141_s0 + $0x1] ss:$8 sm:$0xf]   ;;  %s94_s26 = smov 16   ;;  %vm39_vm6 = vcmask 392448   ;;  %vm45_vm7 = vcmask 261248  }
   0x6   :  { %v2_v7 = vld [vmem:[%s141_s0] ss:$8 sm:$0xf]  }
   0x7   :  { %4 = vst.msk [vmem:[#allocation0] ss:$8 sm:$0xf] %vm3_vm0, %v2_v7  }
   0xa   :  { %13 = vrot.lane.b32.xlu0 %v72_v3, %s91_s19  ;;  %25 = vrot.lane.b32.xlu1 %v74_v4, %s92_s20 }
   0xb   :  { %37 = vrot.lane.b32.xlu2 %v76_v5, %s93_s23 }
  0x12   :  { %43 = vrot.lane.b32.xlu0 %v77_v6, %s94_s26 }
  0x5d   :  { %v32_v8 = vpop.permute.xlu2 %31  }
  0x65   :  { %v38_v9 = vpop.permute.xlu2 %37  }
  0x74   :  { %v8_v10 = vpop.permute.xlu0 %7   ;;  %v20_v11 = vpop.permute.xlu1 %19  }
  0x75   :  { %10 = vst.msk [vmem:[#allocation0] ss:$8 sm:$0xf] %vm9_vm1, %v8_v10  }
  0x7c   :  { %v14_v12 = vpop.permute.xlu0 %13   ;;  %v26_v13 = vpop.permute.xlu1 %25  }
  0x7d   :  { %16 = vst.msk [vmem:[#allocation0] ss:$8 sm:$0xf] %vm15_vm2, %v14_v12  }
  0x7e   :  { %22 = vst.msk [vmem:[#allocation0] ss:$8 sm:$0xf] %vm21_vm3, %v20_v11  }
  0x7f   :  { %28 = vst.msk [vmem:[#allocation0] ss:$8 sm:$0xf] %vm27_vm4, %v26_v13  }
  0x80   :  { %34 = vst.msk [vmem:[#allocation0] ss:$8 sm:$0xf] %vm33_vm5, %v32_v8  }
  0x81   :  { %40 = vst.msk [vmem:[#allocation0] ss:$8 sm:$0xf] %vm39_vm6, %v38_v9  }
  0x84   :  { %v44_v14 = vpop.permute.xlu0 %43  }
  0x85   :  { %46 = vst.msk [vmem:[#allocation0] ss:$8 sm:$0xf] %vm45_vm7, %v44_v14  }
  0x8c   :  { %v49_v15 = vld [vmem:[#allocation0] sm:$0x1]  ;;  %v54_v16 = vld [vmem:[#allocation0 + $0x8] sm:$0x1]  ;;  %v60_v17 = vld [vmem:[#allocation0 + $0x10] sm:$0x1] }
  0x8d   :  { %52 = vst [vmem:[%s142_s1] sm:$0x1] %v49_v15  ;;  %v66_v18 = vld [vmem:[#allocation0 + $0x18] sm:$0x1] }
  0x8e   :  { %78 = vst [vmem:[%s142_s1 + $0x1] sm:$0x1] %v54_v16 }
  0x8f   :  { %79 = vst [vmem:[%s142_s1 + $0x2] sm:$0x1] %v60_v17 }
  0x90   :  { %80 = vst [vmem:[%s142_s1 + $0x3] sm:$0x1] %v66_v18 }

// kernel: semantic_mapping_forward.3
= control target key start
LH: loop header
LB: loop body
LE: loop exit
PB: predicated region body
PF: predicated region fallthrough
CT: control target
= control target key end

     0   :  { %8 = vsyncpa [#allocation4], 0  ;;  %s1842_s0 = inlined_call_operand.vmem [shape: f32[2,4], index: 0, kind: input, shape index: {}]   ;;  %s1843_s1 = inlined_call_operand.vmem [shape: f32[2,6,48,48], index: 1, kind: input, shape index: {}]   ;;  %s1844_s2 = inlined_call_operand.vmem [shape: f32[2,8,48,48], index: 2, kind: input, shape index: {}]   ;;  %s1845_s3 = inlined_call_operand.hbm [shape: f32[2,8,48,48], index: 3, kind: output, shape index: {}]  }
   0x1   :  { %9 = vsyncpa [#allocation3], 0 }
   0x2   :  { %11 = vsyncpa [#allocation3 + $0x1], 0  ;;  %s1388_s12 = smov 0   ;;  %s1390_s13 = smov 0  }
   0x3   :  { %s1392_s14 = smov 0   ;;  %s1394_s15 = smov 0  }
   0x4 LB: > { %s1409_s16 = sadd.s32 4294967295, %s1363_s15   ;;  %s1074_s17 = sadd.s32 4294967294, %s1363_s15   ;;  %s1363_s15 = sphi %s1394_s15, %s1851_s15   ;;  %s1359_s14 = sphi %s1392_s14, %s1850_s14   ;;  %s1355_s13 = sphi %s1390_s13, %s1849_s13   ;;  %s1351_s12 = sphi %s1388_s12, %s1848_s12  }
   0x5   : > { %s1413_s18 = sadd.s32 1, %s1363_s15   ;;  %s97_s19 = sadd.s32 1, %s1359_s14 }
   0x6   : > { %s94_s20 = ssub.s32 %s1363_s15, %s1413_s18  ;;  %p107_p0 = scmp.ne.s32.totalorder %s1359_s14, %s1355_s13 }
   0x7   : > { %p95_p1 = scmp.eq.s32.totalorder %s94_s20, 0  ;;  %p108_p2 = scmp.eq.s32.totalorder %s1409_s16, 1 }
   0x8   : > { %p113_p3 = scmp.ne.s32.totalorder %s1355_s13, %s1351_s12  ;;  %p114_p4 = scmp.eq.s32.totalorder %s1074_s17, 1 }
   0x9   : > { %s1424_s21 = scalar_select %p95_p1, %s1359_s14, %s97_s19  }
   0xa   : > { %p1426_p5 = por %p108_p2, %p107_p0  ;;  %p1430_p6 = por %p114_p4, %p113_p3 }
   0xb   : > { %p1075_p7 = scmp.ge.s32.totalorder %s1363_s15, 1  ;;  %p121_p8 = scmp.lt.s32.totalorder %s1363_s15, 3 }
   0xc   : > { %p1244_p9 = scmp.eq.s32.totalorder %s1409_s16, 0  ;;  %s133_s26 = sshll.u32 %s1842_s0, 4  ;;  %s134_s26 = int_to_ptr.vmem [resolvable:$true] %s133_s26 }
   0xd   : > { %p122_p10 = pnand %p1075_p7, %p121_p8  ;;  %s1365_s27 = smov [#allocation2]  }
   0xf   : > { %p1236_p11 = pneg %p122_p10  ;;  %162 = sbr.rel (%p122_p10) target bundleno = 554 (0x22a), region = 32 }
  0x11   : > { %p1237_p12 = pnand %p1244_p9, %p1236_p11 }
  0x13   : > { %1239 = dma.vmem_to_smem (!%p1237_p12), %s134_s26, 32, %s1365_s27, [#allocation4]  }
  0x14   : > { %1342 = dma.done.wait (%p1244_p9), [#allocation4], 32  }
  0x15   : > { %1344 = vsyncadd (%p1244_p9), [#allocation4], 4294967264 }
  0x16   : > { %169 = sfence }
  0x17   : > { %s1082_s28 = sshll.u32 %s1409_s16, 7  ;;  %v208_v0 = vlaneseq  ;;  %p193_p13 = scmp.lt.s32.totalorder %s1409_s16, 1  ;;  %vm364_vm12 = vcmask 392192  }
  0x18   : > { %s204_s29 = sadd.s32 2, %s1082_s28  ;;  %s206_s30 = sadd.s32 3, %s1082_s28 }
  0x19   : > { %s205_s4 = sld [smem:[#allocation2 + %s204_s29]]  ;;  %v1441_v1 = vshrl.u32 %v208_v0, 7  ;;  %v1443_v2 = vand.u32 127, %v208_v0  ;;  %s190_s17 = sand.u32 1, %s1355_s13  }
  0x1a   : > { %s207_s5 = sld [smem:[#allocation2 + %s206_s30]]  ;;  %s1212_s25 = smul.u32 384, %s190_s17 }
  0x1b   : > { %v214_v3 = vadd.s32 40, %v1441_v1  ;;  %v213_v4 = vadd.s32 32, %v1441_v1  ;;  %v212_v5 = vadd.s32 24, %v1441_v1  ;;  %v217_v6 = vcvt.s32.f32 %v1443_v2  ;;  %s1472_s6 = scalar_select %p193_p13, %s1409_s16, 1 }
  0x1c   : > { %v211_v7 = vadd.s32 16, %v1441_v1  ;;  %v210_v8 = vadd.s32 8, %v1441_v1  ;;  %s1663_s26 = scalar_lea.vmem [#allocation5], %s1212_s25  ;;  %s1229_s27 = smul.u32 384, %s1409_s16 }
  0x1d   : > { %v260_v9 = vcvt.s32.f32 %v214_v3  ;;  %v259_v10 = vcvt.s32.f32 %v213_v4  ;;  %v258_v11 = vcvt.s32.f32 %v212_v5  ;;  %s1213_s7 = smul.u32 288, %s1472_s6  ;;  %s973_s16 = scalar_lea.sflag [#allocation3], %s190_s17 }
  0x1e   : > { %v257_v12 = vcvt.s32.f32 %v211_v7  ;;  %v256_v13 = vcvt.s32.f32 %v210_v8  ;;  %s1214_s11 = smul.u32 384, %s1472_s6  ;;  %s984_s30 = scalar_lea.hbm %s1845_s3, %s1229_s27 }
  0x1f   : > { %v218_v14 = vstv %s205_s4  ;;  %s1480_s10 = scalar_lea.vmem %s1843_s1, %s1213_s7  ;;  %s985_s4 = sshll.u32 %s1663_s26, 4  ;;  %s986_s4 = int_to_ptr.vmem [resolvable:$true] %s985_s4 }
  0x20   : > { %v219_v15 = vadd.f32 %v218_v14, %v217_v6  ;;  %v1451_v16 = vstv %s207_s5  ;;  %v328_v45 = vld [vmem:[%s1480_s10] sm:$0xff]  ;;  %v329_v46 = vld [vmem:[%s1480_s10 + $0x8] sm:$0xff]  ;;  %v330_v47 = vld [vmem:[%s1480_s10 + $0x10] sm:$0xff]  ;;  %s1657_s24 = scalar_lea.vmem %s1844_s2, %s1214_s11  ;;  %s987_s5 = sshll.u32 %s984_s30, 4  ;;  %s988_s5 = int_to_ptr.hbm [resolvable:$true] %s987_s5 }
  0x21   : > { %v1454_v17 = vadd.f32 %v1451_v16, %v260_v9  ;;  %v1457_v18 = vadd.f32 %v1451_v16, %v259_v10  ;;  %v1460_v19 = vadd.f32 %v1451_v16, %v258_v11  ;;  %v1463_v20 = vadd.f32 %v1451_v16, %v257_v12  ;;  %v331_v48 = vld [vmem:[%s1480_s10 + $0x18] sm:$0xff]  ;;  %v332_v49 = vld [vmem:[%s1480_s10 + $0x20] sm:$0xff]  ;;  %v333_v50 = vld [vmem:[%s1480_s10 + $0x28] sm:$0xff]  ;;  %s1311_s6 = sshra.s32 %s988_s5, 4  ;;  %s1312_s6 = int_to_ptr.hbm [resolvable:$true] %s1311_s6 }
  0x22   : > { %v220_v21 = vfloor.f32 %v219_v15  ;;  %v1466_v22 = vadd.f32 %v1451_v16, %v256_v13  ;;  %v334_v51 = vld [vmem:[%s1480_s10 + $0x30] sm:$0xff]  ;;  %v335_v52 = vld [vmem:[%s1480_s10 + $0x38] sm:$0xff]  ;;  %v352_v53 = vld [vmem:[%s1480_s10 + $0xc0] sm:$0xff]  ;;  %s1313_s7 = scalar_lea.hbm %s1312_s6, 384  ;;  %p1318_p3 = scmp.lt.s32.totalorder %s1312_s6, %s1845_s3 }
  0x23   : > { %v336_v54 = vld [vmem:[%s1480_s10 + $0x40] sm:$0xff]  ;;  %v353_v55 = vld [vmem:[%s1480_s10 + $0xc8] sm:$0xff]  ;;  %v346_v56 = vld [vmem:[%s1480_s10 + $0x90] sm:$0xff]  ;;  %p1314_p0 = scmp.ne.s32.totalorder %s1312_s6, %s1313_s7 }
  0x24   : > { %v221_v23 = vsub.f32 %v219_v15, %v220_v21  ;;  %v1216_v24 = vcvt.f32.s32 %v220_v21  ;;  %v358_v57 = vld [vmem:[%s1480_s10 + $0xf0] sm:$0xff]  ;;  %v337_v58 = vld [vmem:[%s1480_s10 + $0x48] sm:$0xff]  ;;  %v347_v60 = vld [vmem:[%s1480_s10 + $0x98] sm:$0xff] }
  0x25   : > { %v354_v59 = vld [vmem:[%s1480_s10 + $0xd0] sm:$0xff]  ;;  %v359_v61 = vld [vmem:[%s1480_s10 + $0xf8] sm:$0xff]  ;;  %v348_v0 = vld [vmem:[%s1480_s10 + $0xa0] sm:$0xff]  ;;  %p1315_p1 = pnand %p1314_p0, %p1426_p5 }
  0x26   : > { %vm228_vm0 = vcmp.eq.s32.totalorder %v214_v3, %v1216_v24  ;;  %v229_v25 = vsub.f32 1.0, %v221_v23  ;;  %v236_v26 = vadd.s32 1, %v1216_v24  ;;  %vm227_vm1 = vcmp.eq.s32.totalorder %v213_v4, %v1216_v24  ;;  %v338_v62 = vld [vmem:[%s1480_s10 + $0x50] sm:$0xff]  ;;  %v355_v63 = vld [vmem:[%s1480_s10 + $0xd8] sm:$0xff]  ;;  %v349_v6 = vld [vmem:[%s1480_s10 + $0xa8] sm:$0xff] }
  0x27   : > { %vm226_vm2 = vcmp.eq.s32.totalorder %v212_v5, %v1216_v24  ;;  %vm225_vm3 = vcmp.eq.s32.totalorder %v211_v7, %v1216_v24  ;;  %vm224_vm7 = vcmp.eq.s32.totalorder %v210_v8, %v1216_v24  ;;  %vm223_vm10 = vcmp.eq.s32.totalorder %v1441_v1, %v1216_v24  ;;  %v357_v9 = vld [vmem:[%s1480_s10 + $0xe8] sm:$0xff]  ;;  %v350_v10 = vld [vmem:[%s1480_s10 + $0xb0] sm:$0xff]  ;;  %v351_v13 = vld [vmem:[%s1480_s10 + $0xb8] sm:$0xff]  ;;  %p1316_p2 = pneg %p1315_p1 }
  0x28   : > { %v235_v27 = vsel %vm228_vm0, %v229_v25, 0.0  ;;  %vm242_vm4 = vcmp.eq.s32.totalorder %v214_v3, %v236_v26  ;;  %v234_v28 = vsel %vm227_vm1, %v229_v25, 0.0  ;;  %vm241_vm5 = vcmp.eq.s32.totalorder %v213_v4, %v236_v26  ;;  %v360_v3 = vld [vmem:[%s1480_s10 + $0x100] sm:$0xff]  ;;  %v339_v4 = vld [vmem:[%s1480_s10 + $0x58] sm:$0xff]  ;;  %v362_v11 = vld [vmem:[%s1480_s10 + $0x110] sm:$0xff] }
  0x29   : > { %v248_v29 = vsel %vm242_vm4, %v221_v23, 0.0  ;;  %v247_v30 = vsel %vm241_vm5, %v221_v23, 0.0  ;;  %v233_v31 = vsel %vm226_vm2, %v229_v25, 0.0  ;;  %vm240_vm6 = vcmp.eq.s32.totalorder %v212_v5, %v236_v26  ;;  %v356_v5 = vld [vmem:[%s1480_s10 + $0xe0] sm:$0xff]  ;;  %v341_v12 = vld [vmem:[%s1480_s10 + $0x68] sm:$0xff]  ;;  %v363_v14 = vld [vmem:[%s1480_s10 + $0x118] sm:$0xff] }
  0x2a   : > { %v254_v32 = vadd.f32 %v248_v29, %v235_v27  ;;  %v253_v33 = vadd.f32 %v247_v30, %v234_v28  ;;  %v246_v34 = vsel %vm240_vm6, %v221_v23, 0.0  ;;  %v232_v35 = vsel %vm225_vm3, %v229_v25, 0.0  ;;  %v342_v15 = vld [vmem:[%s1480_s10 + $0x70] sm:$0xff]  ;;  %v343_v21 = vld [vmem:[%s1480_s10 + $0x78] sm:$0xff]  ;;  %v344_v24 = vld [vmem:[%s1480_s10 + $0x80] sm:$0xff] }
  0x2b   : > { %vm239_vm8 = vcmp.eq.s32.totalorder %v211_v7, %v236_v26  ;;  %vm238_vm9 = vcmp.eq.s32.totalorder %v210_v8, %v236_v26  ;;  %v252_v36 = vadd.f32 %v246_v34, %v233_v31  ;;  %vm237_vm11 = vcmp.eq.s32.totalorder %v1441_v1, %v236_v26  ;;  %v361_v7 = vld [vmem:[%s1480_s10 + $0x108] sm:$0xff]  ;;  %v340_v8 = vld [vmem:[%s1480_s10 + $0x60] sm:$0xff] }
  0x2c   : > { %483 = vmatpush.msra.mxu0 %v254_v32  ;;  %v245_v37 = vsel %vm239_vm8, %v221_v23, 0.0  ;;  %1195 = vmatpush.msra.mxu2 %v254_v32  ;;  %v231_v38 = vsel %vm224_vm7, %v229_v25, 0.0  ;;  %v244_v39 = vsel %vm238_vm9, %v221_v23, 0.0  ;;  %v230_v41 = vsel %vm223_vm10, %v229_v25, 0.0  ;;  %v345_v26 = vld [vmem:[%s1480_s10 + $0x88] sm:$0xff]  ;;  %s1317_s10 = scalar_lea.hbm %s1845_s3, 768 }
  0x2d   : > { %1194 = vmatpush.msra.mxu1 %v254_v32  ;;  %1196 = vmatpush.msra.mxu3 %v254_v32  ;;  %v251_v40 = vadd.f32 %v245_v37, %v232_v35  ;;  %v243_v42 = vsel %vm237_vm11, %v221_v23, 0.0  ;;  %v250_v43 = vadd.f32 %v244_v39, %v231_v38  ;;  %p1319_p4 = scmp.lt.s32.totalorder %s1317_s10, %s1313_s7 }
  0x2e   : > { %484 = vmatpush.msra.mxu0 %v253_v33  ;;  %1198 = vmatpush.msra.mxu2 %v253_v33  ;;  %v249_v44 = vadd.f32 %v243_v42, %v230_v41 }
  0x2f   : > { %1197 = vmatpush.msra.mxu1 %v253_v33  ;;  %1199 = vmatpush.msra.mxu3 %v253_v33  ;;  %p1320_p7 = por %p1319_p4, %p1318_p3 }
  0x30   : > { %485 = vmatpush.msra.mxu0 %v252_v36  ;;  %1201 = vmatpush.msra.mxu2 %v252_v36 }
  0x31   : > { %1200 = vmatpush.msra.mxu1 %v252_v36  ;;  %1202 = vmatpush.msra.mxu3 %v252_v36  ;;  %p1321_p8 = pnand %p1320_p7, %p1316_p2 }
  0x32   : > { %486 = vmatpush.msra.mxu0 %v251_v40  ;;  %1204 = vmatpush.msra.mxu2 %v251_v40 }
  0x33   : > { %1203 = vmatpush.msra.mxu1 %v251_v40  ;;  %1205 = vmatpush.msra.mxu3 %v251_v40 }
  0x34   : > { %487 = vmatpush.msra.mxu0 %v250_v43  ;;  %1207 = vmatpush.msra.mxu2 %v250_v43 }
  0x35   : > { %1206 = vmatpush.msra.mxu1 %v250_v43  ;;  %1208 = vmatpush.msra.mxu3 %v250_v43 }
  0x36   : > { %488 = vmatpush.msra.mxu0 %v249_v44  ;;  %1210 = vmatpush.msra.mxu2 %v249_v44 }
  0x37   : > { %1083 = vmatmul.msk.f32.vlgmr.msra.gmra.mxu0 %vm364_vm12, %v328_v45  ;;  %1209 = vmatpush.msra.mxu1 %v249_v44 }
  0x38   : > { %1211 = vmatpush.msra.mxu3 %v249_v44  ;;  %1107 = vmatmul.msk.f32.vlgmr.msra.gmra.mxu2 %vm364_vm12, %v352_v53 }
  0x39   : > { %1101 = vmatmul.msk.f32.vlgmr.msra.gmra.mxu1 %vm364_vm12, %v346_v56  ;;  %1113 = vmatmul.msk.f32.vlgmr.msra.gmra.mxu3 %vm364_vm12, %v358_v57 }
  0x3f   : > { %1084 = vmatmul.msk.f32.gmra.mxu0 %vm364_vm12, %v329_v46 }
  0x40   : > { %1108 = vmatmul.msk.f32.gmra.mxu2 %vm364_vm12, %v353_v55 }
  0x41   : > { %1102 = vmatmul.msk.f32.gmra.mxu1 %vm364_vm12, %v347_v60  ;;  %1114 = vmatmul.msk.f32.gmra.mxu3 %vm364_vm12, %v359_v61 }
  0x47   : > { %1085 = vmatmul.msk.f32.gmra.mxu0 %vm364_vm12, %v330_v47 }
  0x48   : > { %1109 = vmatmul.msk.f32.gmra.mxu2 %vm364_vm12, %v354_v59 }
  0x49   : > { %1103 = vmatmul.msk.f32.gmra.mxu1 %vm364_vm12, %v348_v0  ;;  %1115 = vmatmul.msk.f32.gmra.mxu3 %vm364_vm12, %v360_v3 }
  0x4f   : > { %1086 = vmatmul.msk.f32.gmra.mxu0 %vm364_vm12, %v331_v48 }
  0x50   : > { %1110 = vmatmul.msk.f32.gmra.mxu2 %vm364_vm12, %v355_v63  ;;  %v269_v63 = vfloor.f32 %v1466_v22 }
  0x51   : > { %1104 = vmatmul.msk.f32.gmra.mxu1 %vm364_vm12, %v349_v6  ;;  %1116 = vmatmul.msk.f32.gmra.mxu3 %vm364_vm12, %v361_v7 }
  0x52   : > { %v1220_v0 = vcvt.f32.s32 %v269_v63  ;;  %v275_v3 = vsub.f32 %v1466_v22, %v269_v63 }
  0x54   : > { %v293_v6 = vsub.f32 1.0, %v275_v3  ;;  %vm287_vm15 = vcmp.eq.s32.totalorder %v1443_v2, %v1220_v0 }
  0x56   : > { %v299_v7 = vsel %vm287_vm15, %v293_v6, 0.0 }
  0x57   : > { %1087 = vmatmul.msk.f32.gmra.mxu0 %vm364_vm12, %v332_v49 }
  0x58   : > { %1111 = vmatmul.msk.f32.gmra.mxu2 %vm364_vm12, %v356_v5 }
  0x59   : > { %1105 = vmatmul.msk.f32.gmra.mxu1 %vm364_vm12, %v350_v10  ;;  %1117 = vmatmul.msk.f32.gmra.mxu3 %vm364_vm12, %v362_v11  ;;  %v270_v10 = vfloor.f32 %v1463_v20 }
  0x5b   : > { %v1222_v22 = vcvt.f32.s32 %v270_v10 }
  0x5d   : > { %vm288_vm1 = vcmp.eq.s32.totalorder %v1443_v2, %v1222_v22 }
  0x5f   : > { %1088 = vmatmul.msk.f32.gmra.mxu0 %vm364_vm12, %v333_v50  ;;  %v255_v50 = vcvt.s32.f32 %v1441_v1 }
  0x60   : > { %1112 = vmatmul.msk.f32.gmra.mxu2 %vm364_vm12, %v357_v9 }
  0x61   : > { %1106 = vmatmul.msk.f32.gmra.mxu1 %vm364_vm12, %v351_v13  ;;  %1118 = vmatmul.msk.f32.gmra.mxu3 %vm364_vm12, %v363_v14  ;;  %v306_v13 = vadd.s32 1, %v1222_v22 }
  0x63   : > { %vm312_vm2 = vcmp.eq.s32.totalorder %v1443_v2, %v306_v13 }
  0x67   : > { %1089 = vmatmul.msk.f32.gmra.mxu0 %vm364_vm12, %v334_v51 }
  0x6f   : > { %1090 = vmatmul.msk.f32.gmra.mxu0 %vm364_vm12, %v335_v52  ;;  %v262_v52 = vadd.f32 %v1451_v16, %v255_v50  ;;  %v832_v50 = vld [vmem:[%s1657_s24 + $0x30] sm:$0xff] }
  0x77   : > { %1091 = vmatmul.msk.f32.gmra.mxu0 %vm364_vm12, %v336_v54  ;;  %v268_v54 = vfloor.f32 %v262_v52 }
  0x79   : > { %v1218_v56 = vcvt.f32.s32 %v268_v54  ;;  %v274_v57 = vsub.f32 %v262_v52, %v268_v54  ;;  %v827_v54 = vld [vmem:[%s1657_s24 + $0x8] sm:$0xff] }
  0x7b   : > { %v292_v59 = vsub.f32 1.0, %v274_v57  ;;  %vm286_vm13 = vcmp.eq.s32.totalorder %v1443_v2, %v1218_v56 }
  0x7d   : > { %v298_v16 = vsel %vm286_vm13, %v292_v59, 0.0 }
  0x7f   : > { %1092 = vmatmul.msk.f32.gmra.mxu0 %vm364_vm12, %v337_v58  ;;  %v304_v58 = vadd.s32 1, %v1218_v56  ;;  %v833_v56 = vld [vmem:[%s1657_s24 + $0x38] sm:$0xff] }
  0x81   : > { %vm310_vm14 = vcmp.eq.s32.totalorder %v1443_v2, %v304_v58 }
  0x82   : > { %v316_v60 = vsel %vm310_vm14, %v274_v57, 0.0 }
  0x83   : > { %v1566_v61 = vadd.f32 %v316_v60, %v298_v16  ;;  %v834_v60 = vld [vmem:[%s1657_s24 + $0x40] sm:$0xff] }
  0x87   : > { %1093 = vmatmul.msk.f32.gmra.mxu0 %vm364_vm12, %v338_v62 }
  0x8f   : > { %1094 = vmatmul.msk.f32.gmra.mxu0 %vm364_vm12, %v339_v4  ;;  %v305_v4 = vadd.s32 1, %v1220_v0  ;;  %v829_v0 = vld [vmem:[%s1657_s24 + $0x18] sm:$0xff] }
  0x91   : > { %vm311_vm0 = vcmp.eq.s32.totalorder %v1443_v2, %v305_v4  ;;  %v835_v4 = vld [vmem:[%s1657_s24 + $0x48] sm:$0xff] }
  0x97   : > { %1095 = vmatmul.msk.f32.gmra.mxu0 %vm364_vm12, %v340_v8  ;;  %v317_v8 = vsel %vm311_vm0, %v275_v3, 0.0 }
  0x98   : > { %v1578_v9 = vadd.f32 %v317_v8, %v299_v7  ;;  %v830_v8 = vld [vmem:[%s1657_s24 + $0x20] sm:$0xff] }
  0x9f   : > { %1096 = vmatmul.msk.f32.gmra.mxu0 %vm364_vm12, %v341_v12  ;;  %v276_v12 = vsub.f32 %v1463_v20, %v270_v10  ;;  %v850_v10 = vld [vmem:[%s1657_s24 + $0xc0] sm:$0xff] }
  0xa7   : > { %1097 = vmatmul.msk.f32.gmra.mxu0 %vm364_vm12, %v342_v15  ;;  %v294_v15 = vsub.f32 1.0, %v276_v12 }
  0xaf   : > { %1098 = vmatmul.msk.f32.gmra.mxu0 %vm364_vm12, %v343_v21  ;;  %v300_v21 = vsel %vm288_vm1, %v294_v15, 0.0 }
  0xb4   : > { %v490_v23 = vpop.f32.mrf.mxu0 }
  0xb6   : > { %v544_v35 = vpop.f32.mrf.mxu1 }
  0xb7   : > { %1099 = vmatmul.msk.f32.gmra.mxu0 %vm364_vm12, %v344_v24 }
  0xbb   : > { %v562_v33 = vpop.f32.mrf.mxu2 }
  0xbc   : > { %v493_v25 = vpop.f32.mrf.mxu0  ;;  %v1554_v46 = vpop.f32.mrf.mxu3 }
  0xbe   : > { %v547_v38 = vpop.f32.mrf.mxu1 }
  0xbf   : > { %1100 = vmatmul.msk.f32.gmra.mxu0 %vm364_vm12, %v345_v26 }
  0xc3   : > { %v565_v36 = vpop.f32.mrf.mxu2 }
  0xc4   : > { %v496_v27 = vpop.f32.mrf.mxu0  ;;  %v1562_v53 = vpop.f32.mrf.mxu3 }
  0xc6   : > { %v550_v41 = vpop.f32.mrf.mxu1 }
  0xcb   : > { %v568_v39 = vpop.f32.mrf.mxu2 }
  0xcc   : > { %v499_v28 = vpop.f32.mrf.mxu0  ;;  %v1568_v62 = vpop.f32.mrf.mxu3 }
  0xce   : > { %v553_v44 = vpop.f32.mrf.mxu1 }
  0xd3   : > { %v571_v42 = vpop.f32.mrf.mxu2 }
  0xd4   : > { %v502_v29 = vpop.f32.mrf.mxu0  ;;  %v589_v11 = vpop.f32.mrf.mxu3 }
  0xd6   : > { %v556_v48 = vpop.f32.mrf.mxu1 }
  0xdb   : > { %v574_v45 = vpop.f32.mrf.mxu2 }
  0xdc   : > { %v505_v30 = vpop.f32.mrf.mxu0 }
  0xdd   : > { %626 = vmatpush.msrb.mxu1 %v505_v30 }
  0xde   : > { %v559_v55 = vpop.f32.mrf.mxu1 }
  0xdf   : > { %627 = vmatpush.msrb.mxu1 %v502_v29 }
  0xe1   : > { %628 = vmatpush.msrb.mxu1 %v499_v28 }
  0xe3   : > { %629 = vmatpush.msrb.mxu1 %v496_v27  ;;  %v577_v49 = vpop.f32.mrf.mxu2  ;;  %v592_v27 = vpop.f32.mrf.mxu3 }
  0xe4   : > { %v508_v31 = vpop.f32.mrf.mxu0 }
  0xe5   : > { %630 = vmatpush.msrb.mxu1 %v493_v25  ;;  %v271_v25 = vfloor.f32 %v1460_v19 }
  0xe7   : > { %631 = vmatpush.msrb.mxu1 %v490_v23  ;;  %v318_v23 = vsel %vm312_vm2, %v276_v12, 0.0  ;;  %v277_v20 = vsub.f32 %v1460_v19, %v271_v25  ;;  %v1224_v26 = vcvt.f32.s32 %v271_v25  ;;  %v837_v25 = vld [vmem:[%s1657_s24 + $0x58] sm:$0xff] }
  0xe8   : > { %1119 = vmatmul.msk.f32.vlgmr.msrb.gmra.mxu1 %vm364_vm12, %v1566_v61  ;;  %v1588_v24 = vadd.f32 %v318_v23, %v300_v21  ;;  %v831_v21 = vld [vmem:[%s1657_s24 + $0x28] sm:$0xff] }
  0xe9   : > { %731 = vmatpush.msra.mxu1 %v559_v55  ;;  %vm289_vm3 = vcmp.eq.s32.totalorder %v1443_v2, %v1224_v26  ;;  %v295_v28 = vsub.f32 1.0, %v277_v20  ;;  %v307_v29 = vadd.s32 1, %v1224_v26 }
  0xeb   : > { %732 = vmatpush.msra.mxu1 %v556_v48  ;;  %vm313_vm4 = vcmp.eq.s32.totalorder %v1443_v2, %v307_v29 }
  0xec   : > { %v511_v32 = vpop.f32.mrf.mxu0 }
  0xed   : > { %733 = vmatpush.msra.mxu1 %v553_v44 }
  0xef   : > { %734 = vmatpush.msra.mxu1 %v550_v41 }
  0xf0   : > { %1120 = vmatmul.msk.f32.gmra.mxu1 %vm364_vm12, %v1578_v9 }
  0xf1   : > { %735 = vmatpush.msra.mxu1 %v547_v38  ;;  %v595_v38 = vpop.f32.mrf.mxu3 }
  0xf3   : > { %736 = vmatpush.msra.mxu1 %v544_v35 }
  0xf4   : > { %v514_v34 = vpop.f32.mrf.mxu0 }
  0xf8   : > { %1121 = vmatmul.msk.f32.gmra.mxu1 %vm364_vm12, %v1588_v24 }
  0xfc   : > { %v517_v37 = vpop.f32.mrf.mxu0 }
 0x104   : > { %v520_v40 = vpop.f32.mrf.mxu0 }
 0x10c   : > { %v523_v43 = vpop.f32.mrf.mxu0 }
 0x10d   : > { %661 = vmatpush.msrb.mxu2 %v523_v43 }
 0x10f   : > { %662 = vmatpush.msrb.mxu2 %v520_v40 }
 0x111   : > { %663 = vmatpush.msrb.mxu2 %v517_v37 }
 0x113   : > { %664 = vmatpush.msrb.mxu2 %v514_v34  ;;  %v272_v34 = vfloor.f32 %v1457_v18 }
 0x114   : > { %v1556_v47 = vpop.f32.mrf.mxu0 }
 0x115   : > { %665 = vmatpush.msrb.mxu2 %v511_v32  ;;  %v319_v32 = vsel %vm313_vm4, %v277_v20, 0.0  ;;  %v278_v19 = vsub.f32 %v1457_v18, %v272_v34  ;;  %v1226_v35 = vcvt.f32.s32 %v272_v34  ;;  %v273_v18 = vfloor.f32 %v1454_v17 }
 0x117   : > { %666 = vmatpush.msrb.mxu2 %v508_v31  ;;  %v301_v31 = vsel %vm289_vm3, %v295_v28, 0.0  ;;  %vm290_vm5 = vcmp.eq.s32.totalorder %v1443_v2, %v1226_v35  ;;  %v308_v37 = vadd.s32 1, %v1226_v35  ;;  %v1228_v43 = vcvt.f32.s32 %v273_v18 }
 0x118   : > { %1125 = vmatmul.msk.f32.vlgmr.msrb.gmra.mxu2 %vm364_vm12, %v1566_v61 }
 0x119   : > { %766 = vmatpush.msra.mxu2 %v577_v49  ;;  %vm314_vm6 = vcmp.eq.s32.totalorder %v1443_v2, %v308_v37  ;;  %vm291_vm7 = vcmp.eq.s32.totalorder %v1443_v2, %v1228_v43 }
 0x11a   : > { %v320_v40 = vsel %vm314_vm6, %v278_v19, 0.0 }
 0x11b   : > { %767 = vmatpush.msra.mxu2 %v574_v45  ;;  %v309_v45 = vadd.s32 1, %v1228_v43 }
 0x11c   : > { %v1559_v51 = vpop.f32.mrf.mxu0 }
 0x11d   : > { %768 = vmatpush.msra.mxu2 %v571_v42  ;;  %v279_v42 = vsub.f32 %v1454_v17, %v273_v18  ;;  %vm315_vm8 = vcmp.eq.s32.totalorder %v1443_v2, %v309_v45  ;;  %v826_v2 = vld [vmem:[%s1657_s24] sm:$0xff] }
 0x11f   : > { %769 = vmatpush.msra.mxu2 %v568_v39  ;;  %v297_v44 = vsub.f32 1.0, %v279_v42  ;;  %v321_v48 = vsel %vm315_vm8, %v279_v42, 0.0 }
 0x120   : > { %1126 = vmatmul.msk.f32.gmra.mxu2 %vm364_vm12, %v1578_v9 }
 0x121   : > { %770 = vmatpush.msra.mxu2 %v565_v36  ;;  %v296_v36 = vsub.f32 1.0, %v278_v19 }
 0x123   : > { %771 = vmatpush.msra.mxu2 %v562_v33  ;;  %v325_v33 = vadd.f32 %v319_v32, %v301_v31  ;;  %v302_v39 = vsel %vm290_vm5, %v296_v36, 0.0  ;;  %v852_v32 = vld [vmem:[%s1657_s24 + $0xd0] sm:$0xff] }
 0x124   : > { %v532_v1 = vpop.f32.mrf.mxu0  ;;  %v326_v41 = vadd.f32 %v320_v40, %v302_v39  ;;  %v853_v40 = vld [vmem:[%s1657_s24 + $0xd8] sm:$0xff] }
 0x125   : > { %1122 = vmatmul.msk.f32.gmra.mxu1 %vm364_vm12, %v325_v33 }
 0x128   : > { %1127 = vmatmul.msk.f32.gmra.mxu2 %vm364_vm12, %v1588_v24 }
 0x12c   : > { %v535_v5 = vpop.f32.mrf.mxu0 }
 0x12d   : > { %1123 = vmatmul.msk.f32.gmra.mxu1 %vm364_vm12, %v326_v41 }
 0x130   : > { %1128 = vmatmul.msk.f32.gmra.mxu2 %vm364_vm12, %v325_v33 }
 0x134   : > { %v538_v14 = vpop.f32.mrf.mxu0 }
 0x138   : > { %1129 = vmatmul.msk.f32.gmra.mxu2 %vm364_vm12, %v326_v41 }
 0x13c   : > { %v541_v30 = vpop.f32.mrf.mxu0 }
 0x13d   : > { %696 = vmatpush.msrb.mxu3 %v541_v30  ;;  %v856_v30 = vld [vmem:[%s1657_s24 + $0xf0] sm:$0xff] }
 0x13f   : > { %697 = vmatpush.msrb.mxu3 %v538_v14 }
 0x141   : > { %698 = vmatpush.msrb.mxu3 %v535_v5 }
 0x143   : > { %699 = vmatpush.msrb.mxu3 %v532_v1  ;;  %v828_v1 = vld [vmem:[%s1657_s24 + $0x10] sm:$0xff] }
 0x145   : > { %700 = vmatpush.msrb.mxu3 %v1559_v51 }
 0x147   : > { %701 = vmatpush.msrb.mxu3 %v1556_v47  ;;  %v303_v47 = vsel %vm291_vm7, %v297_v44, 0.0 }
 0x148   : > { %1131 = vmatmul.msk.f32.vlgmr.msrb.gmra.mxu3 %vm364_vm12, %v1566_v61  ;;  %v327_v49 = vadd.f32 %v321_v48, %v303_v47  ;;  %v858_v47 = vld [vmem:[%s1657_s24 + $0x100] sm:$0xff] }
 0x149   : > { %801 = vmatpush.msra.mxu3 %v595_v38  ;;  %v857_v38 = vld [vmem:[%s1657_s24 + $0xf8] sm:$0xff] }
 0x14a   : > { %1130 = vmatmul.msk.f32.gmra.mxu2 %vm364_vm12, %v327_v49  ;;  %1124 = vmatmul.msk.f32.gmra.mxu1 %vm364_vm12, %v327_v49 }
 0x14b   : > { %802 = vmatpush.msra.mxu3 %v592_v27 }
 0x14d   : > { %803 = vmatpush.msra.mxu3 %v589_v11  ;;  %v836_v11 = vld [vmem:[%s1657_s24 + $0x50] sm:$0xff] }
 0x14f   : > { %804 = vmatpush.msra.mxu3 %v1568_v62 }
 0x150   : > { %1132 = vmatmul.msk.f32.gmra.mxu3 %vm364_vm12, %v1578_v9 }
 0x151   : > { %805 = vmatpush.msra.mxu3 %v1562_v53 }
 0x152   : > { %1143 = vmatmul.msk.f32.vlgmr.msra.gmra.mxu2 %vm364_vm12, %v1566_v61  ;;  %1137 = vmatmul.msk.f32.vlgmr.msra.gmra.mxu1 %vm364_vm12, %v1566_v61 }
 0x153   : > { %806 = vmatpush.msra.mxu3 %v1554_v46 }
 0x158   : > { %1133 = vmatmul.msk.f32.gmra.mxu3 %vm364_vm12, %v1588_v24 }
 0x15a   : > { %1144 = vmatmul.msk.f32.gmra.mxu2 %vm364_vm12, %v1578_v9  ;;  %1138 = vmatmul.msk.f32.gmra.mxu1 %vm364_vm12, %v1578_v9 }
 0x160   : > { %1134 = vmatmul.msk.f32.gmra.mxu3 %vm364_vm12, %v325_v33 }
 0x162   : > { %1145 = vmatmul.msk.f32.gmra.mxu2 %vm364_vm12, %v1588_v24  ;;  %1139 = vmatmul.msk.f32.gmra.mxu1 %vm364_vm12, %v1588_v24 }
 0x165   : > { %v633_v17 = vpop.f32.mrf.mxu1 }
 0x166   : > { %v874_v46 = vmax.f32 %v826_v2, %v633_v17  ;;  %v864_v2 = vld [vmem:[%s1657_s24 + $0x130] sm:$0xff] }
 0x168   : > { %1135 = vmatmul.msk.f32.gmra.mxu3 %vm364_vm12, %v326_v41  ;;  %886 = vst.msk [vmem:[%s1663_s26] sm:$0xff] %vm364_vm12, %v874_v46 }
 0x16a   : > { %1146 = vmatmul.msk.f32.gmra.mxu2 %vm364_vm12, %v325_v33  ;;  %1140 = vmatmul.msk.f32.gmra.mxu1 %vm364_vm12, %v325_v33 }
 0x16d   : > { %v636_v53 = vpop.f32.mrf.mxu1 }
 0x16e   : > { %v875_v55 = vmax.f32 %v827_v54, %v636_v53  ;;  %v859_v53 = vld [vmem:[%s1657_s24 + $0x108] sm:$0xff] }
 0x170   : > { %1136 = vmatmul.msk.f32.gmra.mxu3 %vm364_vm12, %v327_v49  ;;  %887 = vst.msk [vmem:[%s1663_s26 + $0x8] sm:$0xff] %vm364_vm12, %v875_v55  ;;  %v855_v55 = vld [vmem:[%s1657_s24 + $0xe8] sm:$0xff] }
 0x172   : > { %1147 = vmatmul.msk.f32.gmra.mxu2 %vm364_vm12, %v326_v41  ;;  %1141 = vmatmul.msk.f32.gmra.mxu1 %vm364_vm12, %v326_v41 }
 0x175   : > { %v639_v59 = vpop.f32.mrf.mxu1 }
 0x176   : > { %v876_v16 = vmax.f32 %v828_v1, %v639_v59 }
 0x178   : > { %1149 = vmatmul.msk.f32.vlgmr.msra.gmra.mxu3 %vm364_vm12, %v1566_v61  ;;  %888 = vst.msk [vmem:[%s1663_s26 + $0x10] sm:$0xff] %vm364_vm12, %v876_v16 }
 0x17a   : > { %1148 = vmatmul.msk.f32.gmra.mxu2 %vm364_vm12, %v327_v49  ;;  %1142 = vmatmul.msk.f32.gmra.mxu1 %vm364_vm12, %v327_v49 }
 0x180   : > { %1150 = vmatmul.msk.f32.gmra.mxu3 %vm364_vm12, %v1578_v9 }
 0x188   : > { %1151 = vmatmul.msk.f32.gmra.mxu3 %vm364_vm12, %v1588_v24  ;;  %v851_v24 = vld [vmem:[%s1657_s24 + $0xc8] sm:$0xff] }
 0x190   : > { %1152 = vmatmul.msk.f32.gmra.mxu3 %vm364_vm12, %v325_v33  ;;  %v862_v33 = vld [vmem:[%s1657_s24 + $0x120] sm:$0xff] }
 0x198   : > { %1153 = vmatmul.msk.f32.gmra.mxu3 %vm364_vm12, %v326_v41  ;;  %v863_v41 = vld [vmem:[%s1657_s24 + $0x128] sm:$0xff] }
 0x19b   : > { %v668_v51 = vpop.f32.mrf.mxu2 }
 0x19c   : > { %v880_v52 = vmax.f32 %v832_v50, %v668_v51 }
 0x19e   : > { %892 = vst.msk [vmem:[%s1663_s26 + $0x30] sm:$0xff] %vm364_vm12, %v880_v52 }
 0x1a0   : > { %1154 = vmatmul.msk.f32.gmra.mxu3 %vm364_vm12, %v327_v49  ;;  %v854_v49 = vld [vmem:[%s1657_s24 + $0xe0] sm:$0xff] }
 0x1a2   : > { %v642_v63 = vpop.f32.mrf.mxu1 }
 0x1a3   : > { %v671_v57 = vpop.f32.mrf.mxu2  ;;  %v877_v3 = vmax.f32 %v829_v0, %v642_v63  ;;  %v866_v63 = vld [vmem:[%s1657_s24 + $0x140] sm:$0xff] }
 0x1a4   : > { %v881_v58 = vmax.f32 %v833_v56, %v671_v57  ;;  %v865_v56 = vld [vmem:[%s1657_s24 + $0x138] sm:$0xff] }
 0x1a5   : > { %889 = vst.msk [vmem:[%s1663_s26 + $0x18] sm:$0xff] %vm364_vm12, %v877_v3 }
 0x1a6   : > { %893 = vst.msk [vmem:[%s1663_s26 + $0x38] sm:$0xff] %vm364_vm12, %v881_v58 }
 0x1aa   : > { %v645_v7 = vpop.f32.mrf.mxu1 }
 0x1ab   : > { %v674_v61 = vpop.f32.mrf.mxu2  ;;  %v878_v9 = vmax.f32 %v830_v8, %v645_v7  ;;  %v861_v7 = vld [vmem:[%s1657_s24 + $0x118] sm:$0xff] }
 0x1ac   : > { %v882_v62 = vmax.f32 %v834_v60, %v674_v61  ;;  %v860_v60 = vld [vmem:[%s1657_s24 + $0x110] sm:$0xff] }
 0x1ad   : > { %890 = vst.msk [vmem:[%s1663_s26 + $0x20] sm:$0xff] %vm364_vm12, %v878_v9  ;;  %v869_v9 = vld [vmem:[%s1657_s24 + $0x158] sm:$0xff] }
 0x1ae   : > { %894 = vst.msk [vmem:[%s1663_s26 + $0x40] sm:$0xff] %vm364_vm12, %v882_v62  ;;  %v868_v62 = vld [vmem:[%s1657_s24 + $0x150] sm:$0xff] }
 0x1b3   : > { %v677_v5 = vpop.f32.mrf.mxu2 }
 0x1b4   : > { %v883_v6 = vmax.f32 %v835_v4, %v677_v5 }
 0x1b6   : > { %895 = vst.msk [vmem:[%s1663_s26 + $0x48] sm:$0xff] %vm364_vm12, %v883_v6 }
 0x1bb   : > { %v680_v12 = vpop.f32.mrf.mxu2 }
 0x1bc   : > { %v884_v14 = vmax.f32 %v836_v11, %v680_v12  ;;  %v838_v12 = vld [vmem:[%s1657_s24 + $0x60] sm:$0xff] }
 0x1be   : > { %896 = vst.msk [vmem:[%s1663_s26 + $0x50] sm:$0xff] %vm364_vm12, %v884_v14 }
 0x1c7   : > { %v648_v15 = vpop.f32.mrf.mxu1 }
 0x1c8   : > { %v879_v23 = vmax.f32 %v831_v21, %v648_v15  ;;  %v840_v21 = vld [vmem:[%s1657_s24 + $0x70] sm:$0xff] }
 0x1ca   : > { %891 = vst.msk [vmem:[%s1663_s26 + $0x28] sm:$0xff] %vm364_vm12, %v879_v23  ;;  %v841_v23 = vld [vmem:[%s1657_s24 + $0x78] sm:$0xff] }
 0x1cb   : > { %v703_v22 = vpop.f32.mrf.mxu3 }
 0x1cc   : > { %v923_v13 = vmax.f32 %v850_v10, %v703_v22  ;;  %v867_v10 = vld [vmem:[%s1657_s24 + $0x148] sm:$0xff] }
 0x1cd   : > { %v683_v26 = vpop.f32.mrf.mxu2 }
 0x1ce   : > { %1167 = vst.msk [vmem:[%s1663_s26 + $0xc0] sm:$0xff] %vm364_vm12, %v923_v13  ;;  %v885_v28 = vmax.f32 %v837_v25, %v683_v26  ;;  %v839_v13 = vld [vmem:[%s1657_s24 + $0x68] sm:$0xff]  ;;  %v842_v25 = vld [vmem:[%s1657_s24 + $0x80] sm:$0xff] }
 0x1cf   : > { %v738_v29 = vpop.f32.mrf.mxu1  ;;  %v843_v26 = vld [vmem:[%s1657_s24 + $0x88] sm:$0xff] }
 0x1d0   : > { %897 = vst.msk [vmem:[%s1663_s26 + $0x58] sm:$0xff] %vm364_vm12, %v885_v28  ;;  %v929_v31 = vmax.f32 %v856_v30, %v738_v29  ;;  %v901_v28 = vmax.f32 %v841_v23, 0.0  ;;  %v844_v29 = vld [vmem:[%s1657_s24 + $0x90] sm:$0xff]  ;;  %v902_v30 = vmax.f32 %v842_v25, 0.0 }
 0x1d2   : > { %1173 = vst.msk [vmem:[%s1663_s26 + $0xf0] sm:$0xff] %vm364_vm12, %v929_v31  ;;  %v870_v31 = vld [vmem:[%s1657_s24 + $0x160] sm:$0xff] }
 0x1d3   : > { %v706_v20 = vpop.f32.mrf.mxu3  ;;  %1158 = vst.msk [vmem:[%s1663_s26 + $0x78] sm:$0xff] %vm364_vm12, %v901_v28 }
 0x1d4   : > { %v924_v27 = vmax.f32 %v851_v24, %v706_v20  ;;  %v898_v24 = vmax.f32 %v838_v12, 0.0  ;;  %v899_v20 = vmax.f32 %v839_v13, 0.0  ;;  %1159 = vst.msk [vmem:[%s1663_s26 + $0x80] sm:$0xff] %vm364_vm12, %v902_v30 }
 0x1d5   : > { %v773_v19 = vpop.f32.mrf.mxu2 }
 0x1d6   : > { %1168 = vst.msk [vmem:[%s1663_s26 + $0xc8] sm:$0xff] %vm364_vm12, %v924_v27  ;;  %v935_v36 = vmax.f32 %v862_v33, %v773_v19  ;;  %v900_v27 = vmax.f32 %v840_v21, 0.0  ;;  %v903_v33 = vmax.f32 %v843_v26, 0.0 }
 0x1d7   : > { %v741_v37 = vpop.f32.mrf.mxu1  ;;  %1155 = vst.msk [vmem:[%s1663_s26 + $0x60] sm:$0xff] %vm364_vm12, %v898_v24 }
 0x1d8   : > { %1179 = vst.msk [vmem:[%s1663_s26 + $0x120] sm:$0xff] %vm364_vm12, %v935_v36  ;;  %v930_v39 = vmax.f32 %v857_v38, %v741_v37  ;;  %v904_v36 = vmax.f32 %v844_v29, 0.0  ;;  %v848_v38 = vld [vmem:[%s1657_s24 + $0xb0] sm:$0xff] }
 0x1d9   : > { %1156 = vst.msk [vmem:[%s1663_s26 + $0x68] sm:$0xff] %vm364_vm12, %v899_v20 }
 0x1da   : > { %1174 = vst.msk [vmem:[%s1663_s26 + $0xf8] sm:$0xff] %vm364_vm12, %v930_v39 }
 0x1db   : > { %v709_v34 = vpop.f32.mrf.mxu3  ;;  %1157 = vst.msk [vmem:[%s1663_s26 + $0x70] sm:$0xff] %vm364_vm12, %v900_v27 }
 0x1dc   : > { %v925_v35 = vmax.f32 %v852_v32, %v709_v34  ;;  %v845_v32 = vld [vmem:[%s1657_s24 + $0x98] sm:$0xff]  ;;  %v846_v34 = vld [vmem:[%s1657_s24 + $0xa0] sm:$0xff]  ;;  %1160 = vst.msk [vmem:[%s1663_s26 + $0x88] sm:$0xff] %vm364_vm12, %v903_v33 }
 0x1dd   : > { %v776_v42 = vpop.f32.mrf.mxu2  ;;  %v905_v39 = vmax.f32 %v845_v32, 0.0  ;;  %1161 = vst.msk [vmem:[%s1663_s26 + $0x90] sm:$0xff] %vm364_vm12, %v904_v36 }
 0x1de   : > { %1169 = vst.msk [vmem:[%s1663_s26 + $0xd0] sm:$0xff] %vm364_vm12, %v925_v35  ;;  %v936_v44 = vmax.f32 %v863_v41, %v776_v42  ;;  %v847_v35 = vld [vmem:[%s1657_s24 + $0xa8] sm:$0xff]  ;;  %v906_v41 = vmax.f32 %v846_v34, 0.0  ;;  %v908_v42 = vmax.f32 %v848_v38, 0.0 }
 0x1df   : > { %v744_v45 = vpop.f32.mrf.mxu1  ;;  %1162 = vst.msk [vmem:[%s1663_s26 + $0x98] sm:$0xff] %vm364_vm12, %v905_v39 }
 0x1e0   : > { %1180 = vst.msk [vmem:[%s1663_s26 + $0x128] sm:$0xff] %vm364_vm12, %v936_v44  ;;  %v931_v48 = vmax.f32 %v858_v47, %v744_v45  ;;  %v871_v44 = vld [vmem:[%s1657_s24 + $0x168] sm:$0xff] }
 0x1e1   : > { %1163 = vst.msk [vmem:[%s1663_s26 + $0xa0] sm:$0xff] %vm364_vm12, %v906_v41 }
 0x1e2   : > { %1175 = vst.msk [vmem:[%s1663_s26 + $0x100] sm:$0xff] %vm364_vm12, %v931_v48  ;;  %v872_v48 = vld [vmem:[%s1657_s24 + $0x170] sm:$0xff] }
 0x1e3   : > { %v712_v18 = vpop.f32.mrf.mxu3  ;;  %1165 = vst.msk [vmem:[%s1663_s26 + $0xb0] sm:$0xff] %vm364_vm12, %v908_v42 }
 0x1e4   : > { %v926_v43 = vmax.f32 %v853_v40, %v712_v18  ;;  %v849_v40 = vld [vmem:[%s1657_s24 + $0xb8] sm:$0xff]  ;;  %v907_v18 = vmax.f32 %v847_v35, 0.0 }
 0x1e5   : > { %v779_v46 = vpop.f32.mrf.mxu2 }
 0x1e6   : > { %1170 = vst.msk [vmem:[%s1663_s26 + $0xd8] sm:$0xff] %vm364_vm12, %v926_v43  ;;  %v937_v51 = vmax.f32 %v864_v2, %v779_v46  ;;  %v909_v43 = vmax.f32 %v849_v40, 0.0 }
 0x1e7   : > { %v747_v52 = vpop.f32.mrf.mxu1  ;;  %1164 = vst.msk [vmem:[%s1663_s26 + $0xa8] sm:$0xff] %vm364_vm12, %v907_v18 }
 0x1e8   : > { %1181 = vst.msk [vmem:[%s1663_s26 + $0x130] sm:$0xff] %vm364_vm12, %v937_v51  ;;  %v932_v54 = vmax.f32 %v859_v53, %v747_v52 }
 0x1e9   : > { %1166 = vst.msk [vmem:[%s1663_s26 + $0xb8] sm:$0xff] %vm364_vm12, %v909_v43 }
 0x1ea   : > { %1176 = vst.msk [vmem:[%s1663_s26 + $0x108] sm:$0xff] %vm364_vm12, %v932_v54 }
 0x1eb   : > { %v715_v17 = vpop.f32.mrf.mxu3 }
 0x1ec   : > { %v927_v50 = vmax.f32 %v854_v49, %v715_v17  ;;  %v873_v17 = vld [vmem:[%s1657_s24 + $0x178] sm:$0xff] }
 0x1ed   : > { %v782_v58 = vpop.f32.mrf.mxu2 }
 0x1ee   : > { %1171 = vst.msk [vmem:[%s1663_s26 + $0xe0] sm:$0xff] %vm364_vm12, %v927_v50  ;;  %v938_v1 = vmax.f32 %v865_v56, %v782_v58 }
 0x1ef   : > { %v750_v16 = vpop.f32.mrf.mxu1 }
 0x1f0   : > { %1182 = vst.msk [vmem:[%s1663_s26 + $0x138] sm:$0xff] %vm364_vm12, %v938_v1  ;;  %v933_v61 = vmax.f32 %v860_v60, %v750_v16 }
 0x1f2   : > { %1177 = vst.msk [vmem:[%s1663_s26 + $0x110] sm:$0xff] %vm364_vm12, %v933_v61 }
 0x1f3   : > { %v718_v57 = vpop.f32.mrf.mxu3 }
 0x1f4   : > { %v928_v59 = vmax.f32 %v855_v55, %v718_v57 }
 0x1f5   : > { %v785_v3 = vpop.f32.mrf.mxu2 }
 0x1f6   : > { %1172 = vst.msk [vmem:[%s1663_s26 + $0xe8] sm:$0xff] %vm364_vm12, %v928_v59  ;;  %v939_v5 = vmax.f32 %v866_v63, %v785_v3 }
 0x1f7   : > { %v753_v6 = vpop.f32.mrf.mxu1 }
 0x1f8   : > { %1183 = vst.msk [vmem:[%s1663_s26 + $0x140] sm:$0xff] %vm364_vm12, %v939_v5  ;;  %v934_v8 = vmax.f32 %v861_v7, %v753_v6 }
 0x1fa   : > { %1178 = vst.msk [vmem:[%s1663_s26 + $0x118] sm:$0xff] %vm364_vm12, %v934_v8 }
 0x1fb   : > { %v808_v0 = vpop.f32.mrf.mxu3 }
 0x1fc   : > { %v941_v4 = vmax.f32 %v868_v62, %v808_v0 }
 0x1fd   : > { %v788_v22 = vpop.f32.mrf.mxu2 }
 0x1fe   : > { %1185 = vst.msk [vmem:[%s1663_s26 + $0x150] sm:$0xff] %vm364_vm12, %v941_v4  ;;  %v940_v15 = vmax.f32 %v867_v10, %v788_v22 }
 0x200   : > { %1184 = vst.msk [vmem:[%s1663_s26 + $0x148] sm:$0xff] %vm364_vm12, %v940_v15 }
 0x203   : > { %v811_v11 = vpop.f32.mrf.mxu3 }
 0x204   : > { %v942_v14 = vmax.f32 %v869_v9, %v811_v11 }
 0x206   : > { %1186 = vst.msk [vmem:[%s1663_s26 + $0x158] sm:$0xff] %vm364_vm12, %v942_v14 }
 0x20b   : > { %v814_v19 = vpop.f32.mrf.mxu3 }
 0x20c   : > { %v943_v37 = vmax.f32 %v870_v31, %v814_v19 }
 0x20e   : > { %1187 = vst.msk [vmem:[%s1663_s26 + $0x160] sm:$0xff] %vm364_vm12, %v943_v37 }
 0x213   : > { %v817_v45 = vpop.f32.mrf.mxu3 }
 0x214   : > { %v944_v47 = vmax.f32 %v871_v44, %v817_v45 }
 0x216   : > { %1188 = vst.msk [vmem:[%s1663_s26 + $0x168] sm:$0xff] %vm364_vm12, %v944_v47 }
 0x21b   : > { %v820_v49 = vpop.f32.mrf.mxu3 }
 0x21c   : > { %v945_v2 = vmax.f32 %v872_v48, %v820_v49 }
 0x21e   : > { %1189 = vst.msk [vmem:[%s1663_s26 + $0x170] sm:$0xff] %vm364_vm12, %v945_v2 }
 0x223   : > { %v823_v46 = vpop.f32.mrf.mxu3 }
 0x224   : > { %v946_v50 = vmax.f32 %v873_v17, %v823_v46 }
 0x226   : > { %1190 = vst.msk [vmem:[%s1663_s26 + $0x178] sm:$0xff] %vm364_vm12, %v946_v50 }
 0x227   : > { %1324 = shalt.err (!%p1321_p8)
}
 0x228   : > { %s1366_s17 = smov 128   ;;  %s1367_s20 = smov 8  }
 0x229   : > { %1234 = dma.vmem_to_hbm [thread:$0]  (%p1426_p5), %s986_s4, 6144, %s988_s5, %s973_s16, %s1366_s17, %s1366_s17, %s1367_s20  }
 0x22a PF: > { %p1246_p9 = scmp.ge.s32.totalorder %s1363_s15, 2  ;;  %s1002_s24 = sand.u32 1, %s1351_s12  }
 0x22b   : > { %s1003_s25 = scalar_lea.sflag [#allocation3], %s1002_s24 }
 0x22c   : > { %p1241_p10 = pnand %p1246_p9, %p1430_p6 }
 0x22e   : > { %p1242_p11 = pneg %p1241_p10 }
 0x230   : > { %1346 = dma.done.wait (%p1242_p11), %s1003_s25, 6144  }
 0x231   : > { %1348 = vsyncadd (%p1242_p11), %s1003_s25, 4294961152  ;;  %p14_p12 = scmp.ge.s32.totalorder %s1413_s18, 4   ;;  %s1848_s12 = smov %s1355_s13 }
 0x232   : > { %s1849_s13 = smov %s1359_s14  ;;  %s1850_s14 = smov %s1424_s21 }
 0x233   : > { %s1851_s15 = smov %s1413_s18  ;;  %16 = sbr.rel (!%p14_p12) target bundleno = 4 (0x4), region = 77 }
 0x238   :  { %1009 = vsyncpa [#allocation3], 1 }
 0x239   :  { %1011 = vsyncpa [#allocation3 + $0x1], 1 }
 0x23a   :  { %1012 = vsyncpa [#allocation4], 1 }
 0x23b   :  { %1014 = vsyncpa [#allocation4 + $0x1], 1 }

// kernel: semantic_mapping_forward.2
= control target key start
LH: loop header
LB: loop body
LE: loop exit
PB: predicated region body
PF: predicated region fallthrough
CT: control target
= control target key end

     0   :  { %14 = vsyncpa [#allocation3], 0  ;;  %s4083_s27 = smov 0   ;;  %s6213_s0 = inlined_call_operand.vmem [shape: f32[2,4], index: 0, kind: input, shape index: {}]   ;;  %s6214_s1 = inlined_call_operand.vmem [shape: f32[2,1,256], index: 1, kind: input, shape index: {}]   ;;  %s6215_s2 = inlined_call_operand.vmem [shape: f32[1,1,256], index: 2, kind: input, shape index: {}]   ;;  %s6216_s3 = inlined_call_operand.vmem [shape: f32[1,1,256], index: 3, kind: input, shape index: {}]   ;;  %s6217_s4 = inlined_call_operand.vmem [shape: f32[2,6,256], index: 4, kind: input, shape index: {}]   ;;  %s6218_s5 = inlined_call_operand.vmem [shape: f32[1,1,2304], index: 5, kind: input, shape index: {}]   ;;  %s6219_s6 = inlined_call_operand.vmem [shape: f32[1,1,2304], index: 6, kind: input, shape index: {}]   ;;  %s6220_s7 = inlined_call_operand.vmem [shape: f32[2,1,16,16], index: 7, kind: output, shape index: {0}]   ;;  %s6221_s8 = inlined_call_operand.vmem [shape: f32[2,6,2304], index: 8, kind: output, shape index: {1}]  }
   0x1 LB: > { %s4089_s28 = sadd.s32 4294967295, %s4033_s27   ;;  %p3707_p0 = scmp.ge.s32.totalorder %s4033_s27, 1  ;;  %s4033_s27 = sphi %s4083_s27, %s20_s27  }
   0x2   : > { %p234_p1 = scmp.lt.s32.totalorder %s4033_s27, 3  ;;  %s246_s9 = sshll.u32 %s6213_s0, 4  ;;  %s247_s9 = int_to_ptr.vmem [resolvable:$true] %s246_s9 }
   0x3   : > { %p3995_p3 = scmp.eq.s32.totalorder %s4089_s28, 0  ;;  %s4035_s10 = smov [#allocation2]  }
   0x4   : > { %p235_p2 = pnand %p3707_p0, %p234_p1 }
   0x6   : > { %p3991_p4 = pneg %p235_p2  ;;  %286 = sbr.rel (%p235_p2) target bundleno = 822 (0x336), region = 48 }
   0x8   : > { %p3992_p5 = pnand %p3995_p3, %p3991_p4 }
   0xa   : > { %3994 = dma.vmem_to_smem (!%p3992_p5), %s247_s9, 32, %s4035_s10, [#allocation3]  }
   0xb   : > { %4028 = dma.done.wait (%p3995_p3), [#allocation3], 32  }
   0xc   : > { %4030 = vsyncadd (%p3995_p3), [#allocation3], 4294967264 }
   0xd   : > { %293 = sfence }
   0xe   : > { %p331_p6 = scmp.lt.s32.totalorder %s4089_s28, 1  ;;  %v437_v0 = vlaneseq  ;;  %v351_v2 = vld [vmem:[%s6215_s2] sm:$0x3]  ;;  %v4036_v11 = vmov 0.2   ;;  %v4037_v24 = vmov 0.0  }
   0xf   : > { %v358_v3 = vld [vmem:[%s6216_s3] sm:$0x3]  ;;  %s3726_s24 = sshll.u32 %s4089_s28, 7 }
  0x10   : > { %s4099_s11 = scalar_select %p331_p6, %s4089_s28, 1  ;;  %v4101_v1 = vshrl.u32 %v437_v0, 7 }
  0x11   : > { %s733_s25 = sadd.s32 1, %s3726_s24  ;;  %s732_s26 = sld [smem:[#allocation2 + %s3726_s24]] }
  0x12   : > { %s3712_s12 = sshll.u32 %s4099_s11, 1  ;;  %vm510_vm0 = vcmp.eq.s32.totalorder %v4101_v1, 1  ;;  %vm523_vm1 = vcmp.eq.s32.totalorder %v4101_v1, 0  ;;  %v4120_v13 = vadd.s32 8, %v4101_v1  ;;  %s3951_s20 = sshll.u32 %s4099_s11, 4 }
  0x13   : > { %s334_s19 = scalar_lea.vmem %s6214_s1, %s3712_s12  ;;  %v524_v12 = vsel %vm510_vm0, 1.0, %v4036_v11  ;;  %s339_s23 = scalar_lea.vmem %s6217_s4, %s3951_s20 }
  0x14   : > { %v350_v4 = vld [vmem:[%s334_s19] sm:$0x3]  ;;  %v4127_v19 = vsel %vm523_vm1, 1.0, %v524_v12  ;;  %s734_s29 = sld [smem:[#allocation2 + %s733_s25]]  ;;  %s344_s14 = scalar_lea.vmem %s6220_s7, %s3951_s20 }
  0x15   : > { %v352_v5 = vmul.f32 %v351_v2, %v350_v4  ;;  %v356_v6 = vmul.f32 0.2, %v350_v4  ;;  %v359_v7 = vmul.f32 %v358_v3, %v350_v4  ;;  %s3953_s19 = smul.u32 144, %s4099_s11 }
  0x17   : > { %v353_v8 = vadd.f32 40.0, %v352_v5  ;;  %v360_v9 = vadd.f32 88.0, %v359_v7  ;;  %v4115_v10 = vfloor.f32 %v356_v6  ;;  %s5112_s21 = scalar_lea.vmem %s6221_s8, %s3953_s19 }
  0x19   : > { %v354_v14 = vmul.f32 0.2, %v353_v8  ;;  %v361_v15 = vmul.f32 0.2, %v360_v9  ;;  %v384_v16 = vadd.f32 1.0, %v4115_v10  ;;  %v385_v17 = vsub.f32 %v356_v6, %v4115_v10 }
  0x1a   : > { %vm389_vm2 = vcmp.gt.f32.partialorder %v4115_v10, 0.0  ;;  %vm390_vm3 = vcmp.lt.f32.partialorder %v4115_v10, 16.0  ;;  %v3962_v18 = vcvt.f32.s32 %v4115_v10 }
  0x1b   : > { %v362_v20 = vadd.f32 8.0, %v361_v15  ;;  %v4129_v21 = vfloor.f32 %v354_v14  ;;  %v386_v22 = vsub.f32 1.0, %v385_v17  ;;  %v387_v23 = vsub.f32 %v384_v16, %v356_v6  ;;  %vm391_vm4 = vmand %vm389_vm2, %vm390_vm3 }
  0x1c   : > { %v3720_v25 = vsel %vm391_vm4, 1.0, %v4037_v24  ;;  %vm394_vm5 = vcmp.gt.f32.partialorder %v384_v16, 0.0  ;;  %vm395_vm6 = vcmp.lt.f32.partialorder %v384_v16, 16.0  ;;  %vm3963_vm7 = vcmp.lt.s32.totalorder %v384_v16, 0 }
  0x1d   : > { %v4133_v26 = vadd.f32 1.0, %v4129_v21  ;;  %v365_v27 = vsub.f32 %v354_v14, %v4129_v21  ;;  %v388_v28 = vsub.f32 1.0, %v387_v23  ;;  %vm396_vm8 = vmand %vm394_vm5, %vm395_vm6  ;;  %v4136_v29 = vmul.f32 %v3720_v25, %v386_v22 }
  0x1e   : > { %v3721_v30 = vsel %vm396_vm8, 1.0, %v4037_v24  ;;  %v3964_v31 = vceil.f32 %v384_v16  ;;  %v3965_v32 = vfloor.f32 %v384_v16  ;;  %v403_v33 = vfloor.f32 %v362_v20 }
  0x1f   : > { %v4139_v34 = vsub.f32 1.0, %v365_v27  ;;  %v367_v35 = vsub.f32 %v4133_v26, %v354_v14  ;;  %v4142_v36 = vmul.f32 %v3721_v30, %v388_v28  ;;  %v474_v37 = vperm.slane %v3962_v18, 0  ;;  %v508_v28 = vld [vmem:[%s339_s23] sm:$0x3f] }
  0x20   : > { %v3966_v38 = vsel %vm3963_vm7, %v3964_v31, %v3965_v32  ;;  %v404_v39 = vadd.f32 1.0, %v403_v33  ;;  %v405_v40 = vsub.f32 %v362_v20, %v403_v33  ;;  %vm409_vm9 = vcmp.gt.f32.partialorder %v403_v33, 0.0  ;;  %v509_v31 = vld [vmem:[%s339_s23 + $0x8] sm:$0x3f] }
  0x21   : > { %v4144_v41 = vsub.f32 1.0, %v367_v35  ;;  %v3967_v42 = vcvt.f32.s32 %v3966_v38  ;;  %vm410_vm10 = vcmp.lt.f32.partialorder %v403_v33, 80.0  ;;  %v3969_v43 = vcvt.f32.s32 %v403_v33 }
  0x22   : > { %v406_v44 = vsub.f32 1.0, %v405_v40  ;;  %v407_v45 = vsub.f32 %v404_v39, %v362_v20  ;;  %vm411_vm11 = vmand %vm409_vm9, %vm410_vm10  ;;  %vm414_vm12 = vcmp.gt.f32.partialorder %v404_v39, 0.0  ;;  %vm415_vm13 = vcmp.lt.f32.partialorder %v404_v39, 80.0 }
  0x23   : > { %v3722_v46 = vsel %vm411_vm11, 1.0, %v4037_v24  ;;  %vm416_vm14 = vmand %vm414_vm12, %vm415_vm13  ;;  %vm3970_vm15 = vcmp.lt.s32.totalorder %v404_v39, 0  ;;  %v3971_v47 = vceil.f32 %v404_v39  ;;  %v3972_v48 = vfloor.f32 %v404_v39 }
  0x24   : > { %v408_v49 = vsub.f32 1.0, %v407_v45  ;;  %v3723_v50 = vsel %vm416_vm14, 1.0, %v4037_v24  ;;  %v420_v51 = vmul.f32 %v3722_v46, %v406_v44  ;;  %vm423_vm1 = vcmp.ge.s32.totalorder %v3969_v43, 13 }
  0x25   : > { %v3973_v52 = vsel %vm3970_vm15, %v3971_v47, %v3972_v48  ;;  %vm424_vm2 = vcmp.lt.s32.totalorder %v3969_v43, 25  ;;  %vm478_vm3 = vcmp.eq.s32.totalorder %v4120_v13, %v474_v37  ;;  %v481_v53 = vperm.slane %v4136_v29, 0 }
  0x26   : > { %v3974_v54 = vcvt.f32.s32 %v3973_v52  ;;  %v422_v55 = vmul.f32 %v3723_v50, %v408_v49  ;;  %vm425_vm4 = vmand %vm423_vm1, %vm424_vm2  ;;  %v489_v56 = vperm.slane %v3967_v42, 0  ;;  %v496_v57 = vperm.slane %v4142_v36, 0 }
  0x27   : > { %v3724_v58 = vsel %vm425_vm4, 1.0, %v4037_v24  ;;  %v487_v59 = vsel %vm478_vm3, %v481_v53, 0.0  ;;  %v475_v60 = vperm.slane %v3962_v18, 1  ;;  %v482_v61 = vperm.slane %v4136_v29, 1 }
  0x28   : > { %vm428_vm5 = vcmp.ge.s32.totalorder %v3974_v54, 13  ;;  %vm429_vm6 = vcmp.lt.s32.totalorder %v3974_v54, 25  ;;  %v433_v62 = vmul.f32 %v3724_v58, %v420_v51  ;;  %v436_v63 = vadd.f32 %v422_v55, %v420_v51 }
  0x29   : > { %vm430_vm7 = vmand %vm428_vm5, %vm429_vm6  ;;  %vm493_vm8 = vcmp.eq.s32.totalorder %v4120_v13, %v489_v56  ;;  %vm479_vm9 = vcmp.eq.s32.totalorder %v4120_v13, %v475_v60  ;;  %v490_v0 = vperm.slane %v3967_v42, 1  ;;  %v497_v2 = vperm.slane %v4142_v36, 1 }
  0x2a   : > { %v3725_v3 = vsel %vm430_vm7, 1.0, %v4037_v24  ;;  %v502_v4 = vsel %vm493_vm8, %v496_v57, 0.0  ;;  %v512_v5 = vperm.slane %v436_v63, 0  ;;  %v513_v6 = vperm.slane %v436_v63, 1 }
  0x2b   : > { %v434_v7 = vmul.f32 %v3725_v3, %v422_v55  ;;  %v506_v8 = vadd.f32 %v502_v4, %v487_v59  ;;  %v488_v9 = vsel %vm479_vm9, %v482_v61, 0.0  ;;  %vm494_vm10 = vcmp.eq.s32.totalorder %v4120_v13, %v490_v0 }
  0x2c   : > { %v503_v10 = vsel %vm494_vm10, %v497_v2, 0.0  ;;  %vm476_vm11 = vcmp.eq.s32.totalorder %v4101_v1, %v474_v37  ;;  %vm491_vm12 = vcmp.eq.s32.totalorder %v4101_v1, %v489_v56  ;;  %vm477_vm13 = vcmp.eq.s32.totalorder %v4101_v1, %v475_v60 }
  0x2d   : > { %v435_v11 = vadd.f32 %v434_v7, %v433_v62  ;;  %612 = vmatpush.xpose.msra.mxu0 %v506_v8  ;;  %v507_v12 = vadd.f32 %v503_v10, %v488_v9  ;;  %v485_v14 = vsel %vm476_vm11, %v481_v53, 0.0  ;;  %v500_v15 = vsel %vm491_vm12, %v496_v57, 0.0 }
  0x2e   : > { %v504_v16 = vadd.f32 %v500_v15, %v485_v14  ;;  %v486_v17 = vsel %vm477_vm13, %v482_v61, 0.0  ;;  %vm492_vm14 = vcmp.eq.s32.totalorder %v4101_v1, %v490_v0  ;;  %vm369_vm15 = vcmp.gt.f32.partialorder %v4129_v21, 0.0 }
  0x2f   : > { %665 = vmatpush.xpose.msra.mxu1 %v507_v12  ;;  %v501_v18 = vsel %vm492_vm14, %v497_v2, 0.0  ;;  %vm370_vm1 = vcmp.lt.f32.partialorder %v4129_v21, 16.0  ;;  %vm374_vm2 = vcmp.gt.f32.partialorder %v4133_v26, 0.0  ;;  %vm375_vm3 = vcmp.lt.f32.partialorder %v4133_v26, 16.0 }
  0x30   : > { %v505_v20 = vadd.f32 %v501_v18, %v486_v17  ;;  %vm371_vm4 = vmand %vm369_vm15, %vm370_vm1  ;;  %v3955_v22 = vcvt.f32.s32 %v4129_v21  ;;  %vm3956_vm5 = vcmp.lt.s32.totalorder %v4133_v26, 0  ;;  %v3957_v23 = vceil.f32 %v4133_v26 }
  0x31   : > { %613 = vmatpush.xpose.msra.mxu0 %v504_v16  ;;  %v3718_v25 = vsel %vm371_vm4, 1.0, %v4037_v24  ;;  %vm376_vm6 = vmand %vm374_vm2, %vm375_vm3  ;;  %v3958_v27 = vfloor.f32 %v4133_v26  ;;  %v517_v29 = vperm.slane %v435_v11, 0  ;;  %v518_v30 = vperm.slane %v435_v11, 1 }
  0x32   : > { %v3719_v32 = vsel %vm376_vm6, 1.0, %v4037_v24  ;;  %v380_v33 = vmul.f32 %v3718_v25, %v4139_v34  ;;  %v440_v35 = vperm.slane %v3955_v22, 0  ;;  %v441_v21 = vperm.slane %v3955_v22, 1 }
  0x33   : > { %666 = vmatpush.xpose.msra.mxu1 %v505_v20  ;;  %v3959_v36 = vsel %vm3956_vm5, %v3957_v23, %v3958_v27  ;;  %v382_v37 = vmul.f32 %v3719_v32, %v4144_v41  ;;  %v521_v38 = vsel %vm510_vm0, %v512_v5, %v517_v29  ;;  %v522_v26 = vsel %vm510_vm0, %v513_v6, %v518_v30 }
  0x34   : > { %v3960_v39 = vcvt.f32.s32 %v3959_v36  ;;  %vm442_vm7 = vcmp.eq.s32.totalorder %v4101_v1, %v440_v35  ;;  %v447_v40 = vperm.slane %v380_v33, 0  ;;  %v526_v42 = vmul.f32 %v521_v38, %v508_v28 }
  0x35   : > { %v462_v24 = vperm.slane %v382_v37, 0  ;;  %v527_v43 = vmul.f32 %v522_v26, %v509_v31  ;;  %vm443_vm8 = vcmp.eq.s32.totalorder %v4101_v1, %v441_v21  ;;  %v448_v34 = vperm.slane %v380_v33, 1 }
  0x36   : > { %v451_v44 = vsel %vm442_vm7, %v447_v40, 0.0  ;;  %v455_v45 = vperm.slane %v3960_v39, 0  ;;  %v456_v46 = vperm.slane %v3960_v39, 1  ;;  %v4187_v41 = vmul.f32 %v526_v42, %v4127_v19 }
  0x37   : > { %v529_v47 = vmul.f32 %v527_v43, %v4127_v19  ;;  %v452_v48 = vsel %vm443_vm8, %v448_v34, 0.0  ;;  %v463_v49 = vperm.slane %v382_v37, 1  ;;  %vm533_vm9 = vcmask 1040384  }
  0x38   : > { %vm457_vm0 = vcmp.eq.s32.totalorder %v4101_v1, %v455_v45  ;;  %vm458_vm10 = vcmp.eq.s32.totalorder %v4101_v1, %v456_v46  ;;  %vm444_vm11 = vcmp.eq.s32.totalorder %v4120_v13, %v440_v35  ;;  %vm459_vm12 = vcmp.eq.s32.totalorder %v4120_v13, %v455_v45 }
  0x39   : > { %v466_v50 = vsel %vm457_vm0, %v462_v24, 0.0  ;;  %v4192_v51 = vrot.slane %v529_v47, 7  ;;  %v467_v52 = vsel %vm458_vm10, %v463_v49, 0.0  ;;  %vm445_vm13 = vcmp.eq.s32.totalorder %v4120_v13, %v441_v21  ;;  %v738_v47 = vld [vmem:[%s6219_s6] sm:$0xff] }
  0x3a   : > { %v4195_v53 = vadd.f32 %v466_v50, %v451_v44  ;;  %v4197_v54 = vadd.f32 %v467_v52, %v452_v48  ;;  %vm460_vm14 = vcmp.eq.s32.totalorder %v4120_v13, %v456_v46  ;;  %v453_v57 = vsel %vm444_vm11, %v447_v40, 0.0 }
  0x3b   : > { %v534_v19 = vsel %vm533_vm9, %v4187_v41, %v4192_v51  ;;  %v468_v58 = vsel %vm459_vm12, %v462_v24, 0.0  ;;  %v454_v59 = vsel %vm445_vm13, %v448_v34, 0.0  ;;  %v469_v60 = vsel %vm460_vm14, %v463_v49, 0.0 }
  0x3c   : > { %v550_v55 = vperm.slane %v534_v19, 0  ;;  %v551_v56 = vperm.slane %v534_v19, 1  ;;  %vm535_vm15 = vcmask 1041409   ;;  %v4206_v63 = vadd.f32 %v468_v58, %v453_v57 }
  0x3d   : > { %v4208_v0 = vadd.f32 %v469_v60, %v454_v59  ;;  %v536_v2 = vsel %vm535_vm15, %v4187_v41, %v4192_v51  ;;  %vm538_vm1 = vcmask 1042434   ;;  %vm541_vm2 = vcmask 1043459  }
  0x3e   : > { %v574_v61 = vmul.f32 %v550_v55, %v4195_v53  ;;  %v575_v62 = vmul.f32 %v551_v56, %v4197_v54  ;;  %v576_v3 = vmul.f32 %v550_v55, %v4206_v63  ;;  %v537_v5 = vrot.slane %v536_v2, 1 }
  0x3f   : > { %v577_v4 = vmul.f32 %v551_v56, %v4208_v0  ;;  %v539_v10 = vsel %vm538_vm1, %v4187_v41, %v4192_v51  ;;  %v542_v20 = vsel %vm541_vm2, %v4187_v41, %v4192_v51  ;;  %vm547_vm3 = vcmask 1045509  }
  0x40   : > { %614 = vmatmul.f32.vlgmr.msra.gmra.mxu0 %v574_v61  ;;  %667 = vmatmul.f32.vlgmr.msra.gmra.mxu1 %v575_v62  ;;  %v552_v6 = vperm.slane %v537_v5, 0  ;;  %v553_v7 = vperm.slane %v537_v5, 1  ;;  %v540_v14 = vrot.slane %v539_v10, 2  ;;  %v543_v25 = vrot.slane %v542_v20, 3 }
  0x41   : > { %v548_v29 = vsel %vm547_vm3, %v4187_v41, %v4192_v51  ;;  %vm544_vm4 = vcmask 1044484   ;;  %v4254_v48 = vstv %s732_s26  ;;  %v4256_v49 = vstv %s734_s29 }
  0x42   : > { %v578_v8 = vmul.f32 %v552_v6, %v4195_v53  ;;  %v579_v9 = vmul.f32 %v553_v7, %v4197_v54  ;;  %v580_v11 = vmul.f32 %v552_v6, %v4206_v63  ;;  %v581_v12 = vmul.f32 %v553_v7, %v4208_v0  ;;  %6306 = vst [vmem:[#allocation5_spill] sm:$0xff] %v4254_v48 }
  0x43   : > { %v554_v15 = vperm.slane %v540_v14, 0  ;;  %v555_v16 = vperm.slane %v540_v14, 1  ;;  %v556_v27 = vperm.slane %v543_v25, 0  ;;  %v557_v28 = vperm.slane %v543_v25, 1  ;;  %6307 = vst [vmem:[#allocation6_spill] sm:$0xff] %v4256_v49 }
  0x44   : > { %v549_v30 = vrot.slane %v548_v29, 5  ;;  %v545_v38 = vsel %vm544_vm4, %v4187_v41, %v4192_v51  ;;  %v735_v41 = vld [vmem:[%s6218_s5] sm:$0xff]  ;;  %v761_v51 = vmul.f32 %v4254_v48, %v738_v47  ;;  %v4299_v29 = vmul.f32 %v4256_v49, %v738_v47 }
  0x45   : > { %v582_v17 = vmul.f32 %v554_v15, %v4195_v53  ;;  %v583_v18 = vmul.f32 %v555_v16, %v4197_v54  ;;  %v584_v22 = vmul.f32 %v554_v15, %v4206_v63  ;;  %v585_v23 = vmul.f32 %v555_v16, %v4208_v0 }
  0x46   : > { %v586_v31 = vmul.f32 %v556_v27, %v4195_v53  ;;  %v587_v32 = vmul.f32 %v557_v28, %v4197_v54  ;;  %v560_v33 = vperm.slane %v549_v30, 0  ;;  %v561_v35 = vperm.slane %v549_v30, 1 }
  0x47   : > { %v588_v26 = vmul.f32 %v556_v27, %v4206_v63  ;;  %v589_v39 = vmul.f32 %v557_v28, %v4208_v0  ;;  %v546_v40 = vrot.slane %v545_v38, 4  ;;  %v758_v50 = vmul.f32 %v4256_v49, %v735_v41 }
  0x48   : > { %617 = vmatmul.f32.gmra.mxu0 %v576_v3  ;;  %670 = vmatmul.f32.gmra.mxu1 %v577_v4  ;;  %v594_v21 = vmul.f32 %v560_v33, %v4195_v53  ;;  %v595_v36 = vmul.f32 %v561_v35, %v4197_v54  ;;  %v596_v37 = vmul.f32 %v560_v33, %v4206_v63 }
  0x49   : > { %v597_v42 = vmul.f32 %v561_v35, %v4208_v0  ;;  %v558_v24 = vperm.slane %v546_v40, 0  ;;  %v559_v43 = vperm.slane %v546_v40, 1  ;;  %v764_v52 = vadd.f32 %v761_v51, %v758_v50 }
  0x4a   : > { %v4296_v28 = vmul.f32 %v4254_v48, %v735_v41 }
  0x4b   : > { %v590_v34 = vmul.f32 %v558_v24, %v4195_v53  ;;  %v591_v44 = vmul.f32 %v559_v43, %v4197_v54  ;;  %v592_v45 = vmul.f32 %v558_v24, %v4206_v63  ;;  %v593_v46 = vmul.f32 %v559_v43, %v4208_v0 }
  0x4c   : > { %v767_v53 = vadd.f32 1.0, %v764_v52  ;;  %v749_v33 = vsub.f32 %v4296_v28, %v4299_v29 }
  0x4e   : > { %v770_v54 = vmul.f32 23.5, %v767_v53 }
  0x50   : > { %620 = vmatmul.f32.gmra.mxu0 %v578_v8  ;;  %673 = vmatmul.f32.gmra.mxu1 %v579_v9  ;;  %v773_v19 = vfloor.f32 %v770_v54 }
  0x52   : > { %v3976_v55 = vcvt.f32.s32 %v773_v19  ;;  %v4262_v57 = vsub.f32 %v770_v54, %v773_v19 }
  0x54   : > { %v4260_v56 = vadd.s32 4294967272, %v3976_v55  ;;  %v4268_v59 = vsub.f32 1.0, %v4262_v57  ;;  %v977_v2 = vperm.slane %v4262_v57, 0  ;;  %v978_v4 = vperm.slane %v4262_v57, 1 }
  0x55   : > { %v981_v15 = vperm.slane %v4262_v57, 4  ;;  %v982_v20 = vperm.slane %v4262_v57, 5  ;;  %v980_v53 = vperm.slane %v4262_v57, 3 }
  0x56   : > { %v4265_v58 = vadd.s32 1, %v4260_v56  ;;  %v785_v60 = vperm.slane %v4260_v56, 0  ;;  %v786_v62 = vperm.slane %v4260_v56, 1  ;;  %v845_v0 = vperm.slane %v4268_v59, 0 }
  0x57   : > { %v846_v3 = vperm.slane %v4268_v59, 1  ;;  %v790_v16 = vperm.slane %v4260_v56, 5  ;;  %v787_v24 = vperm.slane %v4260_v56, 2  ;;  %v788_v41 = vperm.slane %v4260_v56, 3 }
  0x58   : > { %623 = vmatmul.f32.gmra.mxu0 %v580_v11  ;;  %676 = vmatmul.f32.gmra.mxu1 %v581_v12  ;;  %v920_v61 = vperm.slane %v4265_v58, 0  ;;  %v921_v63 = vperm.slane %v4265_v58, 1  ;;  %vm821_vm5 = vcmp.eq.s32.totalorder %v4120_v13, %v785_v60  ;;  %vm822_vm7 = vcmp.eq.s32.totalorder %v4120_v13, %v786_v62 }
  0x59   : > { %v899_v5 = vsel %vm821_vm5, %v845_v0, 0.0  ;;  %v900_v7 = vsel %vm822_vm7, %v846_v3, 0.0  ;;  %v789_v11 = vperm.slane %v4260_v56, 4  ;;  %v849_v12 = vperm.slane %v4268_v59, 4 }
  0x5a   : > { %vm956_vm6 = vcmp.eq.s32.totalorder %v4120_v13, %v920_v61  ;;  %vm957_vm8 = vcmp.eq.s32.totalorder %v4120_v13, %v921_v63  ;;  %v924_v14 = vperm.slane %v4265_v58, 4  ;;  %vm803_vm9 = vcmp.eq.s32.totalorder %v4101_v1, %v785_v60 }
  0x5b   : > { %v1031_v6 = vsel %vm956_vm6, %v977_v2, 0.0  ;;  %v1032_v8 = vsel %vm957_vm8, %v978_v4, 0.0  ;;  %vm825_vm0 = vcmp.eq.s32.totalorder %v4120_v13, %v789_v11  ;;  %vm826_vm11 = vcmp.eq.s32.totalorder %v4120_v13, %v790_v16 }
  0x5c   : > { %v1067_v9 = vadd.f32 %v1031_v6, %v899_v5  ;;  %v1068_v10 = vadd.f32 %v1032_v8, %v900_v7  ;;  %vm960_vm10 = vcmp.eq.s32.totalorder %v4120_v13, %v924_v14  ;;  %v881_v27 = vsel %vm803_vm9, %v845_v0, 0.0 }
  0x5d   : > { %vm938_vm13 = vcmp.eq.s32.totalorder %v4101_v1, %v920_v61  ;;  %vm804_vm14 = vcmp.eq.s32.totalorder %v4101_v1, %v786_v62  ;;  %vm939_vm5 = vcmp.eq.s32.totalorder %v4101_v1, %v921_v63  ;;  %vm807_vm6 = vcmp.eq.s32.totalorder %v4101_v1, %v789_v11 }
  0x5e   : > { %1447 = vmatpush.msra.mxu2 %v1067_v9  ;;  %1500 = vmatpush.msra.mxu3 %v1068_v10  ;;  %v1013_v35 = vsel %vm938_vm13, %v977_v2, 0.0  ;;  %vm942_vm7 = vcmp.eq.s32.totalorder %v4101_v1, %v924_v14  ;;  %vm808_vm8 = vcmp.eq.s32.totalorder %v4101_v1, %v790_v16  ;;  %vm823_vm9 = vcmp.eq.s32.totalorder %v4120_v13, %v787_v24 }
  0x5f   : > { %v848_v50 = vperm.slane %v4268_v59, 3  ;;  %v923_v52 = vperm.slane %v4265_v58, 3  ;;  %vm728_vm13 = vcmask 130048  }
  0x60   : > { %626 = vmatmul.f32.gmra.mxu0 %v582_v17  ;;  %679 = vmatmul.f32.gmra.mxu1 %v583_v18  ;;  %v850_v17 = vperm.slane %v4268_v59, 5  ;;  %v925_v18 = vperm.slane %v4265_v58, 5 }
  0x62   : > { %v904_v25 = vsel %vm826_vm11, %v850_v17, 0.0  ;;  %vm961_vm12 = vcmp.eq.s32.totalorder %v4120_v13, %v925_v18  ;;  %vm824_vm11 = vcmp.eq.s32.totalorder %v4120_v13, %v788_v41 }
  0x63   : > { %v902_v19 = vsel %vm824_vm11, %v848_v50, 0.0 }
  0x68   : > { %629 = vmatmul.f32.gmra.mxu0 %v584_v22  ;;  %682 = vmatmul.f32.gmra.mxu1 %v585_v23  ;;  %v903_v22 = vsel %vm825_vm0, %v849_v12, 0.0  ;;  %v1035_v23 = vsel %vm960_vm10, %v981_v15, 0.0  ;;  %vm943_vm0 = vcmp.eq.s32.totalorder %v4101_v1, %v925_v18 }
  0x69   : > { %v1071_v30 = vadd.f32 %v1035_v23, %v903_v22  ;;  %v1018_v43 = vsel %vm943_vm0, %v982_v20, 0.0 }
  0x6b   : > { %1659 = vmatpush.msrb.mxu0 %v1071_v30 }
  0x70   : > { %632 = vmatmul.f32.gmra.mxu0 %v586_v31  ;;  %685 = vmatmul.f32.gmra.mxu1 %v587_v32  ;;  %v1036_v31 = vsel %vm961_vm12, %v982_v20, 0.0  ;;  %vm959_vm12 = vcmp.eq.s32.totalorder %v4120_v13, %v923_v52 }
  0x71   : > { %v1072_v32 = vadd.f32 %v1036_v31, %v904_v25  ;;  %v1034_v55 = vsel %vm959_vm12, %v980_v53, 0.0 }
  0x72   : > { %v1070_v60 = vadd.f32 %v1034_v55, %v902_v19 }
  0x73   : > { %1712 = vmatpush.msrb.mxu1 %v1072_v32 }
  0x78   : > { %635 = vmatmul.f32.gmra.mxu0 %v588_v26  ;;  %688 = vmatmul.f32.gmra.mxu1 %v589_v39  ;;  %v885_v26 = vsel %vm807_vm6, %v849_v12, 0.0  ;;  %v1017_v39 = vsel %vm942_vm7, %v981_v15, 0.0  ;;  %vm806_vm6 = vcmp.eq.s32.totalorder %v4101_v1, %v788_v41  ;;  %vm941_vm7 = vcmp.eq.s32.totalorder %v4101_v1, %v923_v52 }
  0x79   : > { %v1053_v40 = vadd.f32 %v1017_v39, %v885_v26  ;;  %v884_v18 = vsel %vm806_vm6, %v848_v50, 0.0  ;;  %v1016_v23 = vsel %vm941_vm7, %v980_v53, 0.0 }
  0x7a   : > { %v1052_v25 = vadd.f32 %v1016_v23, %v884_v18 }
  0x7b   : > { %1660 = vmatpush.msrb.mxu0 %v1053_v40 }
  0x80   : > { %638 = vmatmul.f32.gmra.mxu0 %v590_v34  ;;  %691 = vmatmul.f32.gmra.mxu1 %v591_v44  ;;  %v847_v34 = vperm.slane %v4268_v59, 2  ;;  %v922_v44 = vperm.slane %v4265_v58, 2 }
  0x82   : > { %v901_v47 = vsel %vm823_vm9, %v847_v34, 0.0  ;;  %vm958_vm10 = vcmp.eq.s32.totalorder %v4120_v13, %v922_v44 }
  0x88   : > { %641 = vmatmul.f32.gmra.mxu0 %v592_v45  ;;  %694 = vmatmul.f32.gmra.mxu1 %v593_v46  ;;  %v979_v46 = vperm.slane %v4262_v57, 2 }
  0x8a   : > { %v1033_v51 = vsel %vm958_vm10, %v979_v46, 0.0 }
  0x8b   : > { %v1069_v54 = vadd.f32 %v1033_v51, %v901_v47 }
  0x90   : > { %644 = vmatmul.f32.gmra.mxu0 %v594_v21  ;;  %697 = vmatmul.f32.gmra.mxu1 %v595_v36  ;;  %v882_v21 = vsel %vm804_vm14, %v846_v3, 0.0  ;;  %v1014_v36 = vsel %vm939_vm5, %v978_v4, 0.0  ;;  %vm805_vm14 = vcmp.eq.s32.totalorder %v4101_v1, %v787_v24  ;;  %vm940_vm5 = vcmp.eq.s32.totalorder %v4101_v1, %v922_v44  ;;  %v739_v24 = vld [vmem:[%s6219_s6 + $0x8] sm:$0xff] }
  0x91   : > { %v1050_v38 = vadd.f32 %v1014_v36, %v882_v21  ;;  %v883_v16 = vsel %vm805_vm14, %v847_v34, 0.0  ;;  %v762_v34 = vmul.f32 %v4254_v48, %v739_v24 }
  0x93   : > { %1501 = vmatpush.msra.mxu3 %v1050_v38 }
  0x95   : > { %1606 = vmatpush.msrb.mxu3 %v1070_v60 }
  0x97   : > { %1607 = vmatpush.msrb.mxu3 %v1052_v25 }
  0x98   : > { %647 = vmatmul.f32.gmra.mxu0 %v596_v37  ;;  %700 = vmatmul.f32.gmra.mxu1 %v597_v42  ;;  %v1049_v37 = vadd.f32 %v1013_v35, %v881_v27  ;;  %v886_v42 = vsel %vm808_vm8, %v850_v17, 0.0  ;;  %v1015_v17 = vsel %vm940_vm5, %v979_v46, 0.0 }
  0x99   : > { %v1054_v45 = vadd.f32 %v1018_v43, %v886_v42  ;;  %v1051_v22 = vadd.f32 %v1015_v17, %v883_v16  ;;  %v736_v42 = vld [vmem:[%s6218_s5 + $0x8] sm:$0xff] }
  0x9a   : > { %1448 = vmatpush.msra.mxu2 %v1049_v37  ;;  %v759_v43 = vmul.f32 %v4256_v49, %v736_v42 }
  0x9b   : > { %1713 = vmatpush.msrb.mxu1 %v1054_v45 }
  0x9c   : > { %1553 = vmatpush.msrb.mxu2 %v1069_v54  ;;  %v765_v41 = vadd.f32 %v762_v34, %v759_v43  ;;  %v791_v43 = vperm.slane %v4260_v56, 6  ;;  %v851_v34 = vperm.slane %v4268_v59, 6 }
  0x9e   : > { %1554 = vmatpush.msrb.mxu2 %v1051_v22  ;;  %v768_v50 = vadd.f32 1.0, %v765_v41  ;;  %v926_v41 = vperm.slane %v4265_v58, 6  ;;  %vm827_vm6 = vcmp.eq.s32.totalorder %v4120_v13, %v791_v43 }
  0xa0   : > { %v771_v52 = vmul.f32 23.5, %v768_v50  ;;  %vm962_vm7 = vcmp.eq.s32.totalorder %v4120_v13, %v926_v41 }
  0xa2   : > { %v774_v53 = vfloor.f32 %v771_v52 }
  0xa4   : > { %v3978_v60 = vcvt.f32.s32 %v774_v53 }
  0xbd   : > { %v615_v61 = vpop.f32.mrf.mxu0  ;;  %v668_v62 = vpop.f32.mrf.mxu1 }
  0xbe   : > { %v669_v63 = vadd.f32 %v668_v62, %v615_v61  ;;  %v4413_v62 = vadd.s32 4294967272, %v3978_v60 }
  0xc0   : > { %v704_v0 = vmax.f32 %v669_v63, 0.0  ;;  %v4415_v63 = vsub.f32 %v771_v52, %v774_v53  ;;  %v792_v53 = vperm.slane %v4260_v56, 7 }
  0xc2   : > { %v4327_v2 = vmin.f32 %v704_v0, 1.0  ;;  %v985_v17 = vperm.slane %v4415_v63, 0 }
  0xc4   : > { %729 = vst.msk [vmem:[%s344_s14] sm:$0xff] %vm728_vm13, %v4327_v2  ;;  %3733 = vmatmul.msk.f32.vlgmr.msra.gmra.mxu2 %vm728_vm13, %v4327_v2  ;;  %3745 = vmatmul.msk.f32.vlgmr.msra.gmra.mxu3 %vm728_vm13, %v4327_v2 }
  0xc5   : > { %3781 = vmatmul.msk.f32.vlgmr.msrb.gmra.mxu0 %vm728_vm13, %v4327_v2  ;;  %3793 = vmatmul.msk.f32.vlgmr.msrb.gmra.mxu1 %vm728_vm13, %v4327_v2  ;;  %v618_v3 = vpop.f32.mrf.mxu0  ;;  %v671_v4 = vpop.f32.mrf.mxu1 }
  0xc6   : > { %v672_v5 = vadd.f32 %v671_v4, %v618_v3  ;;  %v4420_v3 = vadd.s32 1, %v4413_v62  ;;  %v4423_v4 = vsub.f32 1.0, %v4415_v63 }
  0xc8   : > { %v705_v6 = vmax.f32 %v672_v5, 0.0  ;;  %v793_v5 = vperm.slane %v4413_v62, 0  ;;  %v853_v16 = vperm.slane %v4423_v4, 0  ;;  %v854_v25 = vperm.slane %v4423_v4, 1 }
  0xca   : > { %v4339_v7 = vmin.f32 %v705_v6, 1.0  ;;  %v928_v6 = vperm.slane %v4420_v3, 0  ;;  %vm829_vm8 = vcmp.eq.s32.totalorder %v4120_v13, %v793_v5  ;;  %vm811_vm11 = vcmp.eq.s32.totalorder %v4101_v1, %v793_v5 }
  0xcb   : > { %v907_v22 = vsel %vm829_vm8, %v853_v16, 0.0  ;;  %vm828_vm8 = vcmp.eq.s32.totalorder %v4120_v13, %v792_v53 }
  0xcc   : > { %6308 = vst [vmem:[#allocation7_spill] sm:$0xff] %v4339_v7  ;;  %3734 = vmatmul.msk.f32.gmra.mxu2 %vm728_vm13, %v4339_v7  ;;  %3746 = vmatmul.msk.f32.gmra.mxu3 %vm728_vm13, %v4339_v7  ;;  %vm964_vm0 = vcmp.eq.s32.totalorder %v4120_v13, %v928_v6  ;;  %vm946_vm12 = vcmp.eq.s32.totalorder %v4101_v1, %v928_v6 }
  0xcd   : > { %730 = vst.msk [vmem:[%s344_s14 + $0x8] sm:$0xff] %vm728_vm13, %v4339_v7  ;;  %3782 = vmatmul.msk.f32.gmra.mxu0 %vm728_vm13, %v4339_v7  ;;  %3794 = vmatmul.msk.f32.gmra.mxu1 %vm728_vm13, %v4339_v7  ;;  %v621_v8 = vpop.f32.mrf.mxu0  ;;  %v674_v9 = vpop.f32.mrf.mxu1  ;;  %v1039_v23 = vsel %vm964_vm0, %v985_v17, 0.0 }
  0xce   : > { %v675_v10 = vadd.f32 %v674_v9, %v621_v8  ;;  %v794_v8 = vperm.slane %v4413_v62, 1  ;;  %v929_v9 = vperm.slane %v4420_v3, 1 }
  0xd0   : > { %v706_v11 = vmax.f32 %v675_v10, 0.0  ;;  %vm830_vm9 = vcmp.eq.s32.totalorder %v4120_v13, %v794_v8  ;;  %vm965_vm10 = vcmp.eq.s32.totalorder %v4120_v13, %v929_v9  ;;  %vm812_vm14 = vcmp.eq.s32.totalorder %v4101_v1, %v794_v8 }
  0xd1   : > { %vm947_vm5 = vcmp.eq.s32.totalorder %v4101_v1, %v929_v9  ;;  %v984_v8 = vperm.slane %v4262_v57, 7 }
  0xd2   : > { %v4351_v12 = vmin.f32 %v706_v11, 1.0 }
  0xd4   : > { %6309 = vst [vmem:[#allocation8_spill] sm:$0xff] %v4351_v12  ;;  %3735 = vmatmul.msk.f32.gmra.mxu2 %vm728_vm13, %v4351_v12  ;;  %3747 = vmatmul.msk.f32.gmra.mxu3 %vm728_vm13, %v4351_v12 }
  0xd5   : > { %3783 = vmatmul.msk.f32.gmra.mxu0 %vm728_vm13, %v4351_v12  ;;  %3795 = vmatmul.msk.f32.gmra.mxu1 %vm728_vm13, %v4351_v12  ;;  %v624_v14 = vpop.f32.mrf.mxu0  ;;  %v677_v15 = vpop.f32.mrf.mxu1 }
  0xd6   : > { %v678_v20 = vadd.f32 %v677_v15, %v624_v14  ;;  %v4438_v14 = vmul.f32 %v4254_v48, %v736_v42  ;;  %v4441_v15 = vmul.f32 %v4256_v49, %v739_v24  ;;  %v890_v24 = vsel %vm812_vm14, %v854_v25, 0.0 }
  0xd7   : > { %vm809_vm14 = vcmp.eq.s32.totalorder %v4101_v1, %v791_v43 }
  0xd8   : > { %v707_v27 = vmax.f32 %v678_v20, 0.0  ;;  %v750_v20 = vsub.f32 %v4438_v14, %v4441_v15 }
  0xda   : > { %v4365_v30 = vmin.f32 %v707_v27, 1.0 }
  0xdc   : > { %6310 = vst [vmem:[#allocation9_spill] sm:$0xff] %v4365_v30  ;;  %3736 = vmatmul.msk.f32.gmra.mxu2 %vm728_vm13, %v4365_v30  ;;  %3748 = vmatmul.msk.f32.gmra.mxu3 %vm728_vm13, %v4365_v30 }
  0xdd   : > { %3784 = vmatmul.msk.f32.gmra.mxu0 %vm728_vm13, %v4365_v30  ;;  %3796 = vmatmul.msk.f32.gmra.mxu1 %vm728_vm13, %v4365_v30  ;;  %v627_v31 = vpop.f32.mrf.mxu0  ;;  %v680_v32 = vpop.f32.mrf.mxu1 }
  0xde   : > { %v681_v35 = vadd.f32 %v680_v32, %v627_v31  ;;  %v1075_v31 = vadd.f32 %v1039_v23, %v907_v22  ;;  %v986_v32 = vperm.slane %v4415_v63, 1 }
  0xe0   : > { %v708_v21 = vmax.f32 %v681_v35, 0.0  ;;  %v908_v35 = vsel %vm830_vm9, %v854_v25, 0.0  ;;  %1871 = vmatpush.msra.mxu0 %v1075_v31 }
  0xe2   : > { %v4375_v36 = vmin.f32 %v708_v21, 1.0 }
  0xe4   : > { %6311 = vst [vmem:[#allocation10_spill] sm:$0xff] %v4375_v36  ;;  %3737 = vmatmul.msk.f32.gmra.mxu2 %vm728_vm13, %v4375_v36  ;;  %3749 = vmatmul.msk.f32.gmra.mxu3 %vm728_vm13, %v4375_v36 }
  0xe5   : > { %3785 = vmatmul.msk.f32.gmra.mxu0 %vm728_vm13, %v4375_v36  ;;  %3797 = vmatmul.msk.f32.gmra.mxu1 %vm728_vm13, %v4375_v36  ;;  %v630_v37 = vpop.f32.mrf.mxu0  ;;  %v683_v38 = vpop.f32.mrf.mxu1 }
  0xe6   : > { %v684_v26 = vadd.f32 %v683_v38, %v630_v37  ;;  %v1040_v37 = vsel %vm965_vm10, %v986_v32, 0.0  ;;  %v889_v38 = vsel %vm811_vm11, %v853_v16, 0.0 }
  0xe8   : > { %v709_v39 = vmax.f32 %v684_v26, 0.0  ;;  %v1021_v26 = vsel %vm946_vm12, %v985_v17, 0.0 }
  0xe9   : > { %v1057_v42 = vadd.f32 %v1021_v26, %v889_v38 }
  0xea   : > { %v4385_v40 = vmin.f32 %v709_v39, 1.0  ;;  %v1076_v39 = vadd.f32 %v1040_v37, %v908_v35  ;;  %v752_v37 = vadd.f32 1.0, %v749_v33 }
  0xeb   : > { %1872 = vmatpush.msra.mxu0 %v1057_v42 }
  0xec   : > { %6312 = vst [vmem:[#allocation11_spill] sm:$0xff] %v4385_v40  ;;  %3738 = vmatmul.msk.f32.gmra.mxu2 %vm728_vm13, %v4385_v40  ;;  %3750 = vmatmul.msk.f32.gmra.mxu3 %vm728_vm13, %v4385_v40  ;;  %v755_v38 = vmul.f32 23.5, %v752_v37 }
  0xed   : > { %3786 = vmatmul.msk.f32.gmra.mxu0 %vm728_vm13, %v4385_v40  ;;  %3798 = vmatmul.msk.f32.gmra.mxu1 %vm728_vm13, %v4385_v40  ;;  %v633_v44 = vpop.f32.mrf.mxu0  ;;  %v686_v45 = vpop.f32.mrf.mxu1 }
  0xee   : > { %v687_v46 = vadd.f32 %v686_v45, %v633_v44  ;;  %1924 = vmatpush.msra.mxu1 %v1076_v39  ;;  %v1085_v26 = vfloor.f32 %v755_v38 }
  0xf0   : > { %v710_v47 = vmax.f32 %v687_v46, 0.0  ;;  %v1022_v46 = vsel %vm947_vm5, %v986_v32, 0.0  ;;  %v3982_v28 = vcvt.f32.s32 %v1085_v26  ;;  %v4546_v33 = vsub.f32 %v755_v38, %v1085_v26 }
  0xf1   : > { %v1058_v52 = vadd.f32 %v1022_v46, %v890_v24  ;;  %vm944_vm5 = vcmp.eq.s32.totalorder %v4101_v1, %v926_v41 }
  0xf2   : > { %v4403_v51 = vmin.f32 %v710_v47, 1.0  ;;  %v983_v47 = vperm.slane %v4262_v57, 6  ;;  %v4540_v29 = vadd.s32 4294967280, %v3982_v28  ;;  %6318 = vst [vmem:[#allocation17_spill] sm:$0xff] %v4546_v33  ;;  %v4556_v42 = vsub.f32 1.0, %v4546_v33 }
  0xf3   : > { %1925 = vmatpush.msra.mxu1 %v1058_v52  ;;  %v1290_v26 = vperm.slane %v4546_v33, 1 }
  0xf4   : > { %6313 = vst [vmem:[#allocation12_spill] sm:$0xff] %v4403_v51  ;;  %3739 = vmatmul.msk.f32.gmra.mxu2 %vm728_vm13, %v4403_v51  ;;  %3751 = vmatmul.msk.f32.gmra.mxu3 %vm728_vm13, %v4403_v51  ;;  %v1037_v60 = vsel %vm962_vm7, %v983_v47, 0.0  ;;  %v4549_v39 = vadd.s32 1, %v4540_v29  ;;  %v1101_v24 = vperm.slane %v4540_v29, 4  ;;  %v1161_v46 = vperm.slane %v4556_v42, 4 }
  0xf5   : > { %3787 = vmatmul.msk.f32.gmra.mxu0 %vm728_vm13, %v4403_v51  ;;  %3799 = vmatmul.msk.f32.gmra.mxu1 %vm728_vm13, %v4403_v51  ;;  %v636_v54 = vpop.f32.mrf.mxu0  ;;  %v689_v19 = vpop.f32.mrf.mxu1  ;;  %6317 = vst [vmem:[#allocation16_spill] sm:$0xff] %v4540_v29  ;;  %v1162_v52 = vperm.slane %v4556_v42, 5  ;;  %v1098_v56 = vperm.slane %v4540_v29, 1  ;;  %v1158_v38 = vperm.slane %v4556_v42, 1 }
  0xf6   : > { %v690_v55 = vadd.f32 %v689_v19, %v636_v54  ;;  %v905_v54 = vsel %vm827_vm6, %v851_v34, 0.0  ;;  %v852_v19 = vperm.slane %v4268_v59, 7  ;;  %6319 = vst [vmem:[#allocation18_spill] sm:$0xff] %v4549_v39  ;;  %vm1119_vm9 = vcmp.eq.s32.totalorder %v4101_v1, %v1101_v24 }
  0xf7   : > { %v1073_v5 = vadd.f32 %v1037_v60, %v905_v54  ;;  %6320 = vst [vmem:[#allocation19_spill] sm:$0xff] %v4556_v42  ;;  %v1237_v54 = vperm.slane %v4549_v39, 5  ;;  %vm810_vm6 = vcmp.eq.s32.totalorder %v4101_v1, %v792_v53  ;;  %v1233_v53 = vperm.slane %v4549_v39, 1 }
  0xf8   : > { %v711_v61 = vmax.f32 %v690_v55, 0.0  ;;  %v906_v6 = vsel %vm828_vm8, %v852_v19, 0.0  ;;  %v888_v43 = vsel %vm810_vm6, %v852_v19, 0.0  ;;  %vm4611_vm8 = vcmp.eq.s32.totalorder %v4120_v13, %v1101_v24 }
  0xf9   : > { %1765 = vmatpush.msra.mxu2 %v1073_v5  ;;  %v1294_v5 = vperm.slane %v4546_v33, 5  ;;  %vm4582_vm12 = vcmp.eq.s32.totalorder %v4101_v1, %v1237_v54  ;;  %v1215_v28 = vsel %vm4611_vm8, %v1161_v46, 0.0  ;;  %vm1134_vm8 = vcmp.eq.s32.totalorder %v4120_v13, %v1098_v56 }
  0xfa   : > { %v4417_v0 = vmin.f32 %v711_v61, 1.0  ;;  %v927_v61 = vperm.slane %v4265_v58, 7 }
  0xfc   : > { %6314 = vst [vmem:[#allocation13_spill] sm:$0xff] %v4417_v0  ;;  %3740 = vmatmul.msk.f32.gmra.mxu2 %vm728_vm13, %v4417_v0  ;;  %3752 = vmatmul.msk.f32.gmra.mxu3 %vm728_vm13, %v4417_v0  ;;  %vm963_vm0 = vcmp.eq.s32.totalorder %v4120_v13, %v927_v61  ;;  %vm945_vm7 = vcmp.eq.s32.totalorder %v4101_v1, %v927_v61 }
  0xfd   : > { %3788 = vmatmul.msk.f32.gmra.mxu0 %vm728_vm13, %v4417_v0  ;;  %3800 = vmatmul.msk.f32.gmra.mxu1 %vm728_vm13, %v4417_v0  ;;  %v639_v10 = vpop.f32.mrf.mxu0  ;;  %v692_v11 = vpop.f32.mrf.mxu1  ;;  %v1020_v41 = vsel %vm945_vm7, %v984_v8, 0.0 }
  0xfe   : > { %v693_v18 = vadd.f32 %v692_v11, %v639_v10  ;;  %v1038_v10 = vsel %vm963_vm0, %v984_v8, 0.0  ;;  %v1056_v58 = vadd.f32 %v1020_v41, %v888_v43  ;;  %v1330_v8 = vsel %vm4582_vm12, %v1294_v5, 0.0 }
  0xff   : > { %v1074_v11 = vadd.f32 %v1038_v10, %v906_v6  ;;  %vm1116_vm12 = vcmp.eq.s32.totalorder %v4101_v1, %v1098_v56 }
 0x100   : > { %v712_v27 = vmax.f32 %v693_v18, 0.0 }
 0x101   : > { %1818 = vmatpush.msra.mxu3 %v1074_v11  ;;  %v1097_v11 = vperm.slane %v4540_v29, 0 }
 0x102   : > { %v4455_v21 = vmin.f32 %v712_v27, 1.0 }
 0x103   : > { %1819 = vmatpush.msra.mxu3 %v1056_v58  ;;  %vm1133_vm6 = vcmp.eq.s32.totalorder %v4120_v13, %v1097_v11 }
 0x104   : > { %6315 = vst [vmem:[#allocation14_spill] sm:$0xff] %v4455_v21  ;;  %3741 = vmatmul.msk.f32.gmra.mxu2 %vm728_vm13, %v4455_v21  ;;  %3753 = vmatmul.msk.f32.gmra.mxu3 %vm728_vm13, %v4455_v21 }
 0x105   : > { %3789 = vmatmul.msk.f32.gmra.mxu0 %vm728_vm13, %v4455_v21  ;;  %3801 = vmatmul.msk.f32.gmra.mxu1 %vm728_vm13, %v4455_v21  ;;  %v642_v44 = vpop.f32.mrf.mxu0  ;;  %v695_v45 = vpop.f32.mrf.mxu1 }
 0x106   : > { %v696_v50 = vadd.f32 %v695_v45, %v642_v44  ;;  %v1236_v44 = vperm.slane %v4549_v39, 4  ;;  %v1102_v45 = vperm.slane %v4540_v29, 5 }
 0x108   : > { %v713_v55 = vmax.f32 %v696_v50, 0.0  ;;  %v1293_v50 = vperm.slane %v4546_v33, 4  ;;  %vm1254_vm10 = vcmp.eq.s32.totalorder %v4101_v1, %v1236_v44  ;;  %vm1120_vm11 = vcmp.eq.s32.totalorder %v4101_v1, %v1102_v45 }
 0x109   : > { %v1198_v6 = vsel %vm1120_vm11, %v1162_v52, 0.0  ;;  %vm4616_vm0 = vcmp.eq.s32.totalorder %v4120_v13, %v1236_v44  ;;  %vm4637_vm11 = vcmp.eq.s32.totalorder %v4101_v1, %v1097_v11 }
 0x10a   : > { %v4490_v9 = vmin.f32 %v713_v55, 1.0  ;;  %v1197_v55 = vsel %vm1119_vm9, %v1161_v46, 0.0  ;;  %v1329_v60 = vsel %vm1254_vm10, %v1293_v50, 0.0  ;;  %vm4621_vm9 = vcmp.eq.s32.totalorder %v4120_v13, %v1102_v45 }
 0x10b   : > { %vm4626_vm10 = vcmp.eq.s32.totalorder %v4120_v13, %v1237_v54  ;;  %v1347_v24 = vsel %vm4616_vm0, %v1293_v50, 0.0  ;;  %v1216_v44 = vsel %vm4621_vm9, %v1162_v52, 0.0  ;;  %v4660_v54 = vadd.f32 %v1330_v8, %v1198_v6 }
 0x10c   : > { %3742 = vmatmul.msk.f32.gmra.mxu2 %vm728_vm13, %v4490_v9  ;;  %3754 = vmatmul.msk.f32.gmra.mxu3 %vm728_vm13, %v4490_v9  ;;  %v1348_v45 = vsel %vm4626_vm10, %v1294_v5, 0.0  ;;  %vm1269_vm0 = vcmp.eq.s32.totalorder %v4120_v13, %v1233_v53  ;;  %v1194_v6 = vsel %vm1116_vm12, %v1158_v38, 0.0 }
 0x10d   : > { %3790 = vmatmul.msk.f32.gmra.mxu0 %vm728_vm13, %v4490_v9  ;;  %3802 = vmatmul.msk.f32.gmra.mxu1 %vm728_vm13, %v4490_v9  ;;  %v645_v16 = vpop.f32.mrf.mxu0  ;;  %v698_v17 = vpop.f32.mrf.mxu1  ;;  %v4678_v5 = vadd.f32 %v1348_v45, %v1216_v44  ;;  %v753_v44 = vadd.f32 1.0, %v750_v20 }
 0x10e   : > { %v699_v18 = vadd.f32 %v698_v17, %v645_v16  ;;  %v1232_v16 = vperm.slane %v4549_v39, 0  ;;  %v887_v17 = vsel %vm809_vm14, %v851_v34, 0.0 }
 0x10f   : > { %v4715_v14 = vmul.f32 23.5, %v753_v44  ;;  %v857_v44 = vperm.slane %v4423_v4, 4 }
 0x110   : > { %v714_v22 = vmax.f32 %v699_v18, 0.0  ;;  %v1019_v18 = vsel %vm944_vm5, %v983_v47, 0.0  ;;  %v4630_v47 = vadd.f32 %v1329_v60, %v1197_v55  ;;  %vm4642_vm14 = vcmp.eq.s32.totalorder %v4101_v1, %v1232_v16 }
 0x111   : > { %vm1251_vm5 = vcmp.eq.s32.totalorder %v4101_v1, %v1233_v53  ;;  %vm1268_vm7 = vcmp.eq.s32.totalorder %v4120_v13, %v1232_v16  ;;  %v4676_v60 = vadd.f32 %v1347_v24, %v1215_v28 }
 0x112   : > { %v4505_v23 = vmin.f32 %v714_v22, 1.0  ;;  %v1055_v22 = vadd.f32 %v1019_v18, %v887_v17  ;;  %v1326_v10 = vsel %vm1251_vm5, %v1290_v26, 0.0  ;;  %v1212_v17 = vsel %vm1134_vm8, %v1158_v38, 0.0 }
 0x113   : > { %v1344_v18 = vsel %vm1269_vm0, %v1290_v26, 0.0  ;;  %v4686_v34 = vadd.f32 %v1326_v10, %v1194_v6 }
 0x114   : > { %3743 = vmatmul.msk.f32.gmra.mxu2 %vm728_vm13, %v4505_v23  ;;  %3755 = vmatmul.msk.f32.gmra.mxu3 %vm728_vm13, %v4505_v23  ;;  %v4694_v59 = vadd.f32 %v1344_v18, %v1212_v17 }
 0x115   : > { %3791 = vmatmul.msk.f32.gmra.mxu0 %vm728_vm13, %v4505_v23  ;;  %3803 = vmatmul.msk.f32.gmra.mxu1 %vm728_vm13, %v4505_v23  ;;  %v648_v25 = vpop.f32.mrf.mxu0  ;;  %v701_v27 = vpop.f32.mrf.mxu1 }
 0x116   : > { %v702_v31 = vadd.f32 %v701_v27, %v648_v25  ;;  %v1157_v27 = vperm.slane %v4556_v42, 0  ;;  %1766 = vmatpush.msra.mxu2 %v1055_v22 }
 0x118   : > { %v715_v32 = vmax.f32 %v702_v31, 0.0  ;;  %v1289_v31 = vperm.slane %v4546_v33, 0  ;;  %v1193_v46 = vsel %vm4637_vm11, %v1157_v27, 0.0  ;;  %v1211_v11 = vsel %vm1133_vm6, %v1157_v27, 0.0 }
 0x11a   : > { %v4515_v35 = vmin.f32 %v715_v32, 1.0  ;;  %v1325_v50 = vsel %vm4642_vm14, %v1289_v31, 0.0  ;;  %v1343_v16 = vsel %vm1268_vm7, %v1289_v31, 0.0 }
 0x11b   : > { %v4680_v43 = vadd.f32 %v1325_v50, %v1193_v46  ;;  %v4692_v57 = vadd.f32 %v1343_v16, %v1211_v11 }
 0x11c   : > { %6316 = vst [vmem:[#allocation15_spill] sm:$0xff] %v4515_v35  ;;  %3744 = vmatmul.msk.f32.gmra.mxu2 %vm728_vm13, %v4515_v35  ;;  %3756 = vmatmul.msk.f32.gmra.mxu3 %vm728_vm13, %v4515_v35 }
 0x11d   : > { %3792 = vmatmul.msk.f32.gmra.mxu0 %vm728_vm13, %v4515_v35  ;;  %3804 = vmatmul.msk.f32.gmra.mxu1 %vm728_vm13, %v4515_v35 }
 0x124   : > { %3757 = vmatmul.msk.f32.vlgmr.msrb.gmra.mxu2 %vm728_vm13, %v4327_v2  ;;  %3769 = vmatmul.msk.f32.vlgmr.msrb.gmra.mxu3 %vm728_vm13, %v4327_v2 }
 0x125   : > { %3829 = vmatmul.msk.f32.vlgmr.msra.gmra.mxu0 %vm728_vm13, %v4327_v2  ;;  %3841 = vmatmul.msk.f32.vlgmr.msra.gmra.mxu1 %vm728_vm13, %v4327_v2 }
 0x12c   : > { %3758 = vmatmul.msk.f32.gmra.mxu2 %vm728_vm13, %v4339_v7  ;;  %3770 = vmatmul.msk.f32.gmra.mxu3 %vm728_vm13, %v4339_v7 }
 0x12d   : > { %3830 = vmatmul.msk.f32.gmra.mxu0 %vm728_vm13, %v4339_v7  ;;  %3842 = vmatmul.msk.f32.gmra.mxu1 %vm728_vm13, %v4339_v7 }
 0x134   : > { %3759 = vmatmul.msk.f32.gmra.mxu2 %vm728_vm13, %v4351_v12  ;;  %3771 = vmatmul.msk.f32.gmra.mxu3 %vm728_vm13, %v4351_v12 }
 0x135   : > { %3831 = vmatmul.msk.f32.gmra.mxu0 %vm728_vm13, %v4351_v12  ;;  %3843 = vmatmul.msk.f32.gmra.mxu1 %vm728_vm13, %v4351_v12 }
 0x13c   : > { %3760 = vmatmul.msk.f32.gmra.mxu2 %vm728_vm13, %v4365_v30  ;;  %3772 = vmatmul.msk.f32.gmra.mxu3 %vm728_vm13, %v4365_v30 }
 0x13d   : > { %3832 = vmatmul.msk.f32.gmra.mxu0 %vm728_vm13, %v4365_v30  ;;  %3844 = vmatmul.msk.f32.gmra.mxu1 %vm728_vm13, %v4365_v30 }
 0x142   : > { %v1662_v19 = vpop.f32.mrf.mxu0  ;;  %v1715_v25 = vpop.f32.mrf.mxu1 }
 0x143   : > { %v2391_v53 = vmul.f32 %v1662_v19, %v4630_v47  ;;  %v2392_v22 = vmul.f32 %v1715_v25, %v4660_v54 }
 0x144   : > { %3761 = vmatmul.msk.f32.gmra.mxu2 %vm728_vm13, %v4375_v36  ;;  %3773 = vmatmul.msk.f32.gmra.mxu3 %vm728_vm13, %v4375_v36 }
 0x145   : > { %3833 = vmatmul.msk.f32.gmra.mxu0 %vm728_vm13, %v4375_v36  ;;  %3845 = vmatmul.msk.f32.gmra.mxu1 %vm728_vm13, %v4375_v36 }
 0x147   : > { %v1450_v52 = vpop.f32.mrf.mxu2  ;;  %v1503_v55 = vpop.f32.mrf.mxu3 }
 0x148   : > { %v2387_v37 = vmul.f32 %v1450_v52, %v4680_v43  ;;  %v2388_v38 = vmul.f32 %v1503_v55, %v4686_v34 }
 0x14a   : > { %v1665_v41 = vpop.f32.mrf.mxu0  ;;  %v1718_v56 = vpop.f32.mrf.mxu1 }
 0x14b   : > { %v2409_v58 = vmul.f32 %v1665_v41, %v4676_v60  ;;  %v2410_v61 = vmul.f32 %v1718_v56, %v4678_v5 }
 0x14c   : > { %3762 = vmatmul.msk.f32.gmra.mxu2 %vm728_vm13, %v4385_v40  ;;  %3774 = vmatmul.msk.f32.gmra.mxu3 %vm728_vm13, %v4385_v40 }
 0x14d   : > { %v2631_v8 = vadd.f32 %v2409_v58, %v2391_v53  ;;  %v2638_v19 = vadd.f32 %v2410_v61, %v2392_v22  ;;  %3834 = vmatmul.msk.f32.gmra.mxu0 %vm728_vm13, %v4385_v40  ;;  %3846 = vmatmul.msk.f32.gmra.mxu1 %vm728_vm13, %v4385_v40 }
 0x14f   : > { %v2632_v25 = vrot.slane %v2631_v8, 4  ;;  %v2639_v27 = vrot.slane %v2638_v19, 4  ;;  %v1453_v31 = vpop.f32.mrf.mxu2  ;;  %v1506_v32 = vpop.f32.mrf.mxu3 }
 0x150   : > { %v2405_v26 = vmul.f32 %v1453_v31, %v4692_v57  ;;  %v2406_v28 = vmul.f32 %v1506_v32, %v4694_v59 }
 0x151   : > { %v2633_v24 = vadd.f32 %v2632_v25, %v2631_v8  ;;  %v2640_v11 = vadd.f32 %v2639_v27, %v2638_v19 }
 0x152   : > { %v2603_v45 = vadd.f32 %v2405_v26, %v2387_v37  ;;  %v2610_v46 = vadd.f32 %v2406_v28, %v2388_v38  ;;  %v1668_v50 = vpop.f32.mrf.mxu0  ;;  %v1721_v6 = vpop.f32.mrf.mxu1  ;;  %v797_v38 = vperm.slane %v4413_v62, 4  ;;  %v932_v26 = vperm.slane %v4420_v3, 4 }
 0x153   : > { %v2634_v10 = vrot.slane %v2633_v24, 2  ;;  %v2641_v52 = vrot.slane %v2640_v11, 2  ;;  %v2427_v22 = vmul.f32 %v1668_v50, %v4630_v47  ;;  %v2428_v58 = vmul.f32 %v1721_v6, %v4660_v54 }
 0x154   : > { %v2604_v16 = vrot.slane %v2603_v45, 4  ;;  %v2611_v17 = vrot.slane %v2610_v46, 4  ;;  %3763 = vmatmul.msk.f32.gmra.mxu2 %vm728_vm13, %v4403_v51  ;;  %3775 = vmatmul.msk.f32.gmra.mxu3 %vm728_vm13, %v4403_v51  ;;  %vm833_vm9 = vcmp.eq.s32.totalorder %v4120_v13, %v797_v38  ;;  %vm968_vm10 = vcmp.eq.s32.totalorder %v4120_v13, %v932_v26 }
 0x155   : > { %3835 = vmatmul.msk.f32.gmra.mxu0 %vm728_vm13, %v4403_v51  ;;  %3847 = vmatmul.msk.f32.gmra.mxu1 %vm728_vm13, %v4403_v51  ;;  %v4717_v20 = vadd.f32 %v2634_v10, %v2633_v24  ;;  %v2642_v25 = vadd.f32 %v2641_v52, %v2640_v11  ;;  %vm815_vm12 = vcmp.eq.s32.totalorder %v4101_v1, %v797_v38 }
 0x156   : > { %v2605_v15 = vadd.f32 %v2604_v16, %v2603_v45  ;;  %v2612_v41 = vadd.f32 %v2611_v17, %v2610_v46  ;;  %v989_v45 = vperm.slane %v4415_v63, 4  ;;  %v911_v17 = vsel %vm833_vm9, %v857_v44, 0.0 }
 0x157   : > { %v1456_v55 = vpop.f32.mrf.mxu2  ;;  %v1509_v18 = vpop.f32.mrf.mxu3  ;;  %v2636_v19 = vrot.slane %v4717_v20, 1  ;;  %v893_v40 = vsel %vm815_vm12, %v857_v44, 0.0  ;;  %vm950_vm5 = vcmp.eq.s32.totalorder %v4101_v1, %v932_v26 }
 0x158   : > { %v2606_v53 = vrot.slane %v2605_v15, 2  ;;  %v2613_v32 = vrot.slane %v2612_v41, 2  ;;  %v2423_v37 = vmul.f32 %v1456_v55, %v4680_v43  ;;  %v2424_v50 = vmul.f32 %v1509_v18, %v4686_v34 }
 0x159   : > { %v1043_v52 = vsel %vm968_vm10, %v989_v45, 0.0  ;;  %v858_v18 = vperm.slane %v4423_v4, 5 }
 0x15a   : > { %v1671_v61 = vpop.f32.mrf.mxu0  ;;  %v1724_v8 = vpop.f32.mrf.mxu1  ;;  %v2607_v46 = vadd.f32 %v2606_v53, %v2605_v15 }
 0x15b   : > { %v2445_v27 = vmul.f32 %v1671_v61, %v4676_v60  ;;  %v2446_v31 = vmul.f32 %v1724_v8, %v4678_v5  ;;  %v798_v61 = vperm.slane %v4413_v62, 5  ;;  %v933_v8 = vperm.slane %v4420_v3, 5 }
 0x15c   : > { %3764 = vmatmul.msk.f32.gmra.mxu2 %vm728_vm13, %v4417_v0  ;;  %3776 = vmatmul.msk.f32.gmra.mxu3 %vm728_vm13, %v4417_v0 }
 0x15d   : > { %v2757_v28 = vadd.f32 %v2445_v27, %v2427_v22  ;;  %v2764_v24 = vadd.f32 %v2446_v31, %v2428_v58  ;;  %3836 = vmatmul.msk.f32.gmra.mxu0 %vm728_vm13, %v4417_v0  ;;  %3848 = vmatmul.msk.f32.gmra.mxu1 %vm728_vm13, %v4417_v0  ;;  %v1079_v58 = vadd.f32 %v1043_v52, %v911_v17 }
 0x15e   : > { %vm834_vm11 = vcmp.eq.s32.totalorder %v4120_v13, %v798_v61  ;;  %vm969_vm14 = vcmp.eq.s32.totalorder %v4120_v13, %v933_v8  ;;  %vm816_vm6 = vcmp.eq.s32.totalorder %v4101_v1, %v798_v61  ;;  %vm951_vm7 = vcmp.eq.s32.totalorder %v4101_v1, %v933_v8 }
 0x15f   : > { %v2758_v6 = vrot.slane %v2757_v28, 4  ;;  %v2765_v10 = vrot.slane %v2764_v24, 4  ;;  %v1459_v11 = vpop.f32.mrf.mxu2  ;;  %v1512_v16 = vpop.f32.mrf.mxu3  ;;  %2083 = vmatpush.msrb.mxu0 %v1079_v58 }
 0x160   : > { %v2441_v55 = vmul.f32 %v1459_v11, %v4692_v57  ;;  %v2442_v22 = vmul.f32 %v1512_v16, %v4694_v59  ;;  %v990_v11 = vperm.slane %v4415_v63, 5  ;;  %v6335_v16 = vfloor.f32 %v4715_v14 }
 0x161   : > { %v2759_v15 = vadd.f32 %v2758_v6, %v2757_v28  ;;  %v2766_v53 = vadd.f32 %v2765_v10, %v2764_v24  ;;  %v2643_v28 = vrot.slane %v2642_v25, 1  ;;  %v2608_v24 = vrot.slane %v2607_v46, 1 }
 0x162   : > { %v2729_v27 = vadd.f32 %v2441_v55, %v2423_v37  ;;  %v2736_v31 = vadd.f32 %v2442_v22, %v2424_v50  ;;  %v1674_v56 = vpop.f32.mrf.mxu0  ;;  %v1727_v0 = vpop.f32.mrf.mxu1  ;;  %v4751_v17 = vsub.f32 %v4715_v14, %v6335_v16  ;;  %v2614_v6 = vadd.f32 %v2613_v32, %v2612_v41 }
 0x163   : > { %v912_v37 = vsel %vm834_vm11, %v858_v18, 0.0  ;;  %v2760_v50 = vrot.slane %v2759_v15, 2  ;;  %v2767_v55 = vrot.slane %v2766_v53, 2  ;;  %v1044_v41 = vsel %vm969_vm14, %v990_v11, 0.0 }
 0x164   : > { %v2730_v10 = vrot.slane %v2729_v27, 4  ;;  %v2737_v52 = vrot.slane %v2736_v31, 4  ;;  %3765 = vmatmul.msk.f32.gmra.mxu2 %vm728_vm13, %v4455_v21  ;;  %3777 = vmatmul.msk.f32.gmra.mxu3 %vm728_vm13, %v4455_v21  ;;  %v4764_v32 = vadd.f32 %v2636_v19, %v4717_v20  ;;  %v1080_v16 = vadd.f32 %v1044_v41, %v912_v37 }
 0x165   : > { %3837 = vmatmul.msk.f32.gmra.mxu0 %vm728_vm13, %v4455_v21  ;;  %3849 = vmatmul.msk.f32.gmra.mxu1 %vm728_vm13, %v4455_v21  ;;  %v4766_v51 = vadd.f32 %v2643_v28, %v2642_v25  ;;  %v2609_v36 = vadd.f32 %v2608_v24, %v2607_v46  ;;  %v2615_v21 = vrot.slane %v2614_v6, 1  ;;  %v2761_v38 = vadd.f32 %v2760_v50, %v2759_v15 }
 0x166   : > { %v2731_v22 = vadd.f32 %v2730_v10, %v2729_v27  ;;  %v2738_v58 = vadd.f32 %v2737_v52, %v2736_v31  ;;  %2136 = vmatpush.msrb.mxu1 %v1080_v16  ;;  %v2768_v20 = vadd.f32 %v2767_v55, %v2766_v53  ;;  %v1025_v19 = vsel %vm950_vm5, %v989_v45, 0.0 }
 0x167   : > { %v1462_v48 = vpop.f32.mrf.mxu2  ;;  %v1515_v49 = vpop.f32.mrf.mxu3  ;;  %v894_v27 = vsel %vm816_vm6, %v858_v18, 0.0  ;;  %v1061_v52 = vadd.f32 %v1025_v19, %v893_v40  ;;  %v2463_v26 = vmul.f32 %v1674_v56, %v4630_v47  ;;  %v2464_v44 = vmul.f32 %v1727_v0, %v4660_v54 }
 0x168   : > { %v2732_v30 = vrot.slane %v2731_v22, 2  ;;  %v2739_v12 = vrot.slane %v2738_v58, 2  ;;  %v2616_v24 = vadd.f32 %v2615_v21, %v2614_v6  ;;  %v2762_v56 = vrot.slane %v2761_v38, 1 }
 0x169   : > { %v2769_v21 = vrot.slane %v2768_v20, 1  ;;  %2084 = vmatpush.msrb.mxu0 %v1061_v52  ;;  %v2459_v8 = vmul.f32 %v1462_v48, %v4680_v43  ;;  %v2460_v6 = vmul.f32 %v1515_v49, %v4686_v34  ;;  %v6247_v48 = vperm.slane %v4413_v62, 2 }
 0x16a   : > { %v2733_v31 = vadd.f32 %v2732_v30, %v2731_v22  ;;  %v2740_v10 = vadd.f32 %v2739_v12, %v2738_v58  ;;  %v1677_v25 = vpop.f32.mrf.mxu0  ;;  %v1730_v28 = vpop.f32.mrf.mxu1  ;;  %v1026_v12 = vsel %vm951_vm7, %v990_v11, 0.0  ;;  %v6246_v49 = vperm.slane %v4423_v4, 2 }
 0x16b   : > { %v2481_v46 = vmul.f32 %v1677_v25, %v4676_v60  ;;  %v2482_v61 = vmul.f32 %v1730_v28, %v4678_v5  ;;  %v1062_v0 = vadd.f32 %v1026_v12, %v894_v27  ;;  %v6244_v52 = vperm.slane %v4415_v63, 2 }
 0x16c   : > { %v2734_v15 = vrot.slane %v2733_v31, 1  ;;  %v2741_v53 = vrot.slane %v2740_v10, 1  ;;  %3766 = vmatmul.msk.f32.gmra.mxu2 %vm728_vm13, %v4490_v9  ;;  %3778 = vmatmul.msk.f32.gmra.mxu3 %vm728_vm13, %v4490_v9  ;;  %vm831_vm8 = vcmp.eq.s32.totalorder %v4120_v13, %v6247_v48 }
 0x16d   : > { %v2883_v30 = vadd.f32 %v2481_v46, %v2463_v26  ;;  %v2890_v40 = vadd.f32 %v2482_v61, %v2464_v44  ;;  %3838 = vmatmul.msk.f32.gmra.mxu0 %vm728_vm13, %v4490_v9  ;;  %3850 = vmatmul.msk.f32.gmra.mxu1 %vm728_vm13, %v4490_v9  ;;  %v2763_v26 = vadd.f32 %v2762_v56, %v2761_v38  ;;  %v6243_v56 = vperm.slane %v4413_v62, 3 }
 0x16e   : > { %v2735_v45 = vadd.f32 %v2734_v15, %v2733_v31  ;;  %v2742_v18 = vadd.f32 %v2741_v53, %v2740_v10  ;;  %2137 = vmatpush.msrb.mxu1 %v1062_v0  ;;  %v2770_v44 = vadd.f32 %v2769_v21, %v2768_v20  ;;  %v909_v53 = vsel %vm831_vm8, %v6246_v49, 0.0 }
 0x16f   : > { %v2884_v37 = vrot.slane %v2883_v30, 4  ;;  %v2891_v11 = vrot.slane %v2890_v40, 4  ;;  %v1465_v50 = vpop.f32.mrf.mxu2  ;;  %v1518_v55 = vpop.f32.mrf.mxu3  ;;  %vm832_vm9 = vcmp.eq.s32.totalorder %v4120_v13, %v6243_v56 }
 0x170   : > { %v4786_v41 = vsel %vm535_vm15, %v2735_v45, %v2609_v36  ;;  %v4789_v22 = vsel %vm535_vm15, %v2742_v18, %v2616_v24  ;;  %v2477_v58 = vmul.f32 %v1465_v50, %v4692_v57  ;;  %v2478_v16 = vmul.f32 %v1518_v55, %v4694_v59 }
 0x171   : > { %v2885_v19 = vadd.f32 %v2884_v37, %v2883_v30  ;;  %v2892_v27 = vadd.f32 %v2891_v11, %v2890_v40  ;;  %v6245_v36 = vperm.slane %v4420_v3, 2  ;;  %v6241_v37 = vperm.slane %v4420_v3, 3 }
 0x172   : > { %v2855_v31 = vadd.f32 %v2477_v58, %v2459_v8  ;;  %v2862_v10 = vadd.f32 %v2478_v16, %v2460_v6  ;;  %v1680_v25 = vpop.f32.mrf.mxu0  ;;  %v1733_v28 = vpop.f32.mrf.mxu1  ;;  %v6242_v6 = vperm.slane %v4423_v4, 3  ;;  %v3487_v11 = vsel %vm535_vm15, %v2763_v26, %v4764_v32 }
 0x173   : > { %v2886_v46 = vrot.slane %v2885_v19, 2  ;;  %v2893_v61 = vrot.slane %v2892_v27, 2  ;;  %vm966_vm0 = vcmp.eq.s32.totalorder %v4120_v13, %v6245_v36  ;;  %v3492_v50 = vsel %vm535_vm15, %v2770_v44, %v4766_v51 }
 0x174   : > { %v2856_v24 = vrot.slane %v2855_v31, 4  ;;  %v2863_v15 = vrot.slane %v2862_v10, 4  ;;  %3767 = vmatmul.msk.f32.gmra.mxu2 %vm728_vm13, %v4505_v23  ;;  %3779 = vmatmul.msk.f32.gmra.mxu3 %vm728_vm13, %v4505_v23  ;;  %v1041_v12 = vsel %vm966_vm0, %v6244_v52, 0.0  ;;  %v2499_v16 = vmul.f32 %v1680_v25, %v4630_v47 }
 0x175   : > { %v2887_v38 = vadd.f32 %v2886_v46, %v2885_v19  ;;  %v2894_v20 = vadd.f32 %v2893_v61, %v2892_v27  ;;  %3839 = vmatmul.msk.f32.gmra.mxu0 %vm728_vm13, %v4505_v23  ;;  %3851 = vmatmul.msk.f32.gmra.mxu1 %vm728_vm13, %v4505_v23  ;;  %v1077_v0 = vadd.f32 %v1041_v12, %v909_v53  ;;  %v910_v51 = vsel %vm832_vm9, %v6242_v6, 0.0 }
 0x176   : > { %v2857_v30 = vadd.f32 %v2856_v24, %v2855_v31  ;;  %v2864_v40 = vadd.f32 %v2863_v15, %v2862_v10  ;;  %v2500_v19 = vmul.f32 %v1733_v28, %v4660_v54  ;;  %vm967_vm10 = vcmp.eq.s32.totalorder %v4120_v13, %v6241_v37 }
 0x177   : > { %v2888_v21 = vrot.slane %v2887_v38, 1  ;;  %v2895_v45 = vrot.slane %v2894_v20, 1  ;;  %v1468_v18 = vpop.f32.mrf.mxu2  ;;  %v1521_v8 = vpop.f32.mrf.mxu3  ;;  %1977 = vmatpush.msrb.mxu2 %v1077_v0  ;;  %v6240_v26 = vperm.slane %v4415_v63, 3  ;;  %v6336_v53 = vfloor.f32 %v4715_v14 }
 0x178   : > { %v2858_v55 = vrot.slane %v2857_v30, 2  ;;  %v2865_v58 = vrot.slane %v2864_v40, 2  ;;  %v1298_v52 = vperm.slane %v4751_v17, 1 }
 0x179   : > { %v2889_v25 = vadd.f32 %v2888_v21, %v2887_v38  ;;  %v2896_v44 = vadd.f32 %v2895_v45, %v2894_v20  ;;  %v1042_v15 = vsel %vm967_vm10, %v6240_v26, 0.0  ;;  %v3984_v12 = vcvt.f32.s32 %v6336_v53 }
 0x17a   : > { %v2859_v27 = vadd.f32 %v2858_v55, %v2857_v30  ;;  %v2866_v32 = vadd.f32 %v2865_v58, %v2864_v40  ;;  %v1683_v31 = vpop.f32.mrf.mxu0  ;;  %v1736_v10 = vpop.f32.mrf.mxu1  ;;  %v1078_v30 = vadd.f32 %v1042_v15, %v910_v51  ;;  %v4848_v40 = vsub.f32 1.0, %v4751_v17 }
 0x17b   : > { %v2517_v28 = vmul.f32 %v1683_v31, %v4676_v60  ;;  %v2518_v46 = vmul.f32 %v1736_v10, %v4678_v5  ;;  %v2495_v21 = vmul.f32 %v1468_v18, %v4680_v43  ;;  %v2496_v45 = vmul.f32 %v1521_v8, %v4686_v34 }
 0x17c   : > { %v2860_v61 = vrot.slane %v2859_v27, 1  ;;  %v2867_v24 = vrot.slane %v2866_v32, 1  ;;  %3768 = vmatmul.msk.f32.gmra.mxu2 %vm728_vm13, %v4515_v35  ;;  %3780 = vmatmul.msk.f32.gmra.mxu3 %vm728_vm13, %v4515_v35  ;;  %v4852_v55 = vadd.s32 4294967280, %v3984_v12  ;;  %v4855_v14 = vsel %vm538_vm1, %v2889_v25, %v3487_v11 }
 0x17d   : > { %v3009_v38 = vadd.f32 %v2517_v28, %v2499_v16  ;;  %v3016_v20 = vadd.f32 %v2518_v46, %v2500_v19  ;;  %3840 = vmatmul.msk.f32.gmra.mxu0 %vm728_vm13, %v4515_v35  ;;  %3852 = vmatmul.msk.f32.gmra.mxu1 %vm728_vm13, %v4515_v35  ;;  %v4858_v51 = vsel %vm538_vm1, %v2896_v44, %v3492_v50  ;;  %v1165_v8 = vperm.slane %v4848_v40, 0 }
 0x17e   : > { %v2861_v0 = vadd.f32 %v2860_v61, %v2859_v27  ;;  %v2868_v58 = vadd.f32 %v2867_v24, %v2866_v32  ;;  %2030 = vmatpush.msrb.mxu3 %v1078_v30  ;;  %v1105_v11 = vperm.slane %v4852_v55, 0  ;;  %v4865_v32 = vadd.s32 1, %v4852_v55 }
 0x17f   : > { %v3010_v16 = vrot.slane %v3009_v38, 4  ;;  %v3017_v19 = vrot.slane %v3016_v20, 4  ;;  %v1471_v31 = vpop.f32.mrf.mxu2  ;;  %v1524_v10 = vpop.f32.mrf.mxu3  ;;  %v1106_v15 = vperm.slane %v4852_v55, 1 }
 0x180   : > { %v2513_v27 = vmul.f32 %v1471_v31, %v4692_v57  ;;  %v2514_v18 = vmul.f32 %v1524_v10, %v4694_v59  ;;  %v4869_v25 = vsel %vm538_vm1, %v2861_v0, %v4786_v41  ;;  %v4874_v53 = vsel %vm538_vm1, %v2868_v58, %v4789_v22 }
 0x181   : > { %v3011_v28 = vadd.f32 %v3010_v16, %v3009_v38  ;;  %v3018_v46 = vadd.f32 %v3017_v19, %v3016_v20  ;;  %v6248_v20 = vperm.slane %v4848_v40, 1  ;;  %vm4884_vm11 = vcmp.eq.s32.totalorder %v4101_v1, %v1105_v11 }
 0x182   : > { %v2981_v61 = vadd.f32 %v2513_v27, %v2495_v21  ;;  %v2988_v50 = vadd.f32 %v2514_v18, %v2496_v45  ;;  %v1686_v44 = vpop.f32.mrf.mxu0  ;;  %v1739_v24 = vpop.f32.mrf.mxu1  ;;  %v1240_v22 = vperm.slane %v4865_v32, 0  ;;  %v1297_v45 = vperm.slane %v4751_v17, 0 }
 0x183   : > { %v3012_v12 = vrot.slane %v3011_v28, 2  ;;  %v3019_v38 = vrot.slane %v3018_v46, 2  ;;  %vm1124_vm14 = vcmp.eq.s32.totalorder %v4101_v1, %v1106_v15  ;;  %v2535_v31 = vmul.f32 %v1686_v44, %v4630_v47 }
 0x184   : > { %v2982_v30 = vrot.slane %v2981_v61, 4  ;;  %v2989_v16 = vrot.slane %v2988_v50, 4  ;;  %3805 = vmatmul.msk.f32.vlgmr.msra.gmra.mxu2 %vm728_vm13, %v4327_v2  ;;  %3817 = vmatmul.msk.f32.vlgmr.msra.gmra.mxu3 %vm728_vm13, %v4327_v2  ;;  %vm1258_vm12 = vcmp.eq.s32.totalorder %v4101_v1, %v1240_v22  ;;  %v2536_v18 = vmul.f32 %v1739_v24, %v4660_v54 }
 0x185   : > { %v3013_v0 = vadd.f32 %v3012_v12, %v3011_v28  ;;  %v3020_v21 = vadd.f32 %v3019_v38, %v3018_v46  ;;  %3877 = vmatmul.msk.f32.vlgmr.msrb.gmra.mxu0 %vm728_vm13, %v4327_v2  ;;  %3889 = vmatmul.msk.f32.vlgmr.msrb.gmra.mxu1 %vm728_vm13, %v4327_v2  ;;  %v1241_v12 = vperm.slane %v4865_v32, 1  ;;  %v1333_v24 = vsel %vm1258_vm12, %v1297_v45, 0.0 }
 0x186   : > { %v2983_v58 = vadd.f32 %v2982_v30, %v2981_v61  ;;  %v2990_v19 = vadd.f32 %v2989_v16, %v2988_v50  ;;  %v1201_v61 = vsel %vm4884_vm11, %v1165_v8, 0.0  ;;  %v1202_v50 = vsel %vm1124_vm14, %v6248_v20, 0.0 }
 0x187   : > { %v3014_v10 = vrot.slane %v3013_v0, 1  ;;  %v3021_v27 = vrot.slane %v3020_v21, 1  ;;  %v1474_v28 = vpop.f32.mrf.mxu2  ;;  %v1527_v46 = vpop.f32.mrf.mxu3  ;;  %vm4915_vm5 = vcmp.eq.s32.totalorder %v4101_v1, %v1241_v12  ;;  %vm1141_vm0 = vcmp.eq.s32.totalorder %v4120_v13, %v1105_v11 }
 0x188   : > { %v2984_v38 = vrot.slane %v2983_v58, 2  ;;  %v2991_v26 = vrot.slane %v2990_v19, 2  ;;  %v2531_v30 = vmul.f32 %v1474_v28, %v4680_v43  ;;  %v2532_v28 = vmul.f32 %v1527_v46, %v4686_v34 }
 0x189   : > { %v3015_v44 = vadd.f32 %v3014_v10, %v3013_v0  ;;  %v6249_v0 = vperm.slane %v4540_v29, 2  ;;  %v3022_v10 = vadd.f32 %v3021_v27, %v3020_v21  ;;  %vm1276_vm10 = vcmp.eq.s32.totalorder %v4120_v13, %v1240_v22 }
 0x18a   : > { %v2985_v37 = vadd.f32 %v2984_v38, %v2983_v58  ;;  %v2992_v6 = vadd.f32 %v2991_v26, %v2990_v19  ;;  %v1689_v41 = vpop.f32.mrf.mxu0  ;;  %v1742_v56 = vpop.f32.mrf.mxu1  ;;  %v4932_v26 = vadd.f32 %v1333_v24, %v1201_v61  ;;  %v6252_v61 = vperm.slane %v4546_v33, 2 }
 0x18b   : > { %v2553_v36 = vmul.f32 %v1689_v41, %v4676_v60  ;;  %v2554_v49 = vmul.f32 %v1742_v56, %v4678_v5  ;;  %v4926_v48 = vsel %vm541_vm2, %v3015_v44, %v4855_v14  ;;  %v1334_v56 = vsel %vm4915_vm5, %v1298_v52, 0.0 }
 0x18c   : > { %v2986_v20 = vrot.slane %v2985_v37, 1  ;;  %v2993_v58 = vrot.slane %v2992_v6, 1  ;;  %3806 = vmatmul.msk.f32.gmra.mxu2 %vm728_vm13, %v4339_v7  ;;  %3818 = vmatmul.msk.f32.gmra.mxu3 %vm728_vm13, %v4339_v7  ;;  %v6253_v14 = vperm.slane %v4556_v42, 2  ;;  %vm1117_vm6 = vcmp.eq.s32.totalorder %v4101_v1, %v6249_v0 }
 0x18d   : > { %v3135_v21 = vadd.f32 %v2553_v36, %v2535_v31  ;;  %v3142_v19 = vadd.f32 %v2554_v49, %v2536_v18  ;;  %3878 = vmatmul.msk.f32.gmra.mxu0 %vm728_vm13, %v4339_v7  ;;  %3890 = vmatmul.msk.f32.gmra.mxu1 %vm728_vm13, %v4339_v7  ;;  %v6254_v49 = vperm.slane %v4549_v39, 2  ;;  %v6250_v44 = vperm.slane %v4540_v29, 3 }
 0x18e   : > { %v2987_v27 = vadd.f32 %v2986_v20, %v2985_v37  ;;  %v2994_v46 = vadd.f32 %v2993_v58, %v2992_v6  ;;  %v4951_v24 = vsel %vm541_vm2, %v3022_v10, %v4858_v51  ;;  %v4955_v20 = vadd.f32 %v1334_v56, %v1202_v50 }
 0x18f   : > { %v3136_v36 = vrot.slane %v3135_v21, 4  ;;  %v3143_v31 = vrot.slane %v3142_v19, 4  ;;  %v1477_v18 = vpop.f32.mrf.mxu2  ;;  %v1530_v38 = vpop.f32.mrf.mxu3  ;;  %v1195_v58 = vsel %vm1117_vm6, %v6253_v14, 0.0  ;;  %vm1252_vm7 = vcmp.eq.s32.totalorder %v4101_v1, %v6254_v49 }
 0x190   : > { %v2549_v6 = vmul.f32 %v1477_v18, %v4692_v57  ;;  %v2550_v37 = vmul.f32 %v1530_v38, %v4694_v59  ;;  %v4964_v0 = vsel %vm541_vm2, %v2987_v27, %v4869_v25  ;;  %v4968_v51 = vsel %vm541_vm2, %v2994_v46, %v4874_v53 }
 0x191   : > { %v3137_v16 = vadd.f32 %v3136_v36, %v3135_v21  ;;  %v3144_v41 = vadd.f32 %v3143_v31, %v3142_v19  ;;  %v1327_v31 = vsel %vm1252_vm7, %v6252_v61, 0.0  ;;  %vm4975_vm8 = vcmp.eq.s32.totalorder %v4101_v1, %v6250_v44 }
 0x192   : > { %v3107_v10 = vadd.f32 %v2549_v6, %v2531_v30  ;;  %v3114_v50 = vadd.f32 %v2550_v37, %v2532_v28  ;;  %v1692_v56 = vpop.f32.mrf.mxu0  ;;  %v1745_v21 = vpop.f32.mrf.mxu1  ;;  %v6343_v30 = vld [vmem:[#allocation8_spill] sm:$0xff]  ;;  %v6255_v28 = vperm.slane %v4556_v42, 3  ;;  %v6251_v6 = vperm.slane %v4549_v39, 3 }
 0x193   : > { %v3138_v19 = vrot.slane %v3137_v16, 2  ;;  %v3145_v36 = vrot.slane %v3144_v41, 2  ;;  %v2571_v53 = vmul.f32 %v1692_v56, %v4630_v47  ;;  %v6256_v47 = vperm.slane %v4546_v33, 3 }
 0x194   : > { %v3108_v25 = vrot.slane %v3107_v10, 4  ;;  %v3115_v27 = vrot.slane %v3114_v50, 4  ;;  %3807 = vmatmul.msk.f32.gmra.mxu2 %vm728_vm13, %v6343_v30  ;;  %3819 = vmatmul.msk.f32.gmra.mxu3 %vm728_vm13, %v6343_v30  ;;  %v2572_v44 = vmul.f32 %v1745_v21, %v4660_v54  ;;  %vm1253_vm9 = vcmp.eq.s32.totalorder %v4101_v1, %v6251_v6 }
 0x195   : > { %v3139_v46 = vadd.f32 %v3138_v19, %v3137_v16  ;;  %v3146_v38 = vadd.f32 %v3145_v36, %v3144_v41  ;;  %3879 = vmatmul.msk.f32.gmra.mxu0 %vm728_vm13, %v6343_v30  ;;  %3891 = vmatmul.msk.f32.gmra.mxu1 %vm728_vm13, %v6343_v30  ;;  %v1196_v54 = vsel %vm4975_vm8, %v6255_v28, 0.0  ;;  %v1219_v6 = vsel %vm1141_vm0, %v1165_v8, 0.0  ;;  %v6374_v30 = vld [vmem:[#allocation14_spill] sm:$0xff] }
 0x196   : > { %v3109_v37 = vadd.f32 %v3108_v25, %v3107_v10  ;;  %v3116_v56 = vadd.f32 %v3115_v27, %v3114_v50  ;;  %v5001_v25 = vadd.f32 %v1327_v31, %v1195_v58  ;;  %v1328_v27 = vsel %vm1253_vm9, %v6256_v47, 0.0  ;;  %v6344_v47 = vld [vmem:[#allocation9_spill] sm:$0xff] }
 0x197   : > { %v3140_v16 = vrot.slane %v3139_v46, 1  ;;  %v3147_v41 = vrot.slane %v3146_v38, 1  ;;  %v1480_v19 = vpop.f32.mrf.mxu2  ;;  %v1533_v36 = vpop.f32.mrf.mxu3  ;;  %v1351_v49 = vsel %vm1276_vm10, %v1297_v45, 0.0  ;;  %vm1142_vm11 = vcmp.eq.s32.totalorder %v4120_v13, %v1106_v15 }
 0x198   : > { %v3110_v10 = vrot.slane %v3109_v37, 2  ;;  %v3117_v50 = vrot.slane %v3116_v56, 2  ;;  %v2567_v11 = vmul.f32 %v1480_v19, %v4680_v43  ;;  %v2568_v21 = vmul.f32 %v1533_v36, %v4686_v34 }
 0x199   : > { %v3141_v22 = vadd.f32 %v3140_v16, %v3139_v46  ;;  %v3148_v18 = vadd.f32 %v3147_v41, %v3146_v38  ;;  %v5017_v34 = vadd.f32 %v1328_v27, %v1196_v54  ;;  %vm1277_vm14 = vcmp.eq.s32.totalorder %v4120_v13, %v1241_v12 }
 0x19a   : > { %v3111_v61 = vadd.f32 %v3110_v10, %v3109_v37  ;;  %v3118_v14 = vadd.f32 %v3117_v50, %v3116_v56  ;;  %v1695_v58 = vpop.f32.mrf.mxu0  ;;  %v1748_v31 = vpop.f32.mrf.mxu1  ;;  %v5033_v8 = vadd.f32 %v1351_v49, %v1219_v6  ;;  %v6345_v46 = vperm.slane %v4848_v40, 1 }
 0x19b   : > { %v2589_v28 = vmul.f32 %v1695_v58, %v4676_v60  ;;  %v2590_v43 = vmul.f32 %v1748_v31, %v4678_v5  ;;  %v1352_v15 = vsel %vm1277_vm14, %v1298_v52, 0.0  ;;  %v6346_v37 = vperm.slane %v4540_v29, 2 }
 0x19c   : > { %v3112_v19 = vrot.slane %v3111_v61, 1  ;;  %v3119_v36 = vrot.slane %v3118_v14, 1  ;;  %3808 = vmatmul.msk.f32.gmra.mxu2 %vm728_vm13, %v6344_v47  ;;  %3820 = vmatmul.msk.f32.gmra.mxu3 %vm728_vm13, %v6344_v47  ;;  %v1220_v38 = vsel %vm1142_vm11, %v6345_v46, 0.0  ;;  %v6347_v16 = vperm.slane %v4549_v39, 2 }
 0x19d   : > { %v3261_v60 = vadd.f32 %v2589_v28, %v2571_v53  ;;  %v3268_v5 = vadd.f32 %v2590_v43, %v2572_v44  ;;  %3880 = vmatmul.msk.f32.gmra.mxu0 %vm728_vm13, %v6344_v47  ;;  %3892 = vmatmul.msk.f32.gmra.mxu1 %vm728_vm13, %v6344_v47  ;;  %vm1135_vm12 = vcmp.eq.s32.totalorder %v4120_v13, %v6346_v37  ;;  %v6348_v10 = vperm.slane %v4556_v42, 2 }
 0x19e   : > { %v3113_v45 = vadd.f32 %v3112_v19, %v3111_v61  ;;  %v3120_v12 = vadd.f32 %v3119_v36, %v3118_v14  ;;  %vm1270_vm5 = vcmp.eq.s32.totalorder %v4120_v13, %v6347_v16  ;;  %v3490_v49 = vsel %vm544_vm4, %v3141_v22, %v4926_v48 }
 0x19f   : > { %v3262_v44 = vrot.slane %v3261_v60, 4  ;;  %v3269_v53 = vrot.slane %v3268_v5, 4  ;;  %v1483_v28 = vpop.f32.mrf.mxu2  ;;  %v1536_v56 = vpop.f32.mrf.mxu3  ;;  %v3495_v61 = vsel %vm544_vm4, %v3148_v18, %v4951_v24  ;;  %v1213_v50 = vsel %vm1135_vm12, %v6348_v10, 0.0 }
 0x1a0   : > { %v2585_v52 = vmul.f32 %v1483_v28, %v4692_v57  ;;  %v2586_v6 = vmul.f32 %v1536_v56, %v4694_v59  ;;  %v6349_v54 = vperm.slane %v4546_v33, 2  ;;  %v5055_v22 = vadd.f32 %v1352_v15, %v1220_v38 }
 0x1a1   : > { %v3263_v41 = vadd.f32 %v3262_v44, %v3261_v60  ;;  %v3270_v14 = vadd.f32 %v3269_v53, %v3268_v5  ;;  %v6350_v24 = vperm.slane %v4540_v29, 3  ;;  %v5066_v59 = vsel %vm544_vm4, %v3113_v45, %v4964_v0  ;;  %v6353_v60 = vld [vmem:[#allocation10_spill] sm:$0xff] }
 0x1a2   : > { %v1345_v27 = vsel %vm1270_vm5, %v6349_v54, 0.0  ;;  %v3233_v58 = vadd.f32 %v2585_v52, %v2567_v11  ;;  %v3240_v31 = vadd.f32 %v2586_v6, %v2568_v21  ;;  %v1874_v43 = vpop.f32.mrf.mxu0  ;;  %v1927_v48 = vpop.f32.mrf.mxu1  ;;  %v5070_v11 = vsel %vm544_vm4, %v3120_v12, %v4968_v51 }
 0x1a3   : > { %vm5060_vm6 = vcmp.eq.s32.totalorder %v4120_v13, %v6350_v24  ;;  %v3264_v21 = vrot.slane %v3263_v41, 2  ;;  %v3271_v18 = vrot.slane %v3270_v14, 2  ;;  %v5076_v5 = vadd.f32 %v1345_v27, %v1213_v50 }
 0x1a4   : > { %v3234_v19 = vrot.slane %v3233_v58, 4  ;;  %v3241_v36 = vrot.slane %v3240_v31, 4  ;;  %3809 = vmatmul.msk.f32.gmra.mxu2 %vm728_vm13, %v6353_v60  ;;  %3821 = vmatmul.msk.f32.gmra.mxu3 %vm728_vm13, %v6353_v60  ;;  %v6354_v46 = vperm.slane %v4413_v62, 2  ;;  %v6355_v45 = vperm.slane %v4556_v42, 3 }
 0x1a5   : > { %v3265_v0 = vadd.f32 %v3264_v21, %v3263_v41  ;;  %v3272_v51 = vadd.f32 %v3271_v18, %v3270_v14  ;;  %3881 = vmatmul.msk.f32.gmra.mxu0 %vm728_vm13, %v6353_v60  ;;  %3893 = vmatmul.msk.f32.gmra.mxu1 %vm728_vm13, %v6353_v60  ;;  %v6356_v15 = vperm.slane %v4549_v39, 3  ;;  %v6359_v53 = vperm.slane %v4423_v4, 2 }
 0x1a6   : > { %vm813_vm7 = vcmp.eq.s32.totalorder %v4101_v1, %v6354_v46  ;;  %v1214_v38 = vsel %vm5060_vm6, %v6355_v45, 0.0  ;;  %v3235_v12 = vadd.f32 %v3234_v19, %v3233_v58  ;;  %v3242_v44 = vadd.f32 %v3241_v36, %v3240_v31 }
 0x1a7   : > { %vm5093_vm8 = vcmp.eq.s32.totalorder %v4120_v13, %v6356_v15  ;;  %v891_v28 = vsel %vm813_vm7, %v6359_v53, 0.0  ;;  %v6360_v56 = vperm.slane %v4420_v3, 2  ;;  %v3266_v16 = vrot.slane %v3265_v0, 1  ;;  %v1556_v6 = vpop.f32.mrf.mxu2  ;;  %v1609_v41 = vpop.f32.mrf.mxu3 }
 0x1a8   : > { %v3273_v52 = vrot.slane %v3272_v51, 1  ;;  %v6361_v14 = vperm.slane %v4415_v63, 2  ;;  %v6362_v50 = vperm.slane %v4413_v62, 3  ;;  %v3236_v54 = vrot.slane %v3235_v12, 2 }
 0x1a9   : > { %vm948_vm0 = vcmp.eq.s32.totalorder %v4101_v1, %v6360_v56  ;;  %v3243_v27 = vrot.slane %v3242_v44, 2  ;;  %v2395_v58 = vmul.f32 %v1874_v43, %v4932_v26  ;;  %v2396_v31 = vmul.f32 %v1927_v48, %v4955_v20  ;;  %v6366_v56 = vld [vmem:[#allocation11_spill] sm:$0xff] }
 0x1aa   : > { %v1023_v10 = vsel %vm948_vm0, %v6361_v14, 0.0  ;;  %vm814_vm9 = vcmp.eq.s32.totalorder %v4101_v1, %v6362_v50  ;;  %v3267_v24 = vadd.f32 %v3266_v16, %v3265_v0  ;;  %v3274_v57 = vadd.f32 %v3273_v52, %v3272_v51  ;;  %v1877_v45 = vpop.f32.mrf.mxu0  ;;  %v1930_v43 = vpop.f32.mrf.mxu1  ;;  %v5144_v50 = vld [vmem:[%s6218_s5 + $0x10] sm:$0x3] }
 0x1ab   : > { %v6363_v21 = vperm.slane %v4546_v33, 3  ;;  %v1059_v19 = vadd.f32 %v1023_v10, %v891_v28  ;;  %v3237_v36 = vadd.f32 %v3236_v54, %v3235_v12  ;;  %v3244_v46 = vadd.f32 %v3243_v27, %v3242_v44 }
 0x1ac   : > { %v6364_v48 = vperm.slane %v4423_v4, 3  ;;  %v6365_v53 = vperm.slane %v4420_v3, 3  ;;  %v3491_v0 = vsel %vm547_vm3, %v3267_v24, %v3490_v49  ;;  %v3496_v51 = vsel %vm547_vm3, %v3274_v57, %v3495_v61  ;;  %3810 = vmatmul.msk.f32.gmra.mxu2 %vm728_vm13, %v6366_v56  ;;  %3822 = vmatmul.msk.f32.gmra.mxu3 %vm728_vm13, %v6366_v56  ;;  %v6369_v24 = vld [vmem:[#allocation5_spill] sm:$0xff] }
 0x1ad   : > { %v1346_v18 = vsel %vm5093_vm8, %v6363_v21, 0.0  ;;  %v2413_v37 = vmul.f32 %v1877_v45, %v5033_v8  ;;  %v2414_v28 = vmul.f32 %v1930_v43, %v5055_v22  ;;  %1978 = vmatpush.msrb.mxu2 %v1059_v19  ;;  %3579 = vst [vmem:[%s5112_s21 + $0x20] sm:$0x3f] %v3491_v0  ;;  %v3238_v12 = vrot.slane %v3237_v36, 1  ;;  %3882 = vmatmul.msk.f32.gmra.mxu0 %vm728_vm13, %v6366_v56 }
 0x1ae   : > { %v892_v15 = vsel %vm814_vm9, %v6364_v48, 0.0  ;;  %vm949_vm10 = vcmp.eq.s32.totalorder %v4101_v1, %v6365_v53  ;;  %v3245_v44 = vrot.slane %v3244_v46, 1  ;;  %v5132_v16 = vadd.f32 %v1346_v18, %v1214_v38  ;;  %3580 = vst [vmem:[%s5112_s21 + $0x28] sm:$0x3f] %v3496_v51  ;;  %3894 = vmatmul.msk.f32.gmra.mxu1 %vm728_vm13, %v6366_v56  ;;  %v5149_v38 = vld [vmem:[%s6219_s6 + $0x10] sm:$0x3] }
 0x1af   : > { %v6367_v49 = vperm.slane %v4415_v63, 3  ;;  %v2659_v61 = vadd.f32 %v2413_v37, %v2395_v58  ;;  %v2666_v14 = vadd.f32 %v2414_v28, %v2396_v31  ;;  %v3239_v54 = vadd.f32 %v3238_v12, %v3237_v36  ;;  %v6368_v58 = vld [vmem:[#allocation6_spill] sm:$0xff]  ;;  %v1559_v43 = vpop.f32.mrf.mxu2  ;;  %v1612_v48 = vpop.f32.mrf.mxu3 }
 0x1b0   : > { %v3246_v27 = vadd.f32 %v3245_v44, %v3244_v46  ;;  %v760_v31 = vmul.f32 %v6368_v58, %v5144_v50  ;;  %v763_v57 = vmul.f32 %v6369_v24, %v5149_v38  ;;  %v2389_v21 = vmul.f32 %v1556_v6, %v5001_v25 }
 0x1b1   : > { %v1024_v52 = vsel %vm949_vm10, %v6367_v49, 0.0  ;;  %v2390_v18 = vmul.f32 %v1609_v41, %v5017_v34  ;;  %v2660_v19 = vrot.slane %v2659_v61, 4  ;;  %v2667_v45 = vrot.slane %v2666_v14, 4 }
 0x1b2   : > { %v1060_v10 = vadd.f32 %v1024_v52, %v892_v15  ;;  %v3471_v36 = vsel %vm547_vm3, %v3239_v54, %v5066_v59  ;;  %v3476_v46 = vsel %vm547_vm3, %v3246_v27, %v5070_v11  ;;  %v2407_v15 = vmul.f32 %v1559_v43, %v5076_v5  ;;  %v1880_v37 = vpop.f32.mrf.mxu0  ;;  %v1933_v28 = vpop.f32.mrf.mxu1  ;;  %v6370_v59 = vld [vmem:[#allocation12_spill] sm:$0xff] }
 0x1b3   : > { %v2408_v53 = vmul.f32 %v1612_v48, %v5132_v16  ;;  %3575 = vst [vmem:[%s5112_s21] sm:$0x3f] %v3471_v36  ;;  %v2661_v0 = vadd.f32 %v2660_v19, %v2659_v61  ;;  %v766_v6 = vadd.f32 %v763_v57, %v760_v31  ;;  %v2668_v12 = vadd.f32 %v2667_v45, %v2666_v14 }
 0x1b4   : > { %2031 = vmatpush.msrb.mxu3 %v1060_v10  ;;  %3576 = vst [vmem:[%s5112_s21 + $0x8] sm:$0x3f] %v3476_v46  ;;  %v2617_v41 = vadd.f32 %v2407_v15, %v2389_v21  ;;  %3811 = vmatmul.msk.f32.gmra.mxu2 %vm728_vm13, %v6370_v59  ;;  %v2431_v43 = vmul.f32 %v1880_v37, %v4932_v26 }
 0x1b5   : > { %v2624_v51 = vadd.f32 %v2408_v53, %v2390_v18  ;;  %v2662_v44 = vrot.slane %v2661_v0, 2  ;;  %3823 = vmatmul.msk.f32.gmra.mxu3 %vm728_vm13, %v6370_v59  ;;  %v769_v11 = vadd.f32 1.0, %v766_v6  ;;  %3883 = vmatmul.msk.f32.gmra.mxu0 %vm728_vm13, %v6370_v59  ;;  %v2669_v57 = vrot.slane %v2668_v12, 2 }
 0x1b6   : > { %v2618_v49 = vrot.slane %v2617_v41, 4  ;;  %3895 = vmatmul.msk.f32.gmra.mxu1 %vm728_vm13, %v6370_v59  ;;  %v2432_v48 = vmul.f32 %v1933_v28, %v4955_v20 }
 0x1b7   : > { %v2625_v52 = vrot.slane %v2624_v51, 4  ;;  %v772_v54 = vmul.f32 23.5, %v769_v11  ;;  %v1562_v14 = vpop.f32.mrf.mxu2  ;;  %v1615_v27 = vpop.f32.mrf.mxu3  ;;  %v5173_v31 = vadd.f32 %v2662_v44, %v2661_v0  ;;  %v6371_v44 = vld [vmem:[#allocation13_spill] sm:$0xff] }
 0x1b8   : > { %v2619_v61 = vadd.f32 %v2618_v49, %v2617_v41 }
 0x1b9   : > { %v2626_v10 = vadd.f32 %v2625_v52, %v2624_v51  ;;  %v775_v18 = vfloor.f32 %v772_v54  ;;  %v5182_v51 = vadd.f32 %v2669_v57, %v2668_v12 }
 0x1ba   : > { %v2620_v21 = vrot.slane %v2619_v61, 2  ;;  %v1883_v36 = vpop.f32.mrf.mxu0  ;;  %v1936_v46 = vpop.f32.mrf.mxu1 }
 0x1bb   : > { %v2627_v45 = vrot.slane %v2626_v10, 2  ;;  %v2449_v15 = vmul.f32 %v1883_v36, %v5033_v8  ;;  %v2450_v53 = vmul.f32 %v1936_v46, %v5055_v22  ;;  %v5179_v6 = vsub.f32 %v772_v54, %v775_v18 }
 0x1bc   : > { %v2621_v19 = vadd.f32 %v2620_v21, %v2619_v61  ;;  %v3980_v41 = vcvt.f32.s32 %v775_v18  ;;  %3812 = vmatmul.msk.f32.gmra.mxu2 %vm728_vm13, %v6371_v44  ;;  %v2425_v61 = vmul.f32 %v1562_v14, %v5001_v25  ;;  %v2426_v54 = vmul.f32 %v1615_v27, %v5017_v34 }
 0x1bd   : > { %3824 = vmatmul.msk.f32.gmra.mxu3 %vm728_vm13, %v6371_v44  ;;  %v2785_v37 = vadd.f32 %v2449_v15, %v2431_v43  ;;  %v2792_v28 = vadd.f32 %v2450_v53, %v2432_v48  ;;  %3884 = vmatmul.msk.f32.gmra.mxu0 %vm728_vm13, %v6371_v44  ;;  %v841_v52 = vsub.f32 1.0, %v5179_v6  ;;  %v2628_v11 = vadd.f32 %v2627_v45, %v2626_v10 }
 0x1be   : > { %3896 = vmatmul.msk.f32.gmra.mxu1 %vm728_vm13, %v6371_v44  ;;  %v5192_v49 = vadd.s32 4294967272, %v3980_v41  ;;  %v2622_v12 = vrot.slane %v2621_v19, 1  ;;  %v993_v10 = vperm.slane %v5179_v6, 0 }
 0x1bf   : > { %v2786_v57 = vrot.slane %v2785_v37, 4  ;;  %v2793_v21 = vrot.slane %v2792_v28, 4  ;;  %v1565_v18 = vpop.f32.mrf.mxu2  ;;  %v1618_v43 = vpop.f32.mrf.mxu3  ;;  %v5198_v36 = vperm.slane %v841_v52, 0  ;;  %v2629_v47 = vrot.slane %v2628_v11, 1 }
 0x1c0   : > { %v801_v48 = vperm.slane %v5192_v49, 0  ;;  %v2443_v46 = vmul.f32 %v1565_v18, %v5076_v5  ;;  %v2444_v15 = vmul.f32 %v1618_v43, %v5132_v16  ;;  %v5203_v53 = vadd.s32 1, %v5192_v49 }
 0x1c1   : > { %v2787_v14 = vadd.f32 %v2786_v57, %v2785_v37  ;;  %v2794_v45 = vadd.f32 %v2793_v21, %v2792_v28  ;;  %v5214_v60 = vadd.f32 %v2622_v12, %v2621_v19  ;;  %v2630_v33 = vadd.f32 %v2629_v47, %v2628_v11 }
 0x1c2   : > { %vm5207_vm11 = vcmp.eq.s32.totalorder %v4120_v13, %v801_v48  ;;  %v2743_v44 = vadd.f32 %v2443_v46, %v2425_v61  ;;  %v2750_v18 = vadd.f32 %v2444_v15, %v2426_v54  ;;  %v1886_v59 = vpop.f32.mrf.mxu0  ;;  %v1939_v43 = vpop.f32.mrf.mxu1  ;;  %v936_v56 = vperm.slane %v5203_v53, 0 }
 0x1c3   : > { %v915_v37 = vsel %vm5207_vm11, %v5198_v36, 0.0  ;;  %v2788_v57 = vrot.slane %v2787_v14, 2  ;;  %v2795_v19 = vrot.slane %v2794_v45, 2  ;;  %v6375_v61 = vperm.slane %v5192_v49, 1 }
 0x1c4   : > { %v2744_v21 = vrot.slane %v2743_v44, 4  ;;  %v2751_v41 = vrot.slane %v2750_v18, 4  ;;  %3813 = vmatmul.msk.f32.gmra.mxu2 %vm728_vm13, %v6374_v30  ;;  %vm972_vm14 = vcmp.eq.s32.totalorder %v4120_v13, %v936_v56  ;;  %v5236_v46 = vperm.slane %v841_v52, 1 }
 0x1c5   : > { %3825 = vmatmul.msk.f32.gmra.mxu3 %vm728_vm13, %v6374_v30  ;;  %3885 = vmatmul.msk.f32.gmra.mxu0 %vm728_vm13, %v6374_v30  ;;  %v1047_v12 = vsel %vm972_vm14, %v993_v10, 0.0  ;;  %vm5232_vm12 = vcmp.eq.s32.totalorder %v4120_v13, %v6375_v61  ;;  %v937_v28 = vperm.slane %v5203_v53, 1  ;;  %v2467_v42 = vmul.f32 %v1886_v59, %v4932_v26 }
 0x1c6   : > { %3897 = vmatmul.msk.f32.gmra.mxu1 %vm728_vm13, %v6374_v30  ;;  %v2745_v15 = vadd.f32 %v2744_v21, %v2743_v44  ;;  %v2752_v27 = vadd.f32 %v2751_v41, %v2750_v18  ;;  %v1083_v0 = vadd.f32 %v1047_v12, %v915_v37  ;;  %vm5241_vm5 = vcmp.eq.s32.totalorder %v4101_v1, %v801_v48 }
 0x1c7   : > { %v1568_v39 = vpop.f32.mrf.mxu2  ;;  %v1621_v30 = vpop.f32.mrf.mxu3  ;;  %vm954_vm6 = vcmp.eq.s32.totalorder %v4101_v1, %v936_v56  ;;  %v2789_v61 = vadd.f32 %v2788_v57, %v2787_v14  ;;  %v2468_v44 = vmul.f32 %v1939_v43, %v4955_v20  ;;  %v2796_v41 = vadd.f32 %v2795_v19, %v2794_v45 }
 0x1c8   : > { %v2746_v52 = vrot.slane %v2745_v15, 2  ;;  %v2753_v7 = vrot.slane %v2752_v27, 2  ;;  %2295 = vmatpush.msra.mxu0 %v1083_v0  ;;  %v916_v47 = vsel %vm5232_vm12, %v5236_v46, 0.0  ;;  %vm973_vm7 = vcmp.eq.s32.totalorder %v4120_v13, %v937_v28 }
 0x1c9   : > { %v897_v59 = vsel %vm5241_vm5, %v5198_v36, 0.0  ;;  %v6380_v14 = vperm.slane %v5179_v6, 1  ;;  %v1029_v43 = vsel %vm954_vm6, %v993_v10, 0.0  ;;  %v2461_v0 = vmul.f32 %v1568_v39, %v5001_v25 }
 0x1ca   : > { %v2747_v11 = vadd.f32 %v2746_v52, %v2745_v15  ;;  %v2754_v48 = vadd.f32 %v2753_v7, %v2752_v27  ;;  %v1889_v56 = vpop.f32.mrf.mxu0  ;;  %v1942_v53 = vpop.f32.mrf.mxu1  ;;  %v2462_v45 = vmul.f32 %v1621_v30, %v5017_v34  ;;  %v1065_v29 = vadd.f32 %v1029_v43, %v897_v59 }
 0x1cb   : > { %v1048_v18 = vsel %vm973_vm7, %v6380_v14, 0.0  ;;  %v2485_v37 = vmul.f32 %v1889_v56, %v5033_v8  ;;  %v2486_v57 = vmul.f32 %v1942_v53, %v5055_v22  ;;  %v2790_v36 = vrot.slane %v2789_v61, 1 }
 0x1cc   : > { %v2748_v21 = vrot.slane %v2747_v11, 1  ;;  %v2755_v19 = vrot.slane %v2754_v48, 1  ;;  %3814 = vmatmul.msk.f32.gmra.mxu2 %vm728_vm13, %v4490_v9  ;;  %v1084_v7 = vadd.f32 %v1048_v18, %v916_v47  ;;  %v6381_v39 = vperm.slane %v5192_v49, 1  ;;  %2296 = vmatpush.msra.mxu0 %v1065_v29 }
 0x1cd   : > { %3826 = vmatmul.msk.f32.gmra.mxu3 %vm728_vm13, %v4490_v9  ;;  %v2911_v10 = vadd.f32 %v2485_v37, %v2467_v42  ;;  %v2918_v12 = vadd.f32 %v2486_v57, %v2468_v44  ;;  %3886 = vmatmul.msk.f32.gmra.mxu0 %vm728_vm13, %v4490_v9  ;;  %v2797_v54 = vrot.slane %v2796_v41, 1  ;;  %vm955_vm0 = vcmp.eq.s32.totalorder %v4101_v1, %v937_v28 }
 0x1ce   : > { %3898 = vmatmul.msk.f32.gmra.mxu1 %vm728_vm13, %v4490_v9  ;;  %vm5271_vm8 = vcmp.eq.s32.totalorder %v4101_v1, %v6381_v39  ;;  %v2749_v15 = vadd.f32 %v2748_v21, %v2747_v11  ;;  %v2756_v27 = vadd.f32 %v2755_v19, %v2754_v48  ;;  %v6384_v59 = vmov %v6380_v14 }
 0x1cf   : > { %2348 = vmatpush.msra.mxu1 %v1084_v7  ;;  %v2912_v42 = vrot.slane %v2911_v10, 4  ;;  %v2919_v52 = vrot.slane %v2918_v12, 4  ;;  %v1571_v44 = vpop.f32.mrf.mxu2  ;;  %v1624_v47 = vpop.f32.mrf.mxu3  ;;  %v898_v49 = vsel %vm5271_vm8, %v5236_v46, 0.0  ;;  %v1030_v56 = vsel %vm955_vm0, %v6384_v59, 0.0 }
 0x1d0   : > { %v5283_v53 = vsel %vm535_vm15, %v2749_v15, %v5214_v60  ;;  %v5286_v11 = vsel %vm535_vm15, %v2756_v27, %v2630_v33  ;;  %v2479_v28 = vmul.f32 %v1571_v44, %v5076_v5  ;;  %v2480_v48 = vmul.f32 %v1624_v47, %v5132_v16 }
 0x1d1   : > { %v2913_v14 = vadd.f32 %v2912_v42, %v2911_v10  ;;  %v2920_v18 = vadd.f32 %v2919_v52, %v2918_v12  ;;  %v5292_v43 = vmul.f32 %v6369_v24, %v5144_v50  ;;  %v5296_v6 = vmul.f32 %v6368_v58, %v5149_v38 }
 0x1d2   : > { %v2869_v46 = vadd.f32 %v2479_v28, %v2461_v0  ;;  %v2876_v60 = vadd.f32 %v2480_v48, %v2462_v45  ;;  %v1892_v37 = vpop.f32.mrf.mxu0  ;;  %v1945_v57 = vpop.f32.mrf.mxu1  ;;  %v1066_v33 = vadd.f32 %v1030_v56, %v898_v49  ;;  %v6281_v21 = vperm.slane %v4413_v62, 6 }
 0x1d3   : > { %v2791_v19 = vadd.f32 %v2790_v36, %v2789_v61  ;;  %v2798_v7 = vadd.f32 %v2797_v54, %v2796_v41  ;;  %v2914_v29 = vrot.slane %v2913_v14, 2  ;;  %v2921_v10 = vrot.slane %v2920_v18, 2 }
 0x1d4   : > { %v2870_v12 = vrot.slane %v2869_v46, 4  ;;  %v2877_v39 = vrot.slane %v2876_v60, 4  ;;  %3815 = vmatmul.msk.f32.gmra.mxu2 %vm728_vm13, %v4505_v23  ;;  %vm835_vm9 = vcmp.eq.s32.totalorder %v4120_v13, %v6281_v21  ;;  %v6280_v24 = vperm.slane %v4423_v4, 6  ;;  %2349 = vmatpush.msra.mxu1 %v1066_v33 }
 0x1d5   : > { %3827 = vmatmul.msk.f32.gmra.mxu3 %vm728_vm13, %v4505_v23  ;;  %v2915_v38 = vadd.f32 %v2914_v29, %v2913_v14  ;;  %v2922_v58 = vadd.f32 %v2921_v10, %v2920_v18  ;;  %3887 = vmatmul.msk.f32.gmra.mxu0 %vm728_vm13, %v4505_v23  ;;  %v6279_v61 = vperm.slane %v4420_v3, 6  ;;  %v6276_v45 = vperm.slane %v4415_v63, 6 }
 0x1d6   : > { %3899 = vmatmul.msk.f32.gmra.mxu1 %vm728_vm13, %v4505_v23  ;;  %v2871_v41 = vadd.f32 %v2870_v12, %v2869_v46  ;;  %v2878_v0 = vadd.f32 %v2877_v39, %v2876_v60  ;;  %v6385_v36 = vrot.slane %v5173_v31, 1  ;;  %v6386_v54 = vrot.slane %v5182_v51, 1 }
 0x1d7   : > { %v1574_v27 = vpop.f32.mrf.mxu2  ;;  %v1627_v42 = vpop.f32.mrf.mxu3  ;;  %v913_v52 = vsel %vm835_vm9, %v6280_v24, 0.0  ;;  %vm970_vm10 = vcmp.eq.s32.totalorder %v4120_v13, %v6279_v61  ;;  %v2916_v44 = vrot.slane %v2915_v38, 1  ;;  %v2923_v47 = vrot.slane %v2922_v58, 1  ;;  %v6393_v61 = vld [vmem:[#allocation7_spill] sm:$0xff] }
 0x1d8   : > { %v2665_v30 = vadd.f32 %v6385_v36, %v5173_v31  ;;  %v2672_v15 = vadd.f32 %v6386_v54, %v5182_v51  ;;  %v2872_v49 = vrot.slane %v2871_v41, 2  ;;  %v2879_v59 = vrot.slane %v2878_v0, 2 }
 0x1d9   : > { %v1045_v51 = vsel %vm970_vm10, %v6276_v45, 0.0  ;;  %v6278_v60 = vperm.slane %v4413_v62, 7  ;;  %v2503_v33 = vmul.f32 %v1892_v37, %v4932_v26  ;;  %v2504_v29 = vmul.f32 %v1945_v57, %v4955_v20 }
 0x1da   : > { %v3507_v56 = vsel %vm535_vm15, %v2791_v19, %v2665_v30  ;;  %v3512_v31 = vsel %vm535_vm15, %v2798_v7, %v2672_v15  ;;  %v2873_v28 = vadd.f32 %v2872_v49, %v2871_v41  ;;  %v2880_v48 = vadd.f32 %v2879_v59, %v2878_v0  ;;  %v1895_v14 = vpop.f32.mrf.mxu0  ;;  %v1948_v18 = vpop.f32.mrf.mxu1 }
 0x1db   : > { %v1081_v46 = vadd.f32 %v1045_v51, %v913_v52  ;;  %v2521_v10 = vmul.f32 %v1895_v14, %v5033_v8  ;;  %v2522_v19 = vmul.f32 %v1948_v18, %v5055_v22  ;;  %v2917_v12 = vadd.f32 %v2916_v44, %v2915_v38 }
 0x1dc   : > { %v2924_v7 = vadd.f32 %v2923_v47, %v2922_v58  ;;  %3816 = vmatmul.msk.f32.gmra.mxu2 %vm728_vm13, %v4515_v35  ;;  %vm5342_vm11 = vcmp.eq.s32.totalorder %v4120_v13, %v6278_v60  ;;  %v6275_v37 = vperm.slane %v4423_v4, 7  ;;  %v6274_v38 = vperm.slane %v4420_v3, 7 }
 0x1dd   : > { %3828 = vmatmul.msk.f32.gmra.mxu3 %vm728_vm13, %v4515_v35  ;;  %v3037_v57 = vadd.f32 %v2521_v10, %v2503_v33  ;;  %v3044_v41 = vadd.f32 %v2522_v19, %v2504_v29  ;;  %3888 = vmatmul.msk.f32.gmra.mxu0 %vm728_vm13, %v4515_v35  ;;  %v6277_v58 = vperm.slane %v4415_v63, 7  ;;  %v2874_v0 = vrot.slane %v2873_v28, 1 }
 0x1de   : > { %3900 = vmatmul.msk.f32.gmra.mxu1 %vm728_vm13, %v4515_v35  ;;  %v2881_v36 = vrot.slane %v2880_v48, 1  ;;  %v2497_v30 = vmul.f32 %v1574_v27, %v5001_v25  ;;  %v2498_v54 = vmul.f32 %v1627_v42, %v5017_v34  ;;  %2189 = vmatpush.msra.mxu2 %v1081_v46  ;;  %v914_v49 = vsel %vm5342_vm11, %v6275_v37, 0.0 }
 0x1df   : > { %v3038_v15 = vrot.slane %v3037_v57, 4  ;;  %v3045_v52 = vrot.slane %v3044_v41, 4  ;;  %v1577_v44 = vpop.f32.mrf.mxu2  ;;  %v1630_v47 = vpop.f32.mrf.mxu3  ;;  %vm971_vm14 = vcmp.eq.s32.totalorder %v4120_v13, %v6274_v38  ;;  %v5363_v59 = vsel %vm538_vm1, %v2917_v12, %v3507_v56 }
 0x1e0   : > { %v2515_v27 = vmul.f32 %v1577_v44, %v5076_v5  ;;  %v2516_v42 = vmul.f32 %v1630_v47, %v5132_v16  ;;  %v1109_v51 = vperm.slane %v4852_v55, 4  ;;  %v5369_v14 = vsel %vm538_vm1, %v2924_v7, %v3512_v31 }
 0x1e1   : > { %v3039_v18 = vadd.f32 %v3038_v15, %v3037_v57  ;;  %v3046_v46 = vadd.f32 %v3045_v52, %v3044_v41  ;;  %v1046_v33 = vsel %vm971_vm14, %v6277_v58, 0.0  ;;  %v2875_v29 = vadd.f32 %v2874_v0, %v2873_v28 }
 0x1e2   : > { %v2995_v10 = vadd.f32 %v2515_v27, %v2497_v30  ;;  %v3002_v19 = vadd.f32 %v2516_v42, %v2498_v54  ;;  %v1898_v39 = vpop.f32.mrf.mxu0  ;;  %v1951_v56 = vpop.f32.mrf.mxu1  ;;  %v1082_v12 = vadd.f32 %v1046_v33, %v914_v49  ;;  %v2882_v50 = vadd.f32 %v2881_v36, %v2880_v48 }
 0x1e3   : > { %v3040_v44 = vrot.slane %v3039_v18, 2  ;;  %v3047_v38 = vrot.slane %v3046_v46, 2  ;;  %v6288_v47 = vperm.slane %v4848_v40, 4  ;;  %vm5381_vm12 = vcmp.eq.s32.totalorder %v4101_v1, %v1109_v51 }
 0x1e4   : > { %v2996_v37 = vrot.slane %v2995_v10, 4  ;;  %v3003_v45 = vrot.slane %v3002_v19, 4  ;;  %3853 = vmatmul.msk.f32.vlgmr.msrb.gmra.mxu2 %vm728_vm13, %v4327_v2  ;;  %v6289_v28 = vperm.slane %v4865_v32, 4  ;;  %2242 = vmatpush.msra.mxu3 %v1082_v12  ;;  %v6287_v57 = vperm.slane %v4751_v17, 4 }
 0x1e5   : > { %3865 = vmatmul.msk.f32.vlgmr.msrb.gmra.mxu3 %vm728_vm13, %v4327_v2  ;;  %v3041_v48 = vadd.f32 %v3040_v44, %v3039_v18  ;;  %v3048_v7 = vadd.f32 %v3047_v38, %v3046_v46  ;;  %3925 = vmatmul.msk.f32.vlgmr.msra.gmra.mxu0 %vm728_vm13, %v4327_v2  ;;  %v6285_v41 = vperm.slane %v4852_v55, 5  ;;  %v5392_v0 = vsel %vm538_vm1, %v2875_v29, %v5283_v53 }
 0x1e6   : > { %v2997_v36 = vadd.f32 %v2996_v37, %v2995_v10  ;;  %v3004_v30 = vadd.f32 %v3003_v45, %v3002_v19  ;;  %3937 = vmatmul.msk.f32.vlgmr.msra.gmra.mxu1 %vm728_vm13, %v4327_v2  ;;  %vm1262_vm5 = vcmp.eq.s32.totalorder %v4101_v1, %v6289_v28  ;;  %v5401_v38 = vsel %vm538_vm1, %v2882_v50, %v5286_v11 }
 0x1e7   : > { %v3042_v54 = vrot.slane %v3041_v48, 1  ;;  %v3049_v15 = vrot.slane %v3048_v7, 1  ;;  %v1580_v52 = vpop.f32.mrf.mxu2  ;;  %v1633_v49 = vpop.f32.mrf.mxu3  ;;  %v1205_v53 = vsel %vm5381_vm12, %v6288_v47, 0.0  ;;  %v2539_v27 = vmul.f32 %v1898_v39, %v4932_v26 }
 0x1e8   : > { %v2998_v45 = vrot.slane %v2997_v36, 2  ;;  %v3005_v37 = vrot.slane %v3004_v30, 2  ;;  %v6283_v42 = vperm.slane %v4865_v32, 5  ;;  %v2540_v18 = vmul.f32 %v1951_v56, %v4955_v20 }
 0x1e9   : > { %v1337_v11 = vsel %vm1262_vm5, %v6287_v57, 0.0  ;;  %vm5415_vm6 = vcmp.eq.s32.totalorder %v4101_v1, %v6285_v41  ;;  %v6282_v46 = vperm.slane %v4848_v40, 5  ;;  %v3043_v33 = vadd.f32 %v3042_v54, %v3041_v48 }
 0x1ea   : > { %v3050_v29 = vadd.f32 %v3049_v15, %v3048_v7  ;;  %v2999_v10 = vadd.f32 %v2998_v45, %v2997_v36  ;;  %v2533_v19 = vmul.f32 %v1580_v52, %v5001_v25  ;;  %v1901_v39 = vpop.f32.mrf.mxu0  ;;  %v1954_v12 = vpop.f32.mrf.mxu1  ;;  %v3006_v56 = vadd.f32 %v3005_v37, %v3004_v30  ;;  %v6396_v15 = vld [vmem:[#allocation16_spill] sm:$0xff]  ;;  %v6397_v37 = vld [vmem:[#allocation18_spill] sm:$0xff] }
 0x1eb   : > { %v2557_v44 = vmul.f32 %v1901_v39, %v5033_v8  ;;  %v2558_v31 = vmul.f32 %v1954_v12, %v5055_v22  ;;  %v6284_v58 = vperm.slane %v4751_v17, 5  ;;  %v2534_v60 = vmul.f32 %v1633_v49, %v5017_v34 }
 0x1ec   : > { %3854 = vmatmul.msk.f32.gmra.mxu2 %vm728_vm13, %v6393_v61  ;;  %v5429_v48 = vadd.f32 %v1337_v11, %v1205_v53  ;;  %vm5434_vm7 = vcmp.eq.s32.totalorder %v4101_v1, %v6283_v42  ;;  %v1206_v54 = vsel %vm5415_vm6, %v6282_v46, 0.0  ;;  %v6286_v52 = vperm.slane %v6396_v15, 6 }
 0x1ed   : > { %3866 = vmatmul.msk.f32.gmra.mxu3 %vm728_vm13, %v6393_v61  ;;  %v3163_v36 = vadd.f32 %v2557_v44, %v2539_v27  ;;  %v3170_v30 = vadd.f32 %v2558_v31, %v2540_v18  ;;  %3926 = vmatmul.msk.f32.gmra.mxu0 %vm728_vm13, %v6393_v61  ;;  %v5447_v49 = vsel %vm541_vm2, %v3043_v33, %v5363_v59  ;;  %v3000_v45 = vrot.slane %v2999_v10, 1  ;;  %v6399_v31 = vld [vmem:[#allocation17_spill] sm:$0xff] }
 0x1ee   : > { %v5451_v53 = vsel %vm541_vm2, %v3050_v29, %v5369_v14  ;;  %3938 = vmatmul.msk.f32.gmra.mxu1 %vm728_vm13, %v6393_v61  ;;  %v6290_v27 = vperm.slane %v6397_v37, 6  ;;  %v3007_v18 = vrot.slane %v3006_v56, 1  ;;  %v1338_v59 = vsel %vm5434_vm7, %v6284_v58, 0.0  ;;  %v6398_v29 = vld [vmem:[#allocation19_spill] sm:$0xff] }
 0x1ef   : > { %v3164_v11 = vrot.slane %v3163_v36, 4  ;;  %v3171_v50 = vrot.slane %v3170_v30, 4  ;;  %v1583_v39 = vpop.f32.mrf.mxu2  ;;  %v1636_v12 = vpop.f32.mrf.mxu3  ;;  %v6293_v44 = vperm.slane %v6398_v29, 6  ;;  %v6292_v24 = vperm.slane %v6399_v31, 6 }
 0x1f0   : > { %v2551_v33 = vmul.f32 %v1583_v39, %v5076_v5  ;;  %v2552_v14 = vmul.f32 %v1636_v12, %v5132_v16  ;;  %vm5467_vm8 = vcmp.eq.s32.totalorder %v4101_v1, %v6286_v52  ;;  %vm5474_vm0 = vcmp.eq.s32.totalorder %v4101_v1, %v6290_v27  ;;  %v6404_v27 = vld [vmem:[#allocation8_spill] sm:$0xff] }
 0x1f1   : > { %v3165_v21 = vadd.f32 %v3164_v11, %v3163_v36  ;;  %v3172_v46 = vadd.f32 %v3171_v50, %v3170_v30  ;;  %v5478_v36 = vadd.f32 %v1338_v59, %v1206_v54  ;;  %v6294_v30 = vperm.slane %v6396_v15, 7 }
 0x1f2   : > { %v3121_v39 = vadd.f32 %v2551_v33, %v2533_v19  ;;  %v3128_v12 = vadd.f32 %v2552_v14, %v2534_v60  ;;  %v1904_v58 = vpop.f32.mrf.mxu0  ;;  %v1957_v41 = vpop.f32.mrf.mxu1  ;;  %v5481_v11 = vadd.f32 %v3000_v45, %v2999_v10  ;;  %v5483_v50 = vadd.f32 %v3007_v18, %v3006_v56 }
 0x1f3   : > { %v3166_v52 = vrot.slane %v3165_v21, 2  ;;  %v3173_v57 = vrot.slane %v3172_v46, 2  ;;  %v1199_v60 = vsel %vm5467_vm8, %v6293_v44, 0.0  ;;  %v1331_v10 = vsel %vm5474_vm0, %v6292_v24, 0.0 }
 0x1f4   : > { %v3122_v47 = vrot.slane %v3121_v39, 4  ;;  %v3129_v28 = vrot.slane %v3128_v12, 4  ;;  %3855 = vmatmul.msk.f32.gmra.mxu2 %vm728_vm13, %v6404_v27  ;;  %v6295_v54 = vperm.slane %v6398_v29, 7  ;;  %v6291_v45 = vperm.slane %v6397_v37, 7 }
 0x1f5   : > { %3867 = vmatmul.msk.f32.gmra.mxu3 %vm728_vm13, %v6404_v27  ;;  %v3167_v19 = vadd.f32 %v3166_v52, %v3165_v21  ;;  %v3174_v56 = vadd.f32 %v3173_v57, %v3172_v46  ;;  %3927 = vmatmul.msk.f32.gmra.mxu0 %vm728_vm13, %v6404_v27  ;;  %vm1122_vm9 = vcmp.eq.s32.totalorder %v4101_v1, %v6294_v30  ;;  %v1296_v42 = vperm.slane %v6399_v31, 7 }
 0x1f6   : > { %v3123_v18 = vadd.f32 %v3122_v47, %v3121_v39  ;;  %v3130_v59 = vadd.f32 %v3129_v28, %v3128_v12  ;;  %3939 = vmatmul.msk.f32.gmra.mxu1 %vm728_vm13, %v6404_v27  ;;  %v2575_v46 = vmul.f32 %v1904_v58, %v4932_v26  ;;  %vm1257_vm10 = vcmp.eq.s32.totalorder %v4101_v1, %v6291_v45 }
 0x1f7   : > { %v3168_v21 = vrot.slane %v3167_v19, 1  ;;  %v3175_v57 = vrot.slane %v3174_v56, 1  ;;  %v1586_v52 = vpop.f32.mrf.mxu2  ;;  %v1639_v33 = vpop.f32.mrf.mxu3  ;;  %v2576_v14 = vmul.f32 %v1957_v41, %v4955_v20  ;;  %vm1145_vm11 = vcmp.eq.s32.totalorder %v4120_v13, %v1109_v51 }
 0x1f8   : > { %v3124_v47 = vrot.slane %v3123_v18, 2  ;;  %v3131_v28 = vrot.slane %v3130_v59, 2  ;;  %v5515_v39 = vadd.f32 %v1331_v10, %v1199_v60  ;;  %v1200_v26 = vsel %vm1122_vm9, %v6295_v54, 0.0 }
 0x1f9   : > { %v3169_v7 = vadd.f32 %v3168_v21, %v3167_v19  ;;  %v6405_v58 = vperm.slane %v4865_v32, 4  ;;  %v3176_v12 = vadd.f32 %v3175_v57, %v3174_v56  ;;  %v1332_v20 = vsel %vm1257_vm10, %v1296_v42, 0.0 }
 0x1fa   : > { %v3125_v45 = vadd.f32 %v3124_v47, %v3123_v18  ;;  %v3132_v24 = vadd.f32 %v3131_v28, %v3130_v59  ;;  %v1907_v44 = vpop.f32.mrf.mxu0  ;;  %v1960_v30 = vpop.f32.mrf.mxu1  ;;  %v6406_v60 = vperm.slane %v4848_v40, 4  ;;  %v6407_v19 = vperm.slane %v4751_v17, 4  ;;  %v6408_v59 = vld [vmem:[#allocation9_spill] sm:$0xff] }
 0x1fb   : > { %vm1280_vm14 = vcmp.eq.s32.totalorder %v4120_v13, %v6405_v58  ;;  %v2593_v51 = vmul.f32 %v1907_v44, %v5033_v8  ;;  %v2594_v41 = vmul.f32 %v1960_v30, %v5055_v22  ;;  %v2569_v56 = vmul.f32 %v1586_v52, %v5001_v25 }
 0x1fc   : > { %v1223_v10 = vsel %vm1145_vm11, %v6406_v60, 0.0  ;;  %v1355_v21 = vsel %vm1280_vm14, %v6407_v19, 0.0  ;;  %v3126_v54 = vrot.slane %v3125_v45, 1  ;;  %v2570_v18 = vmul.f32 %v1639_v33, %v5017_v34  ;;  %3856 = vmatmul.msk.f32.gmra.mxu2 %vm728_vm13, %v6408_v59 }
 0x1fd   : > { %3868 = vmatmul.msk.f32.gmra.mxu3 %vm728_vm13, %v6408_v59  ;;  %v6409_v8 = vperm.slane %v4852_v55, 5  ;;  %v3289_v22 = vadd.f32 %v2593_v51, %v2575_v46  ;;  %v3296_v44 = vadd.f32 %v2594_v41, %v2576_v14  ;;  %3928 = vmatmul.msk.f32.gmra.mxu0 %vm728_vm13, %v6408_v59  ;;  %v5541_v30 = vadd.f32 %v1332_v20, %v1200_v26 }
 0x1fe   : > { %v6410_v25 = vperm.slane %v4865_v32, 5  ;;  %v5548_v34 = vsel %vm544_vm4, %v3169_v7, %v5447_v49  ;;  %v5552_v57 = vsel %vm544_vm4, %v3176_v12, %v5451_v53  ;;  %v3133_v52 = vrot.slane %v3132_v24, 1  ;;  %3940 = vmatmul.msk.f32.gmra.mxu1 %vm728_vm13, %v6408_v59 }
 0x1ff   : > { %vm1146_vm12 = vcmp.eq.s32.totalorder %v4120_v13, %v6409_v8  ;;  %v5556_v46 = vadd.f32 %v1355_v21, %v1223_v10  ;;  %v3290_v33 = vrot.slane %v3289_v22, 4  ;;  %v3297_v47 = vrot.slane %v3296_v44, 4  ;;  %v1589_v28 = vpop.f32.mrf.mxu2  ;;  %v1642_v14 = vpop.f32.mrf.mxu3 }
 0x200   : > { %vm1281_vm5 = vcmp.eq.s32.totalorder %v4120_v13, %v6410_v25  ;;  %v6411_v26 = vperm.slane %v4848_v40, 5  ;;  %v6412_v49 = vperm.slane %v4751_v17, 5  ;;  %v5562_v20 = vadd.f32 %v3126_v54, %v3125_v45 }
 0x201   : > { %v2587_v53 = vmul.f32 %v1589_v28, %v5076_v5  ;;  %v2588_v12 = vmul.f32 %v1642_v14, %v5132_v16  ;;  %v6413_v51 = vperm.slane %v6396_v15, 6  ;;  %v3291_v41 = vadd.f32 %v3290_v33, %v3289_v22 }
 0x202   : > { %v1224_v58 = vsel %vm1146_vm12, %v6411_v26, 0.0  ;;  %v1356_v7 = vsel %vm1281_vm5, %v6412_v49, 0.0  ;;  %v3298_v60 = vadd.f32 %v3297_v47, %v3296_v44  ;;  %v6414_v10 = vperm.slane %v6397_v37, 6  ;;  %v2086_v21 = vpop.f32.mrf.mxu0  ;;  %v2139_v8 = vpop.f32.mrf.mxu1 }
 0x203   : > { %vm1139_vm6 = vcmp.eq.s32.totalorder %v4120_v13, %v6413_v51  ;;  %v6415_v19 = vperm.slane %v6396_v15, 7  ;;  %v5579_v5 = vadd.f32 %v3133_v52, %v3132_v24  ;;  %v3247_v16 = vadd.f32 %v2587_v53, %v2569_v56  ;;  %v6420_v24 = vld [vmem:[#allocation10_spill] sm:$0xff] }
 0x204   : > { %vm1274_vm7 = vcmp.eq.s32.totalorder %v4120_v13, %v6414_v10  ;;  %v3254_v45 = vadd.f32 %v2588_v12, %v2570_v18  ;;  %v5581_v25 = vadd.f32 %v1356_v7, %v1224_v58  ;;  %v3292_v22 = vrot.slane %v3291_v41, 2  ;;  %3857 = vmatmul.msk.f32.gmra.mxu2 %vm728_vm13, %v6420_v24 }
 0x205   : > { %vm5575_vm8 = vcmp.eq.s32.totalorder %v4120_v13, %v6415_v19  ;;  %v3299_v44 = vrot.slane %v3298_v60, 2  ;;  %v6418_v33 = vperm.slane %v6398_v29, 6  ;;  %v6419_v15 = vperm.slane %v6399_v31, 6  ;;  %3869 = vmatmul.msk.f32.gmra.mxu3 %vm728_vm13, %v6420_v24  ;;  %3929 = vmatmul.msk.f32.gmra.mxu0 %vm728_vm13, %v6420_v24 }
 0x206   : > { %v3248_v14 = vrot.slane %v3247_v16, 4  ;;  %v3255_v26 = vrot.slane %v3254_v45, 4  ;;  %v2399_v49 = vmul.f32 %v2086_v21, %v5429_v48  ;;  %v6421_v56 = vperm.slane %v6398_v29, 7  ;;  %3941 = vmatmul.msk.f32.gmra.mxu1 %vm728_vm13, %v6420_v24 }
 0x207   : > { %v1217_v47 = vsel %vm1139_vm6, %v6418_v33, 0.0  ;;  %v1349_v28 = vsel %vm1274_vm7, %v6419_v15, 0.0  ;;  %v3293_v52 = vadd.f32 %v3292_v22, %v3291_v41  ;;  %v3300_v58 = vadd.f32 %v3299_v44, %v3298_v60  ;;  %v1768_v54 = vpop.f32.mrf.mxu2  ;;  %v1821_v21 = vpop.f32.mrf.mxu3 }
 0x208   : > { %v1218_v18 = vsel %vm5575_vm8, %v6421_v56, 0.0  ;;  %v6422_v7 = vperm.slane %v6397_v37, 7  ;;  %v6425_v12 = vperm.slane %v4413_v62, 6  ;;  %v3249_v29 = vadd.f32 %v3248_v14, %v3247_v16 }
 0x209   : > { %v3256_v51 = vadd.f32 %v3255_v26, %v3254_v45  ;;  %v2400_v10 = vmul.f32 %v2139_v8, %v5478_v36  ;;  %v6426_v41 = vperm.slane %v4423_v4, 6  ;;  %v3294_v37 = vrot.slane %v3293_v52, 1 }
 0x20a   : > { %vm5601_vm0 = vcmp.eq.s32.totalorder %v4120_v13, %v6422_v7  ;;  %vm817_vm9 = vcmp.eq.s32.totalorder %v4101_v1, %v6425_v12  ;;  %v3301_v19 = vrot.slane %v3300_v58, 1  ;;  %v6427_v22 = vperm.slane %v4420_v3, 6 }
 0x20b   : > { %v895_v60 = vsel %vm817_vm9, %v6426_v41, 0.0  ;;  %v6428_v44 = vperm.slane %v4413_v62, 7  ;;  %v3250_v16 = vrot.slane %v3249_v29, 2  ;;  %v3257_v45 = vrot.slane %v3256_v51, 2 }
 0x20c   : > { %vm952_vm10 = vcmp.eq.s32.totalorder %v4101_v1, %v6427_v22  ;;  %v5619_v8 = vadd.f32 %v1349_v28, %v1217_v47  ;;  %v1350_v33 = vsel %vm5601_vm0, %v1296_v42, 0.0  ;;  %v3295_v15 = vadd.f32 %v3294_v37, %v3293_v52  ;;  %v2089_v22 = vpop.f32.mrf.mxu0  ;;  %v2142_v47 = vpop.f32.mrf.mxu1 }
 0x20d   : > { %vm818_vm11 = vcmp.eq.s32.totalorder %v4101_v1, %v6428_v44  ;;  %v3302_v14 = vadd.f32 %v3301_v19, %v3300_v58  ;;  %v6429_v26 = vperm.slane %v4415_v63, 6  ;;  %v6430_v7 = vperm.slane %v4423_v4, 7 }
 0x20e   : > { %v3251_v12 = vadd.f32 %v3250_v16, %v3249_v29  ;;  %v3258_v41 = vadd.f32 %v3257_v45, %v3256_v51  ;;  %v6431_v31 = vperm.slane %v4420_v3, 7  ;;  %v3511_v42 = vsel %vm547_vm3, %v3295_v15, %v5548_v34  ;;  %v6432_v51 = vld [vmem:[#allocation11_spill] sm:$0xff] }
 0x20f   : > { %v1027_v56 = vsel %vm952_vm10, %v6429_v26, 0.0  ;;  %v896_v62 = vsel %vm818_vm11, %v6430_v7, 0.0  ;;  %v3516_v52 = vsel %vm547_vm3, %v3302_v14, %v5552_v57  ;;  %v2417_v58 = vmul.f32 %v2089_v22, %v5556_v46  ;;  %3583 = vst [vmem:[%s5112_s21 + $0x40] sm:$0x3f] %v3511_v42  ;;  %3858 = vmatmul.msk.f32.gmra.mxu2 %vm728_vm13, %v6432_v51  ;;  %3870 = vmatmul.msk.f32.gmra.mxu3 %vm728_vm13, %v6432_v51 }
 0x210   : > { %v1063_v28 = vadd.f32 %v1027_v56, %v895_v60  ;;  %vm953_vm14 = vcmp.eq.s32.totalorder %v4101_v1, %v6431_v31  ;;  %v2418_v4 = vmul.f32 %v2142_v47, %v5581_v25  ;;  %v3252_v53 = vrot.slane %v3251_v12, 1  ;;  %3584 = vst [vmem:[%s5112_s21 + $0x48] sm:$0x3f] %v3516_v52  ;;  %3930 = vmatmul.msk.f32.gmra.mxu0 %vm728_vm13, %v6432_v51 }
 0x211   : > { %v3259_v29 = vrot.slane %v3258_v41, 1  ;;  %v5643_v3 = vadd.f32 %v1350_v33, %v1218_v18  ;;  %v6433_v34 = vperm.slane %v4415_v63, 7  ;;  %v2687_v57 = vadd.f32 %v2417_v58, %v2399_v49  ;;  %3942 = vmatmul.msk.f32.gmra.mxu1 %vm728_vm13, %v6432_v51  ;;  %v1824_v33 = vpop.f32.mrf.mxu3 }
 0x212   : > { %v2694_v37 = vadd.f32 %v2418_v4, %v2400_v10  ;;  %2190 = vmatpush.msra.mxu2 %v1063_v28  ;;  %v3479_v44 = vsel %vm541_vm2, %v5481_v11, %v5392_v0  ;;  %v3484_v18 = vsel %vm541_vm2, %v5483_v50, %v5401_v38  ;;  %v3253_v63 = vadd.f32 %v3252_v53, %v3251_v12  ;;  %v1771_v11 = vpop.f32.mrf.mxu2 }
 0x213   : > { %v1028_v60 = vsel %vm953_vm14, %v6433_v34, 0.0  ;;  %v3260_v16 = vadd.f32 %v3259_v29, %v3258_v41  ;;  %v3480_v49 = vsel %vm544_vm4, %v5562_v20, %v3479_v44  ;;  %v3485_v10 = vsel %vm544_vm4, %v5579_v5, %v3484_v18 }
 0x214   : > { %v1064_v19 = vadd.f32 %v1028_v60, %v896_v62  ;;  %v2393_v45 = vmul.f32 %v1768_v54, %v5515_v39  ;;  %v2394_v0 = vmul.f32 %v1821_v21, %v5541_v30  ;;  %v3481_v38 = vsel %vm547_vm3, %v3253_v63, %v3480_v49  ;;  %v2092_v54 = vpop.f32.mrf.mxu0  ;;  %v2145_v7 = vpop.f32.mrf.mxu1  ;;  %v6434_v21 = vld [vmem:[#allocation12_spill] sm:$0xff]  ;;  %v6435_v60 = vld [vmem:[#allocation13_spill] sm:$0xff] }
 0x215   : > { %v3486_v50 = vsel %vm547_vm3, %v3260_v16, %v3485_v10  ;;  %v2411_v15 = vmul.f32 %v1771_v11, %v5619_v8  ;;  %v2412_v14 = vmul.f32 %v1824_v33, %v5643_v3  ;;  %3577 = vst [vmem:[%s5112_s21 + $0x10] sm:$0x3f] %v3481_v38  ;;  %v2688_v20 = vrot.slane %v2687_v57, 4 }
 0x216   : > { %2243 = vmatpush.msra.mxu3 %v1064_v19  ;;  %3578 = vst [vmem:[%s5112_s21 + $0x18] sm:$0x3f] %v3486_v50  ;;  %v2695_v26 = vrot.slane %v2694_v37, 4  ;;  %v2435_v4 = vmul.f32 %v2092_v54, %v5429_v48  ;;  %v2436_v53 = vmul.f32 %v2145_v7, %v5478_v36 }
 0x217   : > { %v2645_v5 = vadd.f32 %v2411_v15, %v2393_v45  ;;  %v2652_v56 = vadd.f32 %v2412_v14, %v2394_v0  ;;  %3859 = vmatmul.msk.f32.gmra.mxu2 %vm728_vm13, %v6434_v21  ;;  %3871 = vmatmul.msk.f32.gmra.mxu3 %vm728_vm13, %v6434_v21  ;;  %v2689_v62 = vadd.f32 %v2688_v20, %v2687_v57 }
 0x218   : > { %3931 = vmatmul.msk.f32.gmra.mxu0 %vm728_vm13, %v6434_v21  ;;  %v2696_v12 = vadd.f32 %v2695_v26, %v2694_v37 }
 0x219   : > { %3943 = vmatmul.msk.f32.gmra.mxu1 %vm728_vm13, %v6434_v21  ;;  %v1827_v22 = vpop.f32.mrf.mxu3  ;;  %v2646_v47 = vrot.slane %v2645_v5, 4  ;;  %v2653_v28 = vrot.slane %v2652_v56, 4  ;;  %v2690_v31 = vrot.slane %v2689_v62, 2 }
 0x21a   : > { %v1774_v41 = vpop.f32.mrf.mxu2  ;;  %v2697_v42 = vrot.slane %v2696_v12, 2  ;;  %v2430_v11 = vmul.f32 %v1827_v22, %v5541_v30 }
 0x21b   : > { %v2647_v57 = vadd.f32 %v2646_v47, %v2645_v5  ;;  %v2654_v37 = vadd.f32 %v2653_v28, %v2652_v56  ;;  %v2691_v18 = vadd.f32 %v2690_v31, %v2689_v62  ;;  %v2429_v0 = vmul.f32 %v1774_v41, %v5515_v39  ;;  %v6436_v31 = vld [vmem:[#allocation14_spill] sm:$0xff] }
 0x21c   : > { %v2095_v52 = vpop.f32.mrf.mxu0  ;;  %v2148_v58 = vpop.f32.mrf.mxu1  ;;  %v2698_v63 = vadd.f32 %v2697_v42, %v2696_v12 }
 0x21d   : > { %v2453_v29 = vmul.f32 %v2095_v52, %v5556_v46  ;;  %v2454_v34 = vmul.f32 %v2148_v58, %v5581_v25  ;;  %v2648_v50 = vrot.slane %v2647_v57, 2  ;;  %v2655_v15 = vrot.slane %v2654_v37, 2 }
 0x21e   : > { %v2692_v12 = vrot.slane %v2691_v18, 1  ;;  %v2699_v47 = vrot.slane %v2698_v63, 1 }
 0x21f   : > { %3860 = vmatmul.msk.f32.gmra.mxu2 %vm728_vm13, %v6435_v60  ;;  %3872 = vmatmul.msk.f32.gmra.mxu3 %vm728_vm13, %v6435_v60  ;;  %v2813_v19 = vadd.f32 %v2453_v29, %v2435_v4  ;;  %v2820_v44 = vadd.f32 %v2454_v34, %v2436_v53  ;;  %v2649_v22 = vadd.f32 %v2648_v50, %v2647_v57 }
 0x220   : > { %3932 = vmatmul.msk.f32.gmra.mxu0 %vm728_vm13, %v6435_v60  ;;  %v2656_v42 = vadd.f32 %v2655_v15, %v2654_v37 }
 0x221   : > { %3944 = vmatmul.msk.f32.gmra.mxu1 %vm728_vm13, %v6435_v60  ;;  %v2814_v16 = vrot.slane %v2813_v19, 4  ;;  %v2821_v49 = vrot.slane %v2820_v44, 4  ;;  %v1830_v45 = vpop.f32.mrf.mxu3  ;;  %v2650_v57 = vrot.slane %v2649_v22, 1 }
 0x222   : > { %v1777_v10 = vpop.f32.mrf.mxu2  ;;  %v2448_v38 = vmul.f32 %v1830_v45, %v5643_v3  ;;  %v2657_v37 = vrot.slane %v2656_v42, 1 }
 0x223   : > { %v2447_v33 = vmul.f32 %v1777_v10, %v5619_v8  ;;  %v2815_v14 = vadd.f32 %v2814_v16, %v2813_v19  ;;  %v2822_v20 = vadd.f32 %v2821_v49, %v2820_v44  ;;  %v2693_v16 = vadd.f32 %v2692_v12, %v2691_v18 }
 0x224   : > { %v2778_v5 = vadd.f32 %v2448_v38, %v2430_v11  ;;  %v2098_v56 = vpop.f32.mrf.mxu0  ;;  %v2151_v54 = vpop.f32.mrf.mxu1  ;;  %v2700_v49 = vadd.f32 %v2699_v47, %v2698_v63 }
 0x225   : > { %v2771_v26 = vadd.f32 %v2447_v33, %v2429_v0  ;;  %v2816_v7 = vrot.slane %v2815_v14, 2  ;;  %v2823_v62 = vrot.slane %v2822_v20, 2  ;;  %v2471_v50 = vmul.f32 %v2098_v56, %v5429_v48 }
 0x226   : > { %v2779_v41 = vrot.slane %v2778_v5, 4  ;;  %v2472_v15 = vmul.f32 %v2151_v54, %v5478_v36  ;;  %v6437_v56 = vsub.f32 %v5292_v43, %v5296_v6 }
 0x227   : > { %v2772_v28 = vrot.slane %v2771_v26, 4  ;;  %3861 = vmatmul.msk.f32.gmra.mxu2 %vm728_vm13, %v6436_v31  ;;  %3873 = vmatmul.msk.f32.gmra.mxu3 %vm728_vm13, %v6436_v31  ;;  %v2817_v52 = vadd.f32 %v2816_v7, %v2815_v14  ;;  %v2824_v58 = vadd.f32 %v2823_v62, %v2822_v20 }
 0x228   : > { %3933 = vmatmul.msk.f32.gmra.mxu0 %vm728_vm13, %v6436_v31  ;;  %v2780_v53 = vadd.f32 %v2779_v41, %v2778_v5  ;;  %v754_v54 = vadd.f32 1.0, %v6437_v56  ;;  %v2658_v41 = vadd.f32 %v2657_v37, %v2656_v42 }
 0x229   : > { %v2773_v4 = vadd.f32 %v2772_v28, %v2771_v26  ;;  %3945 = vmatmul.msk.f32.gmra.mxu1 %vm728_vm13, %v6436_v31  ;;  %v2818_v29 = vrot.slane %v2817_v52, 1  ;;  %v2825_v34 = vrot.slane %v2824_v58, 1  ;;  %v1833_v44 = vpop.f32.mrf.mxu3  ;;  %v2651_v28 = vadd.f32 %v2650_v57, %v2649_v22 }
 0x22a   : > { %v1780_v19 = vpop.f32.mrf.mxu2  ;;  %v2781_v45 = vrot.slane %v2780_v53, 2 }
 0x22b   : > { %v2774_v10 = vrot.slane %v2773_v4, 2  ;;  %v2819_v0 = vadd.f32 %v2818_v29, %v2817_v52  ;;  %v2826_v11 = vadd.f32 %v2825_v34, %v2824_v58 }
 0x22c   : > { %v2782_v38 = vadd.f32 %v2781_v45, %v2780_v53  ;;  %v2101_v14 = vpop.f32.mrf.mxu0  ;;  %v2154_v20 = vpop.f32.mrf.mxu1  ;;  %v2466_v53 = vmul.f32 %v1833_v44, %v5541_v30  ;;  %v757_v45 = vmul.f32 23.5, %v754_v54 }
 0x22d   : > { %v2775_v33 = vadd.f32 %v2774_v10, %v2773_v4  ;;  %v5705_v26 = vsel %vm535_vm15, %v2819_v0, %v2693_v16  ;;  %v5708_v18 = vsel %vm535_vm15, %v2826_v11, %v2700_v49  ;;  %v2489_v63 = vmul.f32 %v2101_v14, %v5556_v46 }
 0x22e   : > { %v2490_v5 = vmul.f32 %v2154_v20, %v5581_v25  ;;  %v2783_v62 = vrot.slane %v2782_v38, 1  ;;  %v2465_v4 = vmul.f32 %v1780_v19, %v5515_v39  ;;  %v1087_v20 = vfloor.f32 %v757_v45 }
 0x22f   : > { %v2776_v7 = vrot.slane %v2775_v33, 1  ;;  %3862 = vmatmul.msk.f32.gmra.mxu2 %vm728_vm13, %v4490_v9  ;;  %3874 = vmatmul.msk.f32.gmra.mxu3 %vm728_vm13, %v4490_v9  ;;  %v2939_v12 = vadd.f32 %v2489_v63, %v2471_v50 }
 0x230   : > { %v2946_v47 = vadd.f32 %v2490_v5, %v2472_v15  ;;  %3934 = vmatmul.msk.f32.gmra.mxu0 %vm728_vm13, %v4490_v9  ;;  %v2784_v58 = vadd.f32 %v2783_v62, %v2782_v38  ;;  %v3986_v56 = vcvt.f32.s32 %v1087_v20 }
 0x231   : > { %v2777_v52 = vadd.f32 %v2776_v7, %v2775_v33  ;;  %3946 = vmatmul.msk.f32.gmra.mxu1 %vm728_vm13, %v4490_v9  ;;  %v2940_v29 = vrot.slane %v2939_v12, 4  ;;  %v1836_v6 = vpop.f32.mrf.mxu3 }
 0x232   : > { %v2947_v34 = vrot.slane %v2946_v47, 4  ;;  %v1783_v43 = vpop.f32.mrf.mxu2  ;;  %v5729_v49 = vsel %vm535_vm15, %v2784_v58, %v2658_v41  ;;  %v2484_v42 = vmul.f32 %v1836_v6, %v5643_v3  ;;  %v5751_v6 = vadd.s32 4294967280, %v3986_v56 }
 0x233   : > { %v5726_v16 = vsel %vm535_vm15, %v2777_v52, %v2651_v28  ;;  %v2483_v22 = vmul.f32 %v1783_v43, %v5619_v8  ;;  %v2941_v10 = vadd.f32 %v2940_v29, %v2939_v12 }
 0x234   : > { %v2948_v57 = vadd.f32 %v2947_v34, %v2946_v47  ;;  %v2904_v37 = vadd.f32 %v2484_v42, %v2466_v53  ;;  %v2104_v44 = vpop.f32.mrf.mxu0  ;;  %v2157_v0 = vpop.f32.mrf.mxu1 }
 0x235   : > { %v2897_v19 = vadd.f32 %v2483_v22, %v2465_v4  ;;  %v2942_v38 = vrot.slane %v2941_v10, 2  ;;  %v2507_v41 = vmul.f32 %v2104_v44, %v5429_v48  ;;  %v2508_v52 = vmul.f32 %v2157_v0, %v5478_v36 }
 0x236   : > { %v2905_v33 = vrot.slane %v2904_v37, 4  ;;  %v2949_v50 = vrot.slane %v2948_v57, 2 }
 0x237   : > { %v2898_v11 = vrot.slane %v2897_v19, 4  ;;  %3863 = vmatmul.msk.f32.gmra.mxu2 %vm728_vm13, %v4505_v23  ;;  %3875 = vmatmul.msk.f32.gmra.mxu3 %vm728_vm13, %v4505_v23  ;;  %v2943_v54 = vadd.f32 %v2942_v38, %v2941_v10 }
 0x238   : > { %3935 = vmatmul.msk.f32.gmra.mxu0 %vm728_vm13, %v4505_v23  ;;  %v2906_v14 = vadd.f32 %v2905_v33, %v2904_v37  ;;  %v2950_v12 = vadd.f32 %v2949_v50, %v2948_v57  ;;  %v5759_v50 = vsub.f32 %v757_v45, %v1087_v20 }
 0x239   : > { %v2899_v15 = vadd.f32 %v2898_v11, %v2897_v19  ;;  %3947 = vmatmul.msk.f32.gmra.mxu1 %vm728_vm13, %v4505_v23  ;;  %v1839_v5 = vpop.f32.mrf.mxu3  ;;  %v2944_v22 = vrot.slane %v2943_v54, 1 }
 0x23a   : > { %v1786_v63 = vpop.f32.mrf.mxu2  ;;  %v2907_v62 = vrot.slane %v2906_v14, 2  ;;  %v2951_v42 = vrot.slane %v2950_v12, 1  ;;  %v2502_v57 = vmul.f32 %v1839_v5, %v5541_v30  ;;  %v1153_v45 = vsub.f32 1.0, %v5759_v50 }
 0x23b   : > { %v2900_v7 = vrot.slane %v2899_v15, 2  ;;  %v2501_v10 = vmul.f32 %v1786_v63, %v5515_v39 }
 0x23c   : > { %v2107_v47 = vpop.f32.mrf.mxu0  ;;  %v2160_v28 = vpop.f32.mrf.mxu1  ;;  %v2908_v29 = vadd.f32 %v2907_v62, %v2906_v14  ;;  %v5762_v62 = vadd.s32 1, %v5751_v6 }
 0x23d   : > { %v2525_v58 = vmul.f32 %v2107_v47, %v5556_v46  ;;  %v2526_v4 = vmul.f32 %v2160_v28, %v5581_v25  ;;  %v2901_v53 = vadd.f32 %v2900_v7, %v2899_v15  ;;  %v2945_v28 = vadd.f32 %v2944_v22, %v2943_v54 }
 0x23e   : > { %v2909_v15 = vrot.slane %v2908_v29, 1 }
 0x23f   : > { %3864 = vmatmul.msk.f32.gmra.mxu2 %vm728_vm13, %v4515_v35  ;;  %3876 = vmatmul.msk.f32.gmra.mxu3 %vm728_vm13, %v4515_v35  ;;  %v3065_v34 = vadd.f32 %v2525_v58, %v2507_v41  ;;  %v3072_v43 = vadd.f32 %v2526_v4, %v2508_v52  ;;  %v2902_v11 = vrot.slane %v2901_v53, 1  ;;  %v2952_v41 = vadd.f32 %v2951_v42, %v2950_v12 }
 0x240   : > { %3936 = vmatmul.msk.f32.gmra.mxu0 %vm728_vm13, %v4515_v35  ;;  %v2910_v20 = vadd.f32 %v2909_v15, %v2908_v29  ;;  %v5773_v12 = vsel %vm538_vm1, %v2945_v28, %v5705_v26 }
 0x241   : > { %3948 = vmatmul.msk.f32.gmra.mxu1 %vm728_vm13, %v4515_v35  ;;  %v3066_v19 = vrot.slane %v3065_v34, 4  ;;  %v3073_v37 = vrot.slane %v3072_v43, 4  ;;  %v1842_v0 = vpop.f32.mrf.mxu3  ;;  %v2903_v58 = vadd.f32 %v2902_v11, %v2901_v53  ;;  %v5777_v53 = vsel %vm538_vm1, %v2952_v41, %v5708_v18 }
 0x242   : > { %v1789_v44 = vpop.f32.mrf.mxu2  ;;  %v2520_v38 = vmul.f32 %v1842_v0, %v5643_v3  ;;  %v5788_v26 = vsel %vm538_vm1, %v2910_v20, %v5729_v49  ;;  %v6296_v0 = vperm.slane %v5751_v6, 1  ;;  %v6300_v41 = vperm.slane %v5762_v62, 1 }
 0x243   : > { %v2519_v33 = vmul.f32 %v1789_v44, %v5619_v8  ;;  %v3067_v14 = vadd.f32 %v3066_v19, %v3065_v34  ;;  %v3074_v7 = vadd.f32 %v3073_v37, %v3072_v43  ;;  %v6299_v34 = vperm.slane %v5751_v6, 0 }
 0x244   : > { %v3030_v56 = vadd.f32 %v2520_v38, %v2502_v57  ;;  %v2110_v5 = vpop.f32.mrf.mxu0  ;;  %v2163_v47 = vpop.f32.mrf.mxu1  ;;  %v6298_v43 = vperm.slane %v5762_v62, 0  ;;  %v5781_v29 = vsel %vm538_vm1, %v2903_v58, %v5726_v16  ;;  %v5783_v19 = vperm.slane %v1153_v45, 0 }
 0x245   : > { %v3023_v63 = vadd.f32 %v2519_v33, %v2501_v10  ;;  %v3068_v52 = vrot.slane %v3067_v14, 2  ;;  %v3075_v4 = vrot.slane %v3074_v7, 2  ;;  %v6297_v37 = vperm.slane %v5759_v50, 0 }
 0x246   : > { %v3031_v54 = vrot.slane %v3030_v56, 4  ;;  %vm5793_vm12 = vcmp.eq.s32.totalorder %v4101_v1, %v6299_v34  ;;  %vm5800_vm5 = vcmp.eq.s32.totalorder %v4101_v1, %v6298_v43  ;;  %v2543_v49 = vmul.f32 %v2110_v5, %v5429_v48 }
 0x247   : > { %v3024_v44 = vrot.slane %v3023_v63, 4  ;;  %3901 = vmatmul.msk.f32.vlgmr.msra.gmra.mxu2 %vm728_vm13, %v4327_v2  ;;  %3913 = vmatmul.msk.f32.vlgmr.msra.gmra.mxu3 %vm728_vm13, %v4327_v2  ;;  %v3069_v10 = vadd.f32 %v3068_v52, %v3067_v14  ;;  %v3076_v57 = vadd.f32 %v3075_v4, %v3074_v7  ;;  %v2544_v38 = vmul.f32 %v2163_v47, %v5478_v36 }
 0x248   : > { %v3032_v33 = vadd.f32 %v3031_v54, %v3030_v56  ;;  %v1209_v56 = vsel %vm5793_vm12, %v5783_v19, 0.0  ;;  %v1341_v5 = vsel %vm5800_vm5, %v6297_v37, 0.0  ;;  %v5821_v47 = vperm.slane %v1153_v45, 1 }
 0x249   : > { %v3025_v22 = vadd.f32 %v3024_v44, %v3023_v63  ;;  %v1845_v2 = vpop.f32.mrf.mxu3  ;;  %v3070_v11 = vrot.slane %v3069_v10, 1  ;;  %v3077_v52 = vrot.slane %v3076_v57, 1  ;;  %vm5826_vm6 = vcmp.eq.s32.totalorder %v4101_v1, %v6296_v0 }
 0x24a   : > { %v1792_v42 = vpop.f32.mrf.mxu2  ;;  %v3033_v54 = vrot.slane %v3032_v33, 2  ;;  %v2538_v16 = vmul.f32 %v1845_v2, %v5541_v30  ;;  %vm1267_vm7 = vcmp.eq.s32.totalorder %v4101_v1, %v6300_v41  ;;  %v1167_v44 = vperm.slane %v4848_v40, 2 }
 0x24b   : > { %v3026_v7 = vrot.slane %v3025_v22, 2  ;;  %v3071_v20 = vadd.f32 %v3070_v11, %v3069_v10  ;;  %v2537_v18 = vmul.f32 %v1792_v42, %v5515_v39  ;;  %v1210_v10 = vsel %vm5826_vm6, %v5821_v47, 0.0 }
 0x24c   : > { %v2113_v15 = vpop.f32.mrf.mxu0  ;;  %v2166_v14 = vpop.f32.mrf.mxu1  ;;  %v6304_v11 = vperm.slane %v4865_v32, 2 }
 0x24d   : > { %v2561_v63 = vmul.f32 %v2113_v15, %v5556_v46  ;;  %v2562_v28 = vmul.f32 %v2166_v14, %v5581_v25  ;;  %v3027_v15 = vadd.f32 %v3026_v7, %v3025_v22  ;;  %v6303_v22 = vperm.slane %v4852_v55, 2 }
 0x24e   : > { %v3034_v7 = vadd.f32 %v3033_v54, %v3032_v33  ;;  %v1108_v33 = vperm.slane %v4852_v55, 3  ;;  %v5852_v54 = vadd.f32 %v1341_v5, %v1209_v56  ;;  %vm1260_vm0 = vcmp.eq.s32.totalorder %v4101_v1, %v6304_v11 }
 0x24f   : > { %3902 = vmatmul.msk.f32.gmra.mxu2 %vm728_vm13, %v6393_v61  ;;  %3914 = vmatmul.msk.f32.gmra.mxu3 %vm728_vm13, %v6393_v61  ;;  %v3191_v58 = vadd.f32 %v2561_v63, %v2543_v49  ;;  %v3198_v4 = vadd.f32 %v2562_v28, %v2544_v38  ;;  %v1306_v61 = vperm.slane %v5759_v50, 1  ;;  %v3078_v63 = vadd.f32 %v3077_v52, %v3076_v57 }
 0x250   : > { %v3028_v52 = vrot.slane %v3027_v15, 1  ;;  %vm1125_vm8 = vcmp.eq.s32.totalorder %v4101_v1, %v6303_v22  ;;  %vm5876_vm9 = vcmp.eq.s32.totalorder %v4101_v1, %v1108_v33 }
 0x251   : > { %v3192_v45 = vrot.slane %v3191_v58, 4  ;;  %v3199_v14 = vrot.slane %v3198_v4, 4  ;;  %v1848_v38 = vpop.f32.mrf.mxu3  ;;  %v1342_v57 = vsel %vm1267_vm7, %v1306_v61, 0.0  ;;  %v1203_v11 = vsel %vm1125_vm8, %v1167_v44, 0.0 }
 0x252   : > { %v1795_v49 = vpop.f32.mrf.mxu2  ;;  %v2556_v0 = vmul.f32 %v1848_v38, %v5643_v3  ;;  %vm1144_vm8 = vcmp.eq.s32.totalorder %v4120_v13, %v1108_v33 }
 0x253   : > { %v2555_v28 = vmul.f32 %v1795_v49, %v5619_v8  ;;  %v3193_v42 = vadd.f32 %v3192_v45, %v3191_v58  ;;  %v3200_v2 = vadd.f32 %v3199_v14, %v3198_v4  ;;  %v5864_v14 = vadd.f32 %v3028_v52, %v3027_v15 }
 0x254   : > { %v3156_v43 = vadd.f32 %v2556_v0, %v2538_v16  ;;  %v2116_v34 = vpop.f32.mrf.mxu0  ;;  %v2169_v41 = vpop.f32.mrf.mxu1  ;;  %v6305_v0 = vperm.slane %v4751_v17, 2  ;;  %v3035_v16 = vrot.slane %v3034_v7, 1  ;;  %v1300_v52 = vperm.slane %v4751_v17, 3 }
 0x255   : > { %v3149_v37 = vadd.f32 %v2555_v28, %v2537_v18  ;;  %v3194_v49 = vrot.slane %v3193_v42, 2  ;;  %v3201_v38 = vrot.slane %v3200_v2, 2  ;;  %v3529_v18 = vsel %vm541_vm2, %v3071_v20, %v5773_v12 }
 0x256   : > { %v3157_v58 = vrot.slane %v3156_v43, 4  ;;  %v1335_v12 = vsel %vm1260_vm0, %v6305_v0, 0.0  ;;  %v1168_v20 = vperm.slane %v4848_v40, 3 }
 0x257   : > { %v3150_v35 = vrot.slane %v3149_v37, 4  ;;  %3903 = vmatmul.msk.f32.gmra.mxu2 %vm728_vm13, %v6404_v27  ;;  %3915 = vmatmul.msk.f32.gmra.mxu3 %vm728_vm13, %v6404_v27  ;;  %v3195_v4 = vadd.f32 %v3194_v49, %v3193_v42  ;;  %v3534_v27 = vsel %vm541_vm2, %v3078_v63, %v5777_v53  ;;  %v3202_v45 = vadd.f32 %v3201_v38, %v3200_v2 }
 0x258   : > { %v5866_v42 = vadd.f32 %v1342_v57, %v1210_v10  ;;  %v1243_v49 = vperm.slane %v4865_v32, 3  ;;  %v3158_v22 = vadd.f32 %v3157_v58, %v3156_v43  ;;  %v6446_v43 = vperm.slane %v5751_v6, 0 }
 0x259   : > { %v3151_v56 = vadd.f32 %v3150_v35, %v3149_v37  ;;  %v1851_v28 = vpop.f32.mrf.mxu3  ;;  %v3196_v35 = vrot.slane %v3195_v4, 1  ;;  %v2579_v37 = vmul.f32 %v2116_v34, %v5429_v48  ;;  %v3203_v63 = vrot.slane %v3202_v45, 1 }
 0x25a   : > { %v1798_v5 = vpop.f32.mrf.mxu2  ;;  %vm5885_vm10 = vcmp.eq.s32.totalorder %v4120_v13, %v6446_v43  ;;  %v2580_v10 = vmul.f32 %v2169_v41, %v5478_v36  ;;  %v6449_v38 = vperm.slane %v5762_v62, 0  ;;  %vm1261_vm14 = vcmp.eq.s32.totalorder %v4101_v1, %v1243_v49 }
 0x25b   : > { %v3152_v48 = vrot.slane %v3151_v56, 2  ;;  %v5899_v43 = vadd.f32 %v3035_v16, %v3034_v7  ;;  %v3159_v36 = vrot.slane %v3158_v22, 2  ;;  %v5905_v41 = vadd.f32 %v1335_v12, %v1203_v11 }
 0x25c   : > { %v2119_v2 = vpop.f32.mrf.mxu0  ;;  %v2172_v57 = vpop.f32.mrf.mxu1  ;;  %vm1284_vm11 = vcmp.eq.s32.totalorder %v4120_v13, %v6449_v38  ;;  %v6450_v38 = vperm.slane %v5759_v50, 0  ;;  %v3204_v16 = vadd.f32 %v3203_v63, %v3202_v45  ;;  %v2573_v0 = vmul.f32 %v1798_v5, %v5515_v39 }
 0x25d   : > { %v2597_v34 = vmul.f32 %v2119_v2, %v5556_v46  ;;  %v2598_v58 = vmul.f32 %v2172_v57, %v5581_v25  ;;  %v1227_v46 = vsel %vm5885_vm10, %v5783_v19, 0.0  ;;  %v3197_v25 = vadd.f32 %v3196_v35, %v3195_v4 }
 0x25e   : > { %v1359_v7 = vsel %vm1284_vm11, %v6450_v38, 0.0  ;;  %v5921_v11 = vsel %vm1261_vm14, %v1300_v52, 0.0  ;;  %v3153_v19 = vadd.f32 %v3152_v48, %v3151_v56  ;;  %v2574_v4 = vmul.f32 %v1851_v28, %v5541_v30 }
 0x25f   : > { %3904 = vmatmul.msk.f32.gmra.mxu2 %vm728_vm13, %v6408_v59  ;;  %3916 = vmatmul.msk.f32.gmra.mxu3 %vm728_vm13, %v6408_v59  ;;  %v3317_v2 = vadd.f32 %v2597_v34, %v2579_v37  ;;  %v3324_v57 = vadd.f32 %v2598_v58, %v2580_v10  ;;  %v5917_v59 = vsel %vm5876_vm9, %v1168_v20, 0.0  ;;  %v3160_v45 = vadd.f32 %v3159_v36, %v3158_v22 }
 0x260   : > { %v5926_v63 = vadd.f32 %v1359_v7, %v1227_v46  ;;  %v3530_v53 = vsel %vm544_vm4, %v3197_v25, %v3529_v18  ;;  %v6451_v58 = vperm.slane %v5751_v6, 1  ;;  %v3535_v56 = vsel %vm544_vm4, %v3204_v16, %v3534_v27 }
 0x261   : > { %v3318_v12 = vrot.slane %v3317_v2, 4  ;;  %v3325_v35 = vrot.slane %v3324_v57, 4  ;;  %v1854_v15 = vpop.f32.mrf.mxu3  ;;  %v3154_v48 = vrot.slane %v3153_v19, 1  ;;  %v3161_v25 = vrot.slane %v3160_v45, 1 }
 0x262   : > { %v1801_v37 = vpop.f32.mrf.mxu2  ;;  %v2592_v5 = vmul.f32 %v1854_v15, %v5643_v3  ;;  %vm5932_vm12 = vcmp.eq.s32.totalorder %v4120_v13, %v6451_v58  ;;  %v6454_v3 = vperm.slane %v5762_v62, 1  ;;  %vm1279_vm0 = vcmp.eq.s32.totalorder %v4120_v13, %v1243_v49 }
 0x263   : > { %v2591_v39 = vmul.f32 %v1801_v37, %v5619_v8  ;;  %v3319_v10 = vadd.f32 %v3318_v12, %v3317_v2  ;;  %v3326_v34 = vadd.f32 %v3325_v35, %v3324_v57  ;;  %v1228_v27 = vsel %vm5932_vm12, %v5821_v47, 0.0 }
 0x264   : > { %v3282_v28 = vadd.f32 %v2592_v5, %v2574_v4  ;;  %v2298_v8 = vpop.f32.mrf.mxu0  ;;  %vm1285_vm5 = vcmp.eq.s32.totalorder %v4120_v13, %v6454_v3  ;;  %v2351_v6 = vpop.f32.mrf.mxu1  ;;  %v6455_v12 = vperm.slane %v4852_v55, 2  ;;  %v6456_v35 = vperm.slane %v4865_v32, 2 }
 0x265   : > { %v3275_v22 = vadd.f32 %v2591_v39, %v2573_v0  ;;  %v3320_v18 = vrot.slane %v3319_v10, 2  ;;  %v3327_v36 = vrot.slane %v3326_v34, 2  ;;  %v2403_v46 = vmul.f32 %v2298_v8, %v5852_v54 }
 0x266   : > { %v3283_v57 = vrot.slane %v3282_v28, 4  ;;  %v2404_v38 = vmul.f32 %v2351_v6, %v5866_v42  ;;  %v1360_v7 = vsel %vm1285_vm5, %v1306_v61, 0.0  ;;  %vm1143_vm6 = vcmp.eq.s32.totalorder %v4120_v13, %v6455_v12 }
 0x267   : > { %v3276_v2 = vrot.slane %v3275_v22, 4  ;;  %3905 = vmatmul.msk.f32.gmra.mxu2 %vm728_vm13, %v6420_v24  ;;  %3917 = vmatmul.msk.f32.gmra.mxu3 %vm728_vm13, %v6420_v24  ;;  %v3321_v62 = vadd.f32 %v3320_v18, %v3319_v10  ;;  %v3328_v0 = vadd.f32 %v3327_v36, %v3326_v34  ;;  %vm1278_vm7 = vcmp.eq.s32.totalorder %v4120_v13, %v6456_v35 }
 0x268   : > { %v3284_v4 = vadd.f32 %v3283_v57, %v3282_v28  ;;  %v3155_v50 = vadd.f32 %v3154_v48, %v3153_v19  ;;  %v5963_v5 = vadd.f32 %v1360_v7, %v1228_v27  ;;  %v1221_v58 = vsel %vm1143_vm6, %v1167_v44, 0.0 }
 0x269   : > { %v3277_v16 = vadd.f32 %v3276_v2, %v3275_v22  ;;  %v3322_v24 = vrot.slane %v3321_v62, 1  ;;  %v3329_v37 = vrot.slane %v3328_v0, 1  ;;  %v2033_v39 = vpop.f32.mrf.mxu3  ;;  %v6457_v30 = vperm.slane %v4751_v17, 2 }
 0x26a   : > { %v1980_v15 = vpop.f32.mrf.mxu2  ;;  %v3285_v61 = vrot.slane %v3284_v4, 2  ;;  %v1222_v49 = vsel %vm1144_vm8, %v1168_v20, 0.0  ;;  %v1354_v19 = vsel %vm1279_vm0, %v1300_v52, 0.0  ;;  %v3162_v3 = vadd.f32 %v3161_v25, %v3160_v45 }
 0x26b   : > { %v3278_v47 = vrot.slane %v3277_v16, 2  ;;  %v3323_v10 = vadd.f32 %v3322_v24, %v3321_v62  ;;  %v3330_v34 = vadd.f32 %v3329_v37, %v3328_v0  ;;  %v1353_v22 = vsel %vm1278_vm7, %v6457_v30, 0.0 }
 0x26c   : > { %v3286_v33 = vadd.f32 %v3285_v61, %v3284_v4  ;;  %v2301_v8 = vpop.f32.mrf.mxu0  ;;  %v2354_v36 = vpop.f32.mrf.mxu1  ;;  %v5982_v20 = vadd.f32 %v1353_v22, %v1221_v58  ;;  %v3499_v52 = vsel %vm541_vm2, %v5864_v14, %v5781_v29  ;;  %v5990_v45 = vadd.f32 %v5921_v11, %v5917_v59 }
 0x26d   : > { %v3279_v28 = vadd.f32 %v3278_v47, %v3277_v16  ;;  %v3531_v48 = vsel %vm547_vm3, %v3323_v10, %v3530_v53  ;;  %v3536_v18 = vsel %vm547_vm3, %v3330_v34, %v3535_v56  ;;  %v2421_v44 = vmul.f32 %v2301_v8, %v5926_v63 }
 0x26e   : > { %3587 = vst [vmem:[%s5112_s21 + $0x60] sm:$0x3f] %v3531_v48  ;;  %v3287_v2 = vrot.slane %v3286_v33, 1  ;;  %v2422_v57 = vmul.f32 %v2354_v36, %v5963_v5  ;;  %v5992_v56 = vadd.f32 %v1354_v19, %v1222_v49  ;;  %v3500_v27 = vsel %vm544_vm4, %v3155_v50, %v3499_v52 }
 0x26f   : > { %v3280_v6 = vrot.slane %v3279_v28, 1  ;;  %3906 = vmatmul.msk.f32.gmra.mxu2 %vm728_vm13, %v6432_v51  ;;  %3918 = vmatmul.msk.f32.gmra.mxu3 %vm728_vm13, %v6432_v51  ;;  %3588 = vst [vmem:[%s5112_s21 + $0x68] sm:$0x3f] %v3536_v18  ;;  %v2715_v53 = vadd.f32 %v2421_v44, %v2403_v46  ;;  %v3504_v51 = vsel %vm541_vm2, %v5899_v43, %v5788_v26 }
 0x270   : > { %v3288_v62 = vadd.f32 %v3287_v2, %v3286_v33  ;;  %v2722_v0 = vadd.f32 %v2422_v57, %v2404_v38  ;;  %v3505_v29 = vsel %vm544_vm4, %v3162_v3, %v3504_v51  ;;  %v2397_v46 = vmul.f32 %v1980_v15, %v5905_v41 }
 0x271   : > { %v3281_v25 = vadd.f32 %v3280_v6, %v3279_v28  ;;  %v2036_v7 = vpop.f32.mrf.mxu3  ;;  %v2398_v26 = vmul.f32 %v2033_v39, %v5990_v45  ;;  %v2716_v15 = vrot.slane %v2715_v53, 4 }
 0x272   : > { %v1983_v14 = vpop.f32.mrf.mxu2  ;;  %v3506_v11 = vsel %vm547_vm3, %v3288_v62, %v3505_v29  ;;  %v2416_v43 = vmul.f32 %v2036_v7, %v5992_v56  ;;  %v2723_v50 = vrot.slane %v2722_v0, 4 }
 0x273   : > { %v3501_v59 = vsel %vm547_vm3, %v3281_v25, %v3500_v27  ;;  %v2415_v16 = vmul.f32 %v1983_v14, %v5982_v20  ;;  %3582 = vst [vmem:[%s5112_s21 + $0x38] sm:$0x3f] %v3506_v11  ;;  %v2717_v61 = vadd.f32 %v2716_v15, %v2715_v53 }
 0x274   : > { %3581 = vst [vmem:[%s5112_s21 + $0x30] sm:$0x3f] %v3501_v59  ;;  %v2304_v4 = vpop.f32.mrf.mxu0  ;;  %v2680_v12 = vadd.f32 %v2416_v43, %v2398_v26  ;;  %v2357_v24 = vpop.f32.mrf.mxu1  ;;  %v2724_v10 = vadd.f32 %v2723_v50, %v2722_v0 }
 0x275   : > { %v2673_v38 = vadd.f32 %v2415_v16, %v2397_v46  ;;  %v2439_v35 = vmul.f32 %v2304_v4, %v5852_v54  ;;  %v2440_v37 = vmul.f32 %v2357_v24, %v5866_v42 }
 0x276   : > { %v2681_v58 = vrot.slane %v2680_v12, 4  ;;  %v2725_v8 = vrot.slane %v2724_v10, 2 }
 0x277   : > { %3907 = vmatmul.msk.f32.gmra.mxu2 %vm728_vm13, %v6434_v21  ;;  %3919 = vmatmul.msk.f32.gmra.mxu3 %vm728_vm13, %v6434_v21  ;;  %v2674_v34 = vrot.slane %v2673_v38, 4  ;;  %v2718_v21 = vrot.slane %v2717_v61, 2 }
 0x278   : > { %v2682_v3 = vadd.f32 %v2681_v58, %v2680_v12 }
 0x279   : > { %v2039_v47 = vpop.f32.mrf.mxu3  ;;  %v2675_v49 = vadd.f32 %v2674_v34, %v2673_v38  ;;  %v2719_v51 = vadd.f32 %v2718_v21, %v2717_v61 }
 0x27a   : > { %v1986_v39 = vpop.f32.mrf.mxu2  ;;  %v2434_v2 = vmul.f32 %v2039_v47, %v5990_v45  ;;  %v2683_v0 = vrot.slane %v2682_v3, 2 }
 0x27b   : > { %v2433_v18 = vmul.f32 %v1986_v39, %v5905_v41  ;;  %v2676_v25 = vrot.slane %v2675_v49, 2  ;;  %v2720_v43 = vrot.slane %v2719_v51, 1 }
 0x27c   : > { %v2307_v30 = vpop.f32.mrf.mxu0  ;;  %v2360_v28 = vpop.f32.mrf.mxu1 }
 0x27d   : > { %v2457_v22 = vmul.f32 %v2307_v30, %v5926_v63  ;;  %v2458_v33 = vmul.f32 %v2360_v28, %v5963_v5  ;;  %v2677_v4 = vadd.f32 %v2676_v25, %v2675_v49  ;;  %v2721_v58 = vadd.f32 %v2720_v43, %v2719_v51 }
 0x27f   : > { %3908 = vmatmul.msk.f32.gmra.mxu2 %vm728_vm13, %v6435_v60  ;;  %3920 = vmatmul.msk.f32.gmra.mxu3 %vm728_vm13, %v6435_v60  ;;  %v2841_v19 = vadd.f32 %v2457_v22, %v2439_v35  ;;  %v2848_v48 = vadd.f32 %v2458_v33, %v2440_v37  ;;  %v2726_v60 = vadd.f32 %v2725_v8, %v2724_v10  ;;  %v2678_v22 = vrot.slane %v2677_v4, 1 }
 0x280   : > { %v2684_v35 = vadd.f32 %v2683_v0, %v2682_v3 }
 0x281   : > { %v2842_v44 = vrot.slane %v2841_v19, 4  ;;  %v2042_v6 = vpop.f32.mrf.mxu3  ;;  %v2849_v57 = vrot.slane %v2848_v48, 4  ;;  %v2727_v38 = vrot.slane %v2726_v60, 1 }
 0x282   : > { %v1989_v36 = vpop.f32.mrf.mxu2  ;;  %v2452_v53 = vmul.f32 %v2042_v6, %v5992_v56  ;;  %v2685_v28 = vrot.slane %v2684_v35, 1 }
 0x283   : > { %v2451_v52 = vmul.f32 %v1989_v36, %v5982_v20  ;;  %v2843_v62 = vadd.f32 %v2842_v44, %v2841_v19  ;;  %v2850_v27 = vadd.f32 %v2849_v57, %v2848_v48  ;;  %v2728_v30 = vadd.f32 %v2727_v38, %v2726_v60 }
 0x284   : > { %v2806_v14 = vadd.f32 %v2452_v53, %v2434_v2  ;;  %v2310_v7 = vpop.f32.mrf.mxu0  ;;  %v2363_v11 = vpop.f32.mrf.mxu1  ;;  %v2686_v51 = vadd.f32 %v2685_v28, %v2684_v35 }
 0x285   : > { %v2799_v29 = vadd.f32 %v2451_v52, %v2433_v18  ;;  %v2844_v59 = vrot.slane %v2843_v62, 2  ;;  %v2851_v46 = vrot.slane %v2850_v27, 2  ;;  %v2475_v3 = vmul.f32 %v2310_v7, %v5852_v54 }
 0x286   : > { %v2807_v26 = vrot.slane %v2806_v14, 4  ;;  %v2476_v48 = vmul.f32 %v2363_v11, %v5866_v42  ;;  %v2679_v52 = vadd.f32 %v2678_v22, %v2677_v4 }
 0x287   : > { %v2800_v16 = vrot.slane %v2799_v29, 4  ;;  %3909 = vmatmul.msk.f32.gmra.mxu2 %vm728_vm13, %v6436_v31  ;;  %3921 = vmatmul.msk.f32.gmra.mxu3 %vm728_vm13, %v6436_v31  ;;  %v2845_v12 = vadd.f32 %v2844_v59, %v2843_v62  ;;  %v2852_v24 = vadd.f32 %v2851_v46, %v2850_v27 }
 0x288   : > { %v2808_v15 = vadd.f32 %v2807_v26, %v2806_v14 }
 0x289   : > { %v2801_v37 = vadd.f32 %v2800_v16, %v2799_v29  ;;  %v2846_v50 = vrot.slane %v2845_v12, 1  ;;  %v6029_v47 = vpop.f32.mrf.mxu3  ;;  %v2853_v61 = vrot.slane %v2852_v24, 1 }
 0x28a   : > { %v6027_v39 = vpop.f32.mrf.mxu2  ;;  %v2809_v34 = vrot.slane %v2808_v15, 2 }
 0x28b   : > { %v2802_v10 = vrot.slane %v2801_v37, 2  ;;  %v2847_v31 = vadd.f32 %v2846_v50, %v2845_v12  ;;  %v2854_v33 = vadd.f32 %v2853_v61, %v2852_v24 }
 0x28c   : > { %v2810_v8 = vadd.f32 %v2809_v34, %v2808_v15 }
 0x28d   : > { %v2803_v21 = vadd.f32 %v2802_v10, %v2801_v37  ;;  %v2313_v49 = vpop.f32.mrf.mxu0  ;;  %v3547_v19 = vsel %vm535_vm15, %v2847_v31, %v2721_v58  ;;  %v3552_v36 = vsel %vm535_vm15, %v2854_v33, %v2728_v30  ;;  %v6458_v33 = vld [vmem:[#allocation15_spill] sm:$0xff] }
 0x28e   : > { %v2493_v18 = vmul.f32 %v2313_v49, %v5926_v63  ;;  %v2366_v44 = vpop.f32.mrf.mxu1  ;;  %v2811_v2 = vrot.slane %v2810_v8, 1 }
 0x28f   : > { %v2804_v6 = vrot.slane %v2803_v21, 1  ;;  %v2494_v57 = vmul.f32 %v2366_v44, %v5963_v5  ;;  %3910 = vmatmul.msk.f32.gmra.mxu2 %vm728_vm13, %v4490_v9  ;;  %3922 = vmatmul.msk.f32.gmra.mxu3 %vm728_vm13, %v4490_v9 }
 0x290   : > { %v2967_v53 = vadd.f32 %v2493_v18, %v2475_v3  ;;  %v2812_v25 = vadd.f32 %v2811_v2, %v2810_v8 }
 0x291   : > { %v2805_v60 = vadd.f32 %v2804_v6, %v2803_v21  ;;  %v2974_v62 = vadd.f32 %v2494_v57, %v2476_v48  ;;  %v2469_v21 = vmul.f32 %v6027_v39, %v5905_v41 }
 0x292   : > { %v2968_v0 = vrot.slane %v2967_v53, 4  ;;  %v1995_v27 = vpop.f32.mrf.mxu2  ;;  %v2048_v29 = vpop.f32.mrf.mxu3  ;;  %v6045_v7 = vsel %vm535_vm15, %v2812_v25, %v2686_v51 }
 0x293   : > { %v6042_v14 = vsel %vm535_vm15, %v2805_v60, %v2679_v52  ;;  %v2975_v59 = vrot.slane %v2974_v62, 4  ;;  %v2487_v34 = vmul.f32 %v1995_v27, %v5982_v20  ;;  %v2488_v49 = vmul.f32 %v2048_v29, %v5992_v56 }
 0x294   : > { %v2969_v11 = vadd.f32 %v2968_v0, %v2967_v53 }
 0x295   : > { %v2976_v46 = vadd.f32 %v2975_v59, %v2974_v62  ;;  %v2316_v16 = vpop.f32.mrf.mxu0  ;;  %v2925_v3 = vadd.f32 %v2487_v34, %v2469_v21 }
 0x296   : > { %v2970_v9 = vrot.slane %v2969_v11, 2  ;;  %v2369_v26 = vpop.f32.mrf.mxu1  ;;  %v2511_v58 = vmul.f32 %v2316_v16, %v5852_v54 }
 0x297   : > { %v2977_v43 = vrot.slane %v2976_v46, 2  ;;  %3911 = vmatmul.msk.f32.gmra.mxu2 %vm728_vm13, %v4505_v23  ;;  %3923 = vmatmul.msk.f32.gmra.mxu3 %vm728_vm13, %v4505_v23  ;;  %v2512_v31 = vmul.f32 %v2369_v26, %v5866_v42  ;;  %v2926_v51 = vrot.slane %v2925_v3, 4 }
 0x298   : > { %v2971_v38 = vadd.f32 %v2970_v9, %v2969_v11 }
 0x299   : > { %v2978_v4 = vadd.f32 %v2977_v43, %v2976_v46  ;;  %v2927_v59 = vadd.f32 %v2926_v51, %v2925_v3  ;;  %v1111_v51 = vperm.slane %v4852_v55, 6 }
 0x29a   : > { %v2972_v12 = vrot.slane %v2971_v38, 1  ;;  %v1998_v35 = vpop.f32.mrf.mxu2  ;;  %v2051_v24 = vpop.f32.mrf.mxu3 }
 0x29b   : > { %v2979_v37 = vrot.slane %v2978_v4, 1  ;;  %vm1147_vm11 = vcmp.eq.s32.totalorder %v4120_v13, %v1111_v51 }
 0x29c   : > { %v2973_v15 = vadd.f32 %v2972_v12, %v2971_v38 }
 0x29d   : > { %v2980_v50 = vadd.f32 %v2979_v37, %v2978_v4  ;;  %v2319_v61 = vpop.f32.mrf.mxu0  ;;  %v2506_v4 = vmul.f32 %v2051_v24, %v5990_v45 }
 0x29e   : > { %v3548_v10 = vsel %vm538_vm1, %v2973_v15, %v3547_v19  ;;  %v2529_v30 = vmul.f32 %v2319_v61, %v5926_v63  ;;  %v2372_v22 = vpop.f32.mrf.mxu1 }
 0x29f   : > { %v3553_v23 = vsel %vm538_vm1, %v2980_v50, %v3552_v36  ;;  %v2530_v28 = vmul.f32 %v2372_v22, %v5963_v5  ;;  %3912 = vmatmul.msk.f32.gmra.mxu2 %vm728_vm13, %v6458_v33  ;;  %3924 = vmatmul.msk.f32.gmra.mxu3 %vm728_vm13, %v6458_v33  ;;  %v2470_v36 = vmul.f32 %v6029_v47, %v5990_v45  ;;  %v2928_v50 = vrot.slane %v2927_v59, 2 }
 0x2a0   : > { %v3093_v8 = vadd.f32 %v2529_v30, %v2511_v58  ;;  %v2505_v47 = vmul.f32 %v1998_v35, %v5905_v41  ;;  %vm1129_vm13 = vcmp.eq.s32.totalorder %v4101_v1, %v1111_v51 }
 0x2a1   : > { %v3100_v19 = vadd.f32 %v2530_v28, %v2512_v31  ;;  %v2932_v57 = vadd.f32 %v2488_v49, %v2470_v36  ;;  %v2929_v3 = vadd.f32 %v2928_v50, %v2927_v59 }
 0x2a2   : > { %v3094_v48 = vrot.slane %v3093_v8, 4  ;;  %v2001_v18 = vpop.f32.mrf.mxu2  ;;  %v2054_v44 = vpop.f32.mrf.mxu3 }
 0x2a3   : > { %v3101_v6 = vrot.slane %v3100_v19, 4  ;;  %v2933_v0 = vrot.slane %v2932_v57, 4  ;;  %v2523_v29 = vmul.f32 %v2001_v18, %v5982_v20  ;;  %v2524_v26 = vmul.f32 %v2054_v44, %v5992_v56 }
 0x2a4   : > { %v3095_v2 = vadd.f32 %v3094_v48, %v3093_v8 }
 0x2a5   : > { %v3102_v52 = vadd.f32 %v3101_v6, %v3100_v19  ;;  %v2322_v53 = vpop.f32.mrf.mxu0  ;;  %v2934_v38 = vadd.f32 %v2933_v0, %v2932_v57  ;;  %v3051_v37 = vadd.f32 %v2523_v29, %v2505_v47  ;;  %v3058_v22 = vadd.f32 %v2524_v26, %v2506_v4 }
 0x2a6   : > { %v3096_v60 = vrot.slane %v3095_v2, 2  ;;  %v2375_v25 = vpop.f32.mrf.mxu1  ;;  %v2547_v34 = vmul.f32 %v2322_v53, %v5852_v54  ;;  %v1246_v0 = vperm.slane %v4865_v32, 6  ;;  %v1303_v26 = vperm.slane %v4751_v17, 6 }
 0x2a7   : > { %v3103_v39 = vrot.slane %v3102_v52, 2  ;;  %v2548_v31 = vmul.f32 %v2375_v25, %v5866_v42  ;;  %v3052_v33 = vrot.slane %v3051_v37, 4  ;;  %v2935_v8 = vrot.slane %v2934_v38, 2 }
 0x2a8   : > { %v3097_v62 = vadd.f32 %v3096_v60, %v3095_v2  ;;  %v3059_v48 = vrot.slane %v3058_v22, 4  ;;  %vm1264_vm9 = vcmp.eq.s32.totalorder %v4101_v1, %v1246_v0  ;;  %vm1282_vm12 = vcmp.eq.s32.totalorder %v4120_v13, %v1246_v0 }
 0x2a9   : > { %v3104_v27 = vadd.f32 %v3103_v39, %v3102_v52  ;;  %v3053_v57 = vadd.f32 %v3052_v33, %v3051_v37  ;;  %v2936_v29 = vadd.f32 %v2935_v8, %v2934_v38  ;;  %v1339_v8 = vsel %vm1264_vm9, %v1303_v26, 0.0 }
 0x2aa   : > { %v3098_v11 = vrot.slane %v3097_v62, 1  ;;  %v2004_v46 = vpop.f32.mrf.mxu2  ;;  %v2057_v16 = vpop.f32.mrf.mxu3 }
 0x2ab   : > { %v3105_v9 = vrot.slane %v3104_v27, 1  ;;  %v2542_v36 = vmul.f32 %v2057_v16, %v5990_v45  ;;  %v1171_v16 = vperm.slane %v4848_v40, 6  ;;  %v3054_v47 = vrot.slane %v3053_v57, 2 }
 0x2ac   : > { %v3099_v43 = vadd.f32 %v3098_v11, %v3097_v62  ;;  %v3060_v11 = vadd.f32 %v3059_v48, %v3058_v22  ;;  %v2937_v50 = vrot.slane %v2936_v29, 1 }
 0x2ad   : > { %v3106_v12 = vadd.f32 %v3105_v9, %v3104_v27  ;;  %v2325_v15 = vpop.f32.mrf.mxu0  ;;  %v2930_v27 = vrot.slane %v2929_v3, 1  ;;  %v1207_v22 = vsel %vm1129_vm13, %v1171_v16, 0.0 }
 0x2ae   : > { %v3549_v61 = vsel %vm541_vm2, %v3099_v43, %v3548_v10  ;;  %v2565_v58 = vmul.f32 %v2325_v15, %v5926_v63  ;;  %v2378_v30 = vpop.f32.mrf.mxu1 }
 0x2af   : > { %v6075_v35 = vsel %vm541_vm2, %v3106_v12, %v3553_v23  ;;  %v2566_v28 = vmul.f32 %v2378_v30, %v5963_v5  ;;  %v2541_v23 = vmul.f32 %v2004_v46, %v5905_v41  ;;  %v6093_v38 = vadd.f32 %v2930_v27, %v2929_v3 }
 0x2b0   : > { %v3219_v24 = vadd.f32 %v2565_v58, %v2547_v34  ;;  %v3061_v58 = vrot.slane %v3060_v11, 2 }
 0x2b1   : > { %v3226_v21 = vadd.f32 %v2566_v28, %v2548_v31  ;;  %v1112_v31 = vperm.slane %v4852_v55, 7  ;;  %v3055_v28 = vadd.f32 %v3054_v47, %v3053_v57  ;;  %v1304_v47 = vperm.slane %v4751_v17, 7 }
 0x2b2   : > { %v3220_v49 = vrot.slane %v3219_v24, 4  ;;  %v2007_v19 = vpop.f32.mrf.mxu2  ;;  %v2060_v10 = vpop.f32.mrf.mxu3 }
 0x2b3   : > { %v3227_v18 = vrot.slane %v3226_v21, 4  ;;  %v2559_v44 = vmul.f32 %v2007_v19, %v5982_v20  ;;  %v2560_v2 = vmul.f32 %v2060_v10, %v5992_v56  ;;  %v3056_v57 = vrot.slane %v3055_v28, 1 }
 0x2b4   : > { %v3221_v6 = vadd.f32 %v3220_v49, %v3219_v24  ;;  %vm1130_vm10 = vcmp.eq.s32.totalorder %v4101_v1, %v1112_v31  ;;  %vm6133_vm5 = vcmp.eq.s32.totalorder %v4120_v13, %v1112_v31  ;;  %v1357_v31 = vsel %vm1282_vm12, %v1303_v26, 0.0 }
 0x2b5   : > { %v3228_v52 = vadd.f32 %v3227_v18, %v3226_v21  ;;  %v2328_v53 = vpop.f32.mrf.mxu0  ;;  %v3177_v25 = vadd.f32 %v2559_v44, %v2541_v23  ;;  %v3184_v39 = vadd.f32 %v2560_v2, %v2542_v36  ;;  %v6105_v18 = vadd.f32 %v2937_v50, %v2936_v29 }
 0x2b6   : > { %v3222_v60 = vrot.slane %v3221_v6, 2  ;;  %v2381_v62 = vpop.f32.mrf.mxu1  ;;  %v2583_v33 = vmul.f32 %v2328_v53, %v5852_v54  ;;  %v3062_v36 = vadd.f32 %v3061_v58, %v3060_v11  ;;  %v6113_v2 = vadd.f32 %v1339_v8, %v1207_v22 }
 0x2b7   : > { %v3229_v59 = vrot.slane %v3228_v52, 2  ;;  %v3178_v4 = vrot.slane %v3177_v25, 4  ;;  %v3185_v12 = vrot.slane %v3184_v39, 4  ;;  %v2584_v54 = vmul.f32 %v2381_v62, %v5866_v42 }
 0x2b8   : > { %v3223_v46 = vadd.f32 %v3222_v60, %v3221_v6 }
 0x2b9   : > { %v3230_v9 = vadd.f32 %v3229_v59, %v3228_v52  ;;  %v3179_v19 = vadd.f32 %v3178_v4, %v3177_v25  ;;  %v3186_v10 = vadd.f32 %v3185_v12, %v3184_v39  ;;  %v3063_v59 = vrot.slane %v3062_v36, 1 }
 0x2ba   : > { %v3224_v43 = vrot.slane %v3223_v46, 1  ;;  %v2010_v37 = vpop.f32.mrf.mxu2  ;;  %v2063_v15 = vpop.f32.mrf.mxu3 }
 0x2bb   : > { %v3231_v34 = vrot.slane %v3230_v9, 1  ;;  %v3180_v53 = vrot.slane %v3179_v19, 2  ;;  %v3187_v60 = vrot.slane %v3186_v10, 2 }
 0x2bc   : > { %v3225_v30 = vadd.f32 %v3224_v43, %v3223_v46 }
 0x2bd   : > { %v3232_v24 = vadd.f32 %v3231_v34, %v3230_v9  ;;  %v2331_v21 = vpop.f32.mrf.mxu0  ;;  %v3181_v12 = vadd.f32 %v3180_v53, %v3179_v19  ;;  %v1225_v34 = vsel %vm1147_vm11, %v1171_v16, 0.0  ;;  %v3523_v53 = vsel %vm538_vm1, %v6105_v18, %v6045_v7 }
 0x2be   : > { %v6102_v49 = vsel %vm544_vm4, %v3225_v30, %v3549_v61  ;;  %v2601_v3 = vmul.f32 %v2331_v21, %v5926_v63  ;;  %v2384_v48 = vpop.f32.mrf.mxu1  ;;  %v1172_v61 = vperm.slane %v4848_v40, 7  ;;  %v1247_v63 = vperm.slane %v4865_v32, 7 }
 0x2bf   : > { %v6109_v44 = vsel %vm544_vm4, %v3232_v24, %v6075_v35  ;;  %v2602_v23 = vmul.f32 %v2384_v48, %v5963_v5  ;;  %v2577_v35 = vmul.f32 %v2010_v37, %v5905_v41  ;;  %v2578_v5 = vmul.f32 %v2063_v15, %v5990_v45 }
 0x2c0   : > { %v3345_v6 = vadd.f32 %v2601_v3, %v2583_v33  ;;  %v1208_v46 = vsel %vm1130_vm10, %v1172_v61, 0.0  ;;  %v3057_v41 = vadd.f32 %v3056_v57, %v3055_v28  ;;  %v3188_v45 = vadd.f32 %v3187_v60, %v3186_v10 }
 0x2c1   : > { %v3352_v52 = vadd.f32 %v2602_v23, %v2584_v54  ;;  %vm1265_vm14 = vcmp.eq.s32.totalorder %v4101_v1, %v1247_v63  ;;  %vm1283_vm6 = vcmp.eq.s32.totalorder %v4120_v13, %v1247_v63  ;;  %v3182_v22 = vrot.slane %v3181_v12, 1 }
 0x2c2   : > { %v3346_v25 = vrot.slane %v3345_v6, 4  ;;  %v2013_v42 = vpop.f32.mrf.mxu2  ;;  %v2066_v39 = vpop.f32.mrf.mxu3  ;;  %v3189_v1 = vrot.slane %v3188_v45, 1  ;;  %v1340_v40 = vsel %vm1265_vm14, %v1304_v47, 0.0  ;;  %v3064_v21 = vadd.f32 %v3063_v59, %v3062_v36 }
 0x2c3   : > { %v3353_v62 = vrot.slane %v3352_v52, 4  ;;  %v2595_v27 = vmul.f32 %v2013_v42, %v5982_v20  ;;  %v2596_v29 = vmul.f32 %v2066_v39, %v5992_v56  ;;  %v1226_v19 = vsel %vm6133_vm5, %v1172_v61, 0.0 }
 0x2c4   : > { %v3347_v11 = vadd.f32 %v3346_v25, %v3345_v6  ;;  %v1358_v10 = vsel %vm1283_vm6, %v1304_v47, 0.0  ;;  %v6142_v54 = vadd.f32 %v1340_v40, %v1208_v46  ;;  %v3183_v23 = vadd.f32 %v3182_v22, %v3181_v12 }
 0x2c5   : > { %v3354_v9 = vadd.f32 %v3353_v62, %v3352_v52  ;;  %v3303_v43 = vadd.f32 %v2595_v27, %v2577_v35  ;;  %v3310_v4 = vadd.f32 %v2596_v29, %v2578_v5  ;;  %v3190_v6 = vadd.f32 %v3189_v1, %v3188_v45 }
 0x2c6   : > { %v3348_v37 = vrot.slane %v3347_v11, 2  ;;  %v6146_v52 = vadd.f32 %v1357_v31, %v1225_v34  ;;  %v6151_v61 = vadd.f32 %v1358_v10, %v1226_v19  ;;  %v3518_v63 = vsel %vm538_vm1, %v6093_v38, %v6042_v14 }
 0x2c7   : > { %v3355_v15 = vrot.slane %v3354_v9, 2  ;;  %v3304_v20 = vrot.slane %v3303_v43, 4  ;;  %v3311_v50 = vrot.slane %v3310_v4, 4  ;;  %v3524_v60 = vsel %vm541_vm2, %v3064_v21, %v3523_v53 }
 0x2c8   : > { %v3349_v56 = vadd.f32 %v3348_v37, %v3347_v11  ;;  %v3525_v42 = vsel %vm544_vm4, %v3190_v6, %v3524_v60 }
 0x2c9   : > { %v3356_v51 = vadd.f32 %v3355_v15, %v3354_v9  ;;  %v3305_v58 = vadd.f32 %v3304_v20, %v3303_v43  ;;  %v3312_v30 = vadd.f32 %v3311_v50, %v3310_v4 }
 0x2ca   : > { %v3350_v28 = vrot.slane %v3349_v56, 1  ;;  %v2192_v24 = vpop.f32.mrf.mxu2  ;;  %v2245_v16 = vpop.f32.mrf.mxu3 }
 0x2cb   : > { %v3357_v33 = vrot.slane %v3356_v51, 1  ;;  %v3306_v32 = vrot.slane %v3305_v58, 2  ;;  %v3313_v0 = vrot.slane %v3312_v30, 2  ;;  %v2401_v39 = vmul.f32 %v2192_v24, %v6113_v2 }
 0x2cc   : > { %v3351_v8 = vadd.f32 %v3350_v28, %v3349_v56  ;;  %v2402_v14 = vmul.f32 %v2245_v16, %v6142_v54 }
 0x2cd   : > { %v3358_v13 = vadd.f32 %v3357_v33, %v3356_v51  ;;  %v3307_v3 = vadd.f32 %v3306_v32, %v3305_v58  ;;  %v3314_v48 = vadd.f32 %v3313_v0, %v3312_v30 }
 0x2ce   : > { %v3551_v57 = vsel %vm547_vm3, %v3351_v8, %v6102_v49  ;;  %v3519_v49 = vsel %vm541_vm2, %v3057_v41, %v3518_v63 }
 0x2cf   : > { %3591 = vst [vmem:[%s5112_s21 + $0x80] sm:$0x3f] %v3551_v57  ;;  %v3556_v17 = vsel %vm547_vm3, %v3358_v13, %v6109_v44  ;;  %v3308_v26 = vrot.slane %v3307_v3, 1  ;;  %v3315_v36 = vrot.slane %v3314_v48, 1  ;;  %v3520_v25 = vsel %vm544_vm4, %v3183_v23, %v3519_v49 }
 0x2d0   : > { %3592 = vst [vmem:[%s5112_s21 + $0x88] sm:$0x3f] %v3556_v17 }
 0x2d1   : > { %v3309_v44 = vadd.f32 %v3308_v26, %v3307_v3  ;;  %v3316_v35 = vadd.f32 %v3315_v36, %v3314_v48 }
 0x2d2   : > { %v2195_v38 = vpop.f32.mrf.mxu2  ;;  %v2248_v5 = vpop.f32.mrf.mxu3 }
 0x2d3   : > { %v3521_v7 = vsel %vm547_vm3, %v3309_v44, %v3520_v25  ;;  %v3526_v18 = vsel %vm547_vm3, %v3316_v35, %v3525_v42  ;;  %v2419_v62 = vmul.f32 %v2195_v38, %v6146_v52  ;;  %v2420_v27 = vmul.f32 %v2248_v5, %v6151_v61 }
 0x2d4   : > { %3585 = vst [vmem:[%s5112_s21 + $0x50] sm:$0x3f] %v3521_v7 }
 0x2d5   : > { %3586 = vst [vmem:[%s5112_s21 + $0x58] sm:$0x3f] %v3526_v18  ;;  %v2701_v29 = vadd.f32 %v2419_v62, %v2401_v39  ;;  %v2708_v59 = vadd.f32 %v2420_v27, %v2402_v14 }
 0x2d7   : > { %v2702_v47 = vrot.slane %v2701_v29, 4  ;;  %v2709_v9 = vrot.slane %v2708_v59, 4 }
 0x2d9   : > { %v2703_v43 = vadd.f32 %v2702_v47, %v2701_v29  ;;  %v2710_v4 = vadd.f32 %v2709_v9, %v2708_v59 }
 0x2da   : > { %v2198_v11 = vpop.f32.mrf.mxu2  ;;  %v2251_v46 = vpop.f32.mrf.mxu3 }
 0x2db   : > { %v2437_v45 = vmul.f32 %v2198_v11, %v6113_v2  ;;  %v2438_v37 = vmul.f32 %v2251_v46, %v6142_v54  ;;  %v2704_v50 = vrot.slane %v2703_v43, 2  ;;  %v2711_v56 = vrot.slane %v2710_v4, 2 }
 0x2dd   : > { %v2705_v30 = vadd.f32 %v2704_v50, %v2703_v43  ;;  %v2712_v22 = vadd.f32 %v2711_v56, %v2710_v4 }
 0x2df   : > { %v2706_v32 = vrot.slane %v2705_v30, 1  ;;  %v2713_v0 = vrot.slane %v2712_v22, 1 }
 0x2e1   : > { %v2707_v10 = vadd.f32 %v2706_v32, %v2705_v30  ;;  %v2714_v13 = vadd.f32 %v2713_v0, %v2712_v22 }
 0x2e2   : > { %v2201_v41 = vpop.f32.mrf.mxu2  ;;  %v2254_v12 = vpop.f32.mrf.mxu3 }
 0x2e3   : > { %v2455_v15 = vmul.f32 %v2201_v41, %v6146_v52  ;;  %v2456_v20 = vmul.f32 %v2254_v12, %v6151_v61 }
 0x2e5   : > { %v2827_v34 = vadd.f32 %v2455_v15, %v2437_v45  ;;  %v2834_v55 = vadd.f32 %v2456_v20, %v2438_v37 }
 0x2e7   : > { %v2828_v51 = vrot.slane %v2827_v34, 4  ;;  %v2835_v58 = vrot.slane %v2834_v55, 4 }
 0x2e9   : > { %v2829_v1 = vadd.f32 %v2828_v51, %v2827_v34  ;;  %v2836_v28 = vadd.f32 %v2835_v58, %v2834_v55 }
 0x2ea   : > { %v2204_v24 = vpop.f32.mrf.mxu2  ;;  %v2257_v40 = vpop.f32.mrf.mxu3 }
 0x2eb   : > { %v2830_v16 = vrot.slane %v2829_v1, 2  ;;  %v2837_v33 = vrot.slane %v2836_v28, 2  ;;  %v2473_v39 = vmul.f32 %v2204_v24, %v6113_v2  ;;  %v2474_v14 = vmul.f32 %v2257_v40, %v6142_v54 }
 0x2ed   : > { %v2831_v31 = vadd.f32 %v2830_v16, %v2829_v1  ;;  %v2838_v21 = vadd.f32 %v2837_v33, %v2836_v28 }
 0x2ef   : > { %v2832_v8 = vrot.slane %v2831_v31, 1  ;;  %v2839_v19 = vrot.slane %v2838_v21, 1 }
 0x2f1   : > { %v2833_v3 = vadd.f32 %v2832_v8, %v2831_v31  ;;  %v2840_v48 = vadd.f32 %v2839_v19, %v2838_v21 }
 0x2f2   : > { %v2207_v23 = vpop.f32.mrf.mxu2  ;;  %v2260_v6 = vpop.f32.mrf.mxu3 }
 0x2f3   : > { %v6177_v57 = vsel %vm535_vm15, %v2833_v3, %v2707_v10  ;;  %v6180_v17 = vsel %vm535_vm15, %v2840_v48, %v2714_v13  ;;  %v2491_v44 = vmul.f32 %v2207_v23, %v6146_v52  ;;  %v2492_v35 = vmul.f32 %v2260_v6, %v6151_v61 }
 0x2f5   : > { %v2953_v29 = vadd.f32 %v2491_v44, %v2473_v39  ;;  %v2960_v59 = vadd.f32 %v2492_v35, %v2474_v14 }
 0x2f7   : > { %v2954_v41 = vrot.slane %v2953_v29, 4  ;;  %v2961_v12 = vrot.slane %v2960_v59, 4 }
 0x2f9   : > { %v2955_v34 = vadd.f32 %v2954_v41, %v2953_v29  ;;  %v2962_v55 = vadd.f32 %v2961_v12, %v2960_v59 }
 0x2fa   : > { %v2210_v26 = vpop.f32.mrf.mxu2  ;;  %v2263_v36 = vpop.f32.mrf.mxu3 }
 0x2fb   : > { %v2509_v7 = vmul.f32 %v2210_v26, %v6113_v2  ;;  %v2510_v18 = vmul.f32 %v2263_v36, %v6142_v54  ;;  %v2956_v1 = vrot.slane %v2955_v34, 2  ;;  %v2963_v28 = vrot.slane %v2962_v55, 2 }
 0x2fd   : > { %v2957_v10 = vadd.f32 %v2956_v1, %v2955_v34  ;;  %v2964_v13 = vadd.f32 %v2963_v28, %v2962_v55 }
 0x302   : > { %v2213_v63 = vpop.f32.mrf.mxu2  ;;  %v2266_v53 = vpop.f32.mrf.mxu3 }
 0x303   : > { %v2527_v25 = vmul.f32 %v2213_v63, %v6146_v52  ;;  %v2528_v42 = vmul.f32 %v2266_v53, %v6151_v61 }
 0x305   : > { %v3079_v47 = vadd.f32 %v2527_v25, %v2509_v7  ;;  %v3086_v9 = vadd.f32 %v2528_v42, %v2510_v18 }
 0x307   : > { %v3080_v45 = vrot.slane %v3079_v47, 4  ;;  %v3087_v37 = vrot.slane %v3086_v9, 4 }
 0x309   : > { %v3081_v51 = vadd.f32 %v3080_v45, %v3079_v47  ;;  %v3088_v58 = vadd.f32 %v3087_v37, %v3086_v9 }
 0x30a   : > { %v2216_v49 = vpop.f32.mrf.mxu2  ;;  %v2269_v60 = vpop.f32.mrf.mxu3 }
 0x30b   : > { %v2545_v11 = vmul.f32 %v2216_v49, %v6113_v2  ;;  %v2546_v46 = vmul.f32 %v2269_v60, %v6142_v54  ;;  %v3082_v24 = vrot.slane %v3081_v51, 2  ;;  %v3089_v40 = vrot.slane %v3088_v58, 2 }
 0x30c   : > { %v2958_v49 = vrot.slane %v2957_v10, 1  ;;  %v2965_v60 = vrot.slane %v2964_v13, 1 }
 0x30d   : > { %v3083_v3 = vadd.f32 %v3082_v24, %v3081_v51  ;;  %v3090_v48 = vadd.f32 %v3089_v40, %v3088_v58 }
 0x30e   : > { %v2959_v39 = vadd.f32 %v2958_v49, %v2957_v10  ;;  %v2966_v14 = vadd.f32 %v2965_v60, %v2964_v13 }
 0x30f   : > { %v3084_v44 = vrot.slane %v3083_v3, 1 }
 0x312   : > { %v2219_v38 = vpop.f32.mrf.mxu2  ;;  %v2272_v5 = vpop.f32.mrf.mxu3 }
 0x313   : > { %v2563_v62 = vmul.f32 %v2219_v38, %v6146_v52  ;;  %v2564_v27 = vmul.f32 %v2272_v5, %v6151_v61  ;;  %v3085_v38 = vadd.f32 %v3084_v44, %v3083_v3 }
 0x315   : > { %v3205_v43 = vadd.f32 %v2563_v62, %v2545_v11  ;;  %v3212_v4 = vadd.f32 %v2564_v27, %v2546_v46  ;;  %v3538_v11 = vsel %vm538_vm1, %v2959_v39, %v6177_v57  ;;  %v3543_v46 = vsel %vm538_vm1, %v2966_v14, %v6180_v17 }
 0x316   : > { %v3539_v47 = vsel %vm541_vm2, %v3085_v38, %v3538_v11 }
 0x317   : > { %v3206_v15 = vrot.slane %v3205_v43, 4  ;;  %v3213_v20 = vrot.slane %v3212_v4, 4 }
 0x319   : > { %v3207_v30 = vadd.f32 %v3206_v15, %v3205_v43  ;;  %v3214_v22 = vadd.f32 %v3213_v20, %v3212_v4 }
 0x31a   : > { %v2222_v50 = vpop.f32.mrf.mxu2  ;;  %v2275_v56 = vpop.f32.mrf.mxu3 }
 0x31b   : > { %v3208_v16 = vrot.slane %v3207_v30, 2  ;;  %v3215_v33 = vrot.slane %v3214_v22, 2  ;;  %v2581_v31 = vmul.f32 %v2222_v50, %v6113_v2  ;;  %v2582_v21 = vmul.f32 %v2275_v56, %v6142_v54 }
 0x31c   : > { %v3091_v2 = vrot.slane %v3090_v48, 1 }
 0x31d   : > { %v3209_v26 = vadd.f32 %v3208_v16, %v3207_v30  ;;  %v3216_v36 = vadd.f32 %v3215_v33, %v3214_v22 }
 0x31e   : > { %v3092_v5 = vadd.f32 %v3091_v2, %v3090_v48 }
 0x31f   : > { %v3210_v25 = vrot.slane %v3209_v26, 1 }
 0x320   : > { %v3544_v9 = vsel %vm541_vm2, %v3092_v5, %v3543_v46 }
 0x321   : > { %v3211_v62 = vadd.f32 %v3210_v25, %v3209_v26 }
 0x322   : > { %v2225_v32 = vpop.f32.mrf.mxu2  ;;  %v2278_v0 = vpop.f32.mrf.mxu3 }
 0x323   : > { %v2599_v8 = vmul.f32 %v2225_v32, %v6146_v52  ;;  %v2600_v19 = vmul.f32 %v2278_v0, %v6151_v61  ;;  %v3217_v52 = vrot.slane %v3216_v36, 1  ;;  %v3540_v41 = vsel %vm544_vm4, %v3211_v62, %v3539_v47 }
 0x325   : > { %v3331_v23 = vadd.f32 %v2599_v8, %v2581_v31  ;;  %v3338_v6 = vadd.f32 %v2600_v19, %v2582_v21  ;;  %v3218_v27 = vadd.f32 %v3217_v52, %v3216_v36 }
 0x327   : > { %v3332_v63 = vrot.slane %v3331_v23, 4  ;;  %v3339_v53 = vrot.slane %v3338_v6, 4  ;;  %v3545_v12 = vsel %vm544_vm4, %v3218_v27, %v3544_v9 }
 0x329   : > { %v3333_v35 = vadd.f32 %v3332_v63, %v3331_v23  ;;  %v3340_v54 = vadd.f32 %v3339_v53, %v3338_v6 }
 0x32b   : > { %v3334_v42 = vrot.slane %v3333_v35, 2  ;;  %v3341_v61 = vrot.slane %v3340_v54, 2 }
 0x32d   : > { %v3335_v7 = vadd.f32 %v3334_v42, %v3333_v35  ;;  %v3342_v18 = vadd.f32 %v3341_v61, %v3340_v54 }
 0x32f   : > { %v3336_v29 = vrot.slane %v3335_v7, 1  ;;  %v3343_v59 = vrot.slane %v3342_v18, 1 }
 0x331   : > { %v3337_v43 = vadd.f32 %v3336_v29, %v3335_v7  ;;  %v3344_v4 = vadd.f32 %v3343_v59, %v3342_v18 }
 0x333   : > { %v3541_v45 = vsel %vm547_vm3, %v3337_v43, %v3540_v41  ;;  %v3546_v37 = vsel %vm547_vm3, %v3344_v4, %v3545_v12 }
 0x334   : > { %3589 = vst [vmem:[%s5112_s21 + $0x70] sm:$0x3f] %v3541_v45 }
 0x335   : > { %3590 = vst [vmem:[%s5112_s21 + $0x78] sm:$0x3f] %v3546_v37 }
 0x336 PF: > { %s20_s27 = sadd.s32 1, %s4033_s27  }
 0x337   : > { %p17_p7 = scmp.ge.s32.totalorder %s20_s27, 4  }
 0x339   :  { %19 = sbr.rel (!%p17_p7) target bundleno = 1 (0x1), region = 98 }
 0x33e   :  { %3630 = vsyncpa [#allocation3], 1 }
 0x33f   :  { %3632 = vsyncpa [#allocation3 + $0x1], 1 }

</bundles_post_ra>
